<compile_context>
chip_gen: v7x
topology: tpu7x:2x2x1
jax: 0.10.0
libtpu: 0.0.40
codegen_flags: <defaults>
</compile_context>

<pallas_src>
import functools

import numpy as np
import jax
import jax.numpy as jnp
from jax.experimental import pallas as pl
from jax.experimental.pallas import tpu as pltpu

NUM_FILTERS = 48             # fixed by the module
MXU_DTYPE = jnp.bfloat16     # bf16 matmul operands (f32 accumulation)


# --------------------------------------------------------------------------
# Kernel: one (batch-chunk, residual-block) grid step
# --------------------------------------------------------------------------
def larva_body_kernel(res_ref, fea_ref, w1_ref, b1_ref, w2_ref, b2_ref,
                      out_fea_ref, out_res_ref, cur_ref, mid_ref, *, pad_h):
    """Grid = (chunks, num_blocks).  One residual block for one batch-chunk.

    Layout: images stacked row-wise, lane-flattened.
      res_ref / fea_ref : (RC, L)  RC = NB*(H+2) rows (1-row zero pad/image),
                                   L = W*C lanes (multiple of 128)
      w1/w2             : (1, 3, L, L)  this block's width-banded conv weights
      b1/b2             : (1, 1, L)     this block's bias tiled over W
      out_fea/out_res   : (RC, L)       written only at the last block
      cur_ref           : (RC, L) f32   carried residual (persists over blocks)
      mid_ref           : (RC, L) f32   conv1 output (ReLU), zero border rows
    """
    blk = pl.program_id(1)
    nb = pl.num_programs(1)
    RC, L = cur_ref.shape
    M = RC - 2                       # interior rows (shifted-matmul output rows)
    mxu_dt = w1_ref.dtype

    # Per-image pad-row validity mask for the M interior-aligned rows:
    # stacked row r = j + 1; position inside one padded image = r % pad_h;
    # valid iff 1 <= pos <= H.  Broadcast once, reused at both masking sites.
    r_idx = jax.lax.broadcasted_iota(jnp.int32, (M, 1), 0) + 1
    pos = r_idx % pad_h
    mask = jnp.broadcast_to(
        jnp.logical_and(pos >= 1, pos <= pad_h - 2).astype(jnp.float32), (M, L))

    @pl.when(blk == 0)
    def _():
        # New chunk: load the block-chain input into the carried scratch and
        # zero the chunk-border rows of the conv1-output scratch (they are
        # never written again, so they stay zero for the whole chain).
        cur_ref[...] = res_ref[...]
        zrow = jnp.zeros((1, L), jnp.float32)
        mid_ref[0:1, :] = zrow
        mid_ref[RC - 1:RC, :] = zrow

    # ---- conv1: 3 row-shifted banded matmuls (bf16 x bf16 -> f32 acc),
    #      bias used as accumulator init; contiguous dot chain for MRB fusion.
    acc = b1_ref[0]                                        # (1, L) f32
    for dy in range(3):
        acc = acc + jnp.dot(cur_ref[dy:dy + M, :].astype(mxu_dt),
                            w1_ref[0, dy],
                            preferred_element_type=jnp.float32)
    mid_ref[1:RC - 1, :] = jnp.maximum(acc, 0.0) * mask    # ReLU, zero pad rows

    # ---- conv2 + residual add with the block input ----
    acc2 = b2_ref[0]
    for dy in range(3):
        acc2 = acc2 + jnp.dot(mid_ref[dy:dy + M, :].astype(mxu_dt),
                              w2_ref[0, dy],
                              preferred_element_type=jnp.float32)
    new_res = (acc2 + cur_ref[1:RC - 1, :]) * mask         # keep pad rows zero

    @pl.when(blk < nb - 1)
    def _():
        cur_ref[1:RC - 1, :] = new_res                     # carry to next block

    @pl.when(blk == nb - 1)
    def _():
        zrow = jnp.zeros((1, L), jnp.float32)
        out_res_ref[0:1, :] = zrow
        out_res_ref[RC - 1:RC, :] = zrow
        out_res_ref[1:RC - 1, :] = new_res
        out_fea_ref[0:1, :] = zrow
        out_fea_ref[RC - 1:RC, :] = zrow
        out_fea_ref[1:RC - 1, :] = fea_ref[1:RC - 1, :] + new_res


# --------------------------------------------------------------------------
# Glue: layout conversion and banded-weight preparation (done once)
# --------------------------------------------------------------------------
def _make_banded(w_oihw, W):
    """(C,C,3,3) OIHW -> (3, W*C, W*C): one width-banded matrix per vertical tap.

    Wb[dy][w_in*C + c_in, w_out*C + c_out] = w[c_out, c_in, dy, w_in - w_out + 1]
    (zero where the horizontal tap falls outside [0, W) -> width zero-padding
    is baked into the band structure).
    """
    w = np.asarray(w_oihw, dtype=np.float32)
    C = w.shape[0]
    L = W * C
    Wb = np.zeros((3, L, L), dtype=np.float32)
    for dy in range(3):
        for kx in range(3):
            blk = w[:, :, dy, kx].T          # (C_in, C_out)
            for wo in range(W):
                wi = wo + kx - 1
                if 0 <= wi < W:
                    Wb[dy, wi * C:(wi + 1) * C, wo * C:(wo + 1) * C] = blk
    return Wb


def prepare_banded_params(params, W):
    """params: list of (w1, b1, w2, b2) with w OIHW (C,C,3,3), b (C,)."""
    w1s, b1s, w2s, b2s = [], [], [], []
    for (w1, b1, w2, b2) in params:
        w1s.append(_make_banded(w1, W))
        w2s.append(_make_banded(w2, W))
        b1s.append(np.tile(np.asarray(b1, dtype=np.float32), W)[None])
        b2s.append(np.tile(np.asarray(b2, dtype=np.float32), W)[None])
    return (jnp.asarray(np.stack(w1s), dtype=MXU_DTYPE),
            jnp.asarray(np.stack(b1s), dtype=jnp.float32),
            jnp.asarray(np.stack(w2s), dtype=MXU_DTYPE),
            jnp.asarray(np.stack(b2s), dtype=jnp.float32))


def _to_padded_rows(x_nchw):
    N, C, H, W = x_nchw.shape
    x = jnp.transpose(x_nchw, (0, 2, 3, 1)).reshape(N, H, W * C)
    x = jnp.pad(x, ((0, 0), (1, 1), (0, 0)))
    return x.reshape(N * (H + 2), W * C)


def _from_padded_rows(rows, N, C, H, W):
    x = rows.reshape(N, H + 2, W * C)[:, 1:H + 1, :]
    return jnp.transpose(x.reshape(N, H, W, C), (0, 3, 1, 2))


def _choose_chunk_images(n_images, pad_h, target_rows=512):
    """Images per chunk: chunk rows % 8 == 0, chunk boundary = image boundary,
    prefer >= 2 chunks (v7x megacore) with rows near `target_rows`."""
    cands = [nb for nb in range(1, n_images + 1)
             if n_images % nb == 0 and (nb * pad_h) % 8 == 0]
    if not cands:
        return n_images          # single chunk: block shape == full array dims
    multi = [nb for nb in cands if n_images // nb >= 2]
    pool = multi if multi else cands
    return min(pool, key=lambda nb: abs(nb * pad_h - target_rows))


def larva_body_forward(fea_nchw, res_nchw, banded_params, num_blocks):
    """fea, res: (N, 48, H, W) -> (fea + res_blocks(res), res_blocks(res))."""
    N, C, H, W = fea_nchw.shape
    assert C == NUM_FILTERS
    assert num_blocks >= 1
    L = W * C
    # lane-dense design constraint (48 * W must be a multiple of 128)
    assert L % 128 == 0, "W must be a multiple of 8 for lane-dense rows"

    pad_h = H + 2
    R = N * pad_h
    w1_all, b1_all, w2_all, b2_all = banded_params
    assert w1_all.shape[0] == num_blocks

    res_rows = _to_padded_rows(res_nchw)
    fea_rows = _to_padded_rows(fea_nchw)

    nb_img = _choose_chunk_images(N, pad_h)
    num_chunks = N // nb_img
    RC = nb_img * pad_h                       # rows per chunk

    # VMEM budget: double-buffered in/out chunks + f32 scratch + per-block
    # streamed weights (re-derived per shape; clamped to a v7x-safe ceiling).
    w_item = w1_all.dtype.itemsize
    chunk_bytes = RC * L * 4
    w_block_bytes = 3 * L * L * w_item
    vmem_need = (4 * 2 * chunk_bytes          # res/fea in + 2 outs, 2-buffered
                 + 2 * RC * L * 4             # cur/mid f32 scratch
                 + 2 * 2 * w_block_bytes      # w1/w2 streamed, 2-buffered
                 + 4 * 2 * L * 4)             # biases
    vmem_limit = int(min(max(2 * vmem_need, 32 << 20), 48 << 20))

    kernel = functools.partial(larva_body_kernel, pad_h=pad_h)

    out_fea_rows, out_res_rows = pl.pallas_call(
        kernel,
        out_shape=(jax.ShapeDtypeStruct((R, L), jnp.float32),
                   jax.ShapeDtypeStruct((R, L), jnp.float32)),
        grid_spec=pltpu.PrefetchScalarGridSpec(
            num_scalar_prefetch=0,
            grid=(num_chunks, num_blocks),
            in_specs=[
                pl.BlockSpec((RC, L), lambda i, b: (i, 0)),          # res chunk
                pl.BlockSpec((RC, L), lambda i, b: (i, 0)),          # fea chunk
                pl.BlockSpec((1, 3, L, L), lambda i, b: (b, 0, 0, 0)),  # w1[blk]
                pl.BlockSpec((1, 1, L), lambda i, b: (b, 0, 0)),        # b1[blk]
                pl.BlockSpec((1, 3, L, L), lambda i, b: (b, 0, 0, 0)),  # w2[blk]
                pl.BlockSpec((1, 1, L), lambda i, b: (b, 0, 0)),        # b2[blk]
            ],
            out_specs=[pl.BlockSpec((RC, L), lambda i, b: (i, 0)),
                       pl.BlockSpec((RC, L), lambda i, b: (i, 0))],
            scratch_shapes=[pltpu.VMEM((RC, L), jnp.float32),   # carried res
                            pltpu.VMEM((RC, L), jnp.float32)],  # conv1 output
        ),
        compiler_params=pltpu.CompilerParams(
            dimension_semantics=("parallel", "arbitrary"),
            vmem_limit_bytes=vmem_limit),
        input_output_aliases={0: 1},   # res_rows HBM buffer reused for out_res
    )(res_rows, fea_rows, w1_all, b1_all, w2_all, b2_all)

    out_fea = _from_padded_rows(out_fea_rows, N, C, H, W)
    out_res = _from_padded_rows(out_res_rows, N, C, H, W)
    return out_fea, out_res


# --------------------------------------------------------------------------
# Plain-JAX reference (matches PyTorch semantics, f32)
# --------------------------------------------------------------------------
def _reference(fea, res, params):
    def conv(x, w, b):
        y = jax.lax.conv_general_dilated(
            x, w, window_strides=(1, 1), padding=((1, 1), (1, 1)),
            dimension_numbers=('NCHW', 'OIHW', 'NCHW'))
        return y + b[None, :, None, None]

    r = res
    for (w1, b1, w2, b2) in params:
        t = jnp.maximum(conv(r, w1, b1), 0.0)
        t = conv(t, w2, b2)
        r = r + t
    return fea + r, r


if __name__ == "__main__":
    key = jax.random.PRNGKey(0)
    num_blocks = 2
    # Small shapes: 48 channels fixed by the module; W=8 -> lane-dense L=384;
    # H=6 -> pad_h=8 so the batch can be chunked (2 chunks x 2 images here).
    N, C, H, W = 4, NUM_FILTERS, 6, 8

    keys = jax.random.split(key, 2 + 4 * num_blocks)
    fea = jax.random.normal(keys[0], (N, C, H, W), jnp.float32)
    res = jax.random.normal(keys[1], (N, C, H, W), jnp.float32)

    # kaiming_normal_(fan_in, a=0) * 0.1 for weights; small nonzero biases to
    # exercise the bias path (module init zeroes them, semantics unchanged).
    fan_in = C * 3 * 3
    std = (2.0 / fan_in) ** 0.5
    params = []
    for b in range(num_blocks):
        w1 = jax.random.normal(keys[2 + 4 * b], (C, C, 3, 3), jnp.float32) * std * 0.1
        w2 = jax.random.normal(keys[3 + 4 * b], (C, C, 3, 3), jnp.float32) * std * 0.1
        b1 = jax.random.normal(keys[4 + 4 * b], (C,), jnp.float32) * 0.01
        b2 = jax.random.normal(keys[5 + 4 * b], (C,), jnp.float32) * 0.01
        params.append((w1, b1, w2, b2))

    banded = prepare_banded_params(params, W)

    fwd = jax.jit(larva_body_forward, static_argnames=("num_blocks",))
    out_fea, out_res = fwd(fea, res, banded, num_blocks=num_blocks)
    jax.block_until_ready((out_fea, out_res))

    ref_fea, ref_res = _reference(fea, res, params)
    ref_fea, ref_res = jax.block_until_ready((ref_fea, ref_res))

    assert out_fea.shape == fea.shape and out_res.shape == res.shape
    # Tolerance relaxed vs the pure-f32 path: matmul operands (weights + LHS)
    # are bf16; accumulation and the residual carrier stay f32.
    assert jnp.allclose(out_res, ref_res, atol=1e-2, rtol=1e-2)
    assert jnp.allclose(out_fea, ref_fea, atol=1e-2, rtol=1e-2)

    print("KERNEL_OK")
</pallas_src>

<mosaic_0001>
module attributes {stable_mosaic.version = 11 : i64} {
  func.func @larva_body_kernel(%arg0: i32, %arg1: i32, %arg2: memref<16x384xf32, #tpu.memory_space<vmem>>, %arg3: memref<16x384xf32, #tpu.memory_space<vmem>>, %arg4: memref<1x3x384x384xbf16, #tpu.memory_space<vmem>>, %arg5: memref<1x1x384xf32, #tpu.memory_space<vmem>>, %arg6: memref<1x3x384x384xbf16, #tpu.memory_space<vmem>>, %arg7: memref<1x1x384xf32, #tpu.memory_space<vmem>>, %arg8: memref<16x384xf32, #tpu.memory_space<vmem>>, %arg9: memref<16x384xf32, #tpu.memory_space<vmem>>, %arg10: memref<16x384xf32, #tpu.memory_space<vmem>>, %arg11: memref<16x384xf32, #tpu.memory_space<vmem>>) attributes {dimension_semantics = [#tpu.dimension_semantics<parallel>, #tpu.dimension_semantics<arbitrary>], iteration_bounds = array<i64: 2, 2>, scalar_prefetch = 0 : i64, scratch_operands = 2 : i64, tpu.core_type = #tpu.core_type<tc>, window_params = [{transform_indices = @transform_0, window_bounds = array<i64: 16, 384>}, {transform_indices = @transform_1, window_bounds = array<i64: 16, 384>}, {transform_indices = @transform_2, window_bounds = array<i64: 1, 3, 384, 384>}, {transform_indices = @transform_3, window_bounds = array<i64: 1, 1, 384>}, {transform_indices = @transform_4, window_bounds = array<i64: 1, 3, 384, 384>}, {transform_indices = @transform_5, window_bounds = array<i64: 1, 1, 384>}, {transform_indices = @transform_6, window_bounds = array<i64: 16, 384>}, {transform_indices = @transform_7, window_bounds = array<i64: 16, 384>}]} {
    %0 = tpu.iota {dimensions = array<i32: 0>} : vector<14x1xi32>
    %c1_i32 = arith.constant 1 : i32
    %1 = vector.broadcast %c1_i32 : i32 to vector<14x1xi32>
    %2 = arith.addi %0, %1 : vector<14x1xi32>
    %c8_i32 = arith.constant 8 : i32
    %c0_i32 = arith.constant 0 : i32
    %3 = arith.cmpi eq, %c8_i32, %c0_i32 : i32
    %c1_i32_0 = arith.constant 1 : i32
    %4 = arith.select %3, %c1_i32_0, %c8_i32 : i32
    %5 = vector.broadcast %4 : i32 to vector<14x1xi32>
    %6 = arith.remsi %2, %5 : vector<14x1xi32>
    %c0_i32_1 = arith.constant 0 : i32
    %7 = vector.broadcast %c0_i32_1 : i32 to vector<14x1xi32>
    %8 = arith.cmpi ne, %6, %7 : vector<14x1xi32>
    %c0_i32_2 = arith.constant 0 : i32
    %9 = vector.broadcast %c0_i32_2 : i32 to vector<14x1xi32>
    %10 = arith.cmpi slt, %6, %9 : vector<14x1xi32>
    %c0_i32_3 = arith.constant 0 : i32
    %11 = arith.cmpi slt, %4, %c0_i32_3 : i32
    %12 = vector.broadcast %11 : i1 to vector<14x1xi1>
    %13 = vector.broadcast %12 : vector<14x1xi1> to vector<14x1xi1>
    %14 = arith.xori %10, %13 : vector<14x1xi1>
    %15 = arith.andi %14, %8 : vector<14x1xi1>
    %16 = vector.broadcast %4 : i32 to vector<14x1xi32>
    %17 = arith.addi %6, %16 : vector<14x1xi32>
    %18 = arith.select %15, %17, %6 : vector<14x1xi1>, vector<14x1xi32>
    %c1_i32_4 = arith.constant 1 : i32
    %19 = vector.broadcast %c1_i32_4 : i32 to vector<14x1xi32>
    %20 = arith.cmpi sge, %18, %19 : vector<14x1xi32>
    %c6_i32 = arith.constant 6 : i32
    %21 = vector.broadcast %c6_i32 : i32 to vector<14x1xi32>
    %22 = arith.cmpi sle, %18, %21 : vector<14x1xi32>
    %23 = arith.andi %20, %22 : vector<14x1xi1>
    %24 = arith.extui %23 : vector<14x1xi1> to vector<14x1xi32>
    %25 = arith.sitofp %24 : vector<14x1xi32> to vector<14x1xf32>
    %26 = vector.shape_cast %25 : vector<14x1xf32> to vector<14x1xf32>
    %27 = vector.broadcast %26 : vector<14x1xf32> to vector<14x384xf32>
    %c0_i32_5 = arith.constant 0 : i32
    %28 = arith.cmpi eq, %arg1, %c0_i32_5 : i32
    %29 = arith.extui %28 : i1 to i32
    %c0_i32_6 = arith.constant 0 : i32
    %30 = arith.cmpi ne, %29, %c0_i32_6 : i32
    scf.if %30 {
      %c0_60 = arith.constant 0 : index
      %c0_61 = arith.constant 0 : index
      %86 = vector.load %arg2[%c0_60, %c0_61] : memref<16x384xf32, #tpu.memory_space<vmem>>, vector<16x384xf32>
      %c0_62 = arith.constant 0 : index
      %c0_63 = arith.constant 0 : index
      %87 = vector.load %arg10[%c0_62, %c0_63] : memref<16x384xf32, #tpu.memory_space<vmem>>, vector<16x384xf32>
      tpu.vector_store %arg10[%c0_62, %c0_63], %86 {strides = array<i32>} : memref<16x384xf32, #tpu.memory_space<vmem>>, vector<16x384xf32>,
      %cst_64 = arith.constant 0.000000e+00 : f32
      %88 = vector.broadcast %cst_64 : f32 to vector<1x384xf32>
      %c0_65 = arith.constant 0 : index
      %c0_66 = arith.constant 0 : index
      %89 = vector.load %arg11[%c0_65, %c0_66] : memref<16x384xf32, #tpu.memory_space<vmem>>, vector<1x384xf32>
      tpu.vector_store %arg11[%c0_65, %c0_66], %88 {strides = array<i32>} : memref<16x384xf32, #tpu.memory_space<vmem>>, vector<1x384xf32>,
      %c15 = arith.constant 15 : index
      %c0_67 = arith.constant 0 : index
      %90 = vector.load %arg11[%c15, %c0_67] : memref<16x384xf32, #tpu.memory_space<vmem>>, vector<1x384xf32>
      tpu.vector_store %arg11[%c15, %c0_67], %88 {strides = array<i32>} : memref<16x384xf32, #tpu.memory_space<vmem>>, vector<1x384xf32>,
    } else {
    }
    %c0 = arith.constant 0 : index
    %c0_7 = arith.constant 0 : index
    %c0_8 = arith.constant 0 : index
    %31 = vector.load %arg5[%c0, %c0_7, %c0_8] : memref<1x1x384xf32, #tpu.memory_space<vmem>>, vector<1x1x384xf32>
    %32 = vector.shape_cast %31 : vector<1x1x384xf32> to vector<1x384xf32>
    %c0_9 = arith.constant 0 : index
    %c0_10 = arith.constant 0 : index
    %33 = vector.load %arg10[%c0_9, %c0_10] : memref<16x384xf32, #tpu.memory_space<vmem>>, vector<14x384xf32>
    %34 = arith.truncf %33 : vector<14x384xf32> to vector<14x384xbf16>
    %c0_11 = arith.constant 0 : index
    %c0_12 = arith.constant 0 : index
    %c0_13 = arith.constant 0 : index
    %c0_14 = arith.constant 0 : index
    %35 = vector.load %arg4[%c0_11, %c0_12, %c0_13, %c0_14] : memref<1x3x384x384xbf16, #tpu.memory_space<vmem>>, vector<1x1x384x384xbf16>
    %36 = vector.shape_cast %35 : vector<1x1x384x384xbf16> to vector<384x384xbf16>
    %cst = arith.constant dense<0.000000e+00> : vector<14x384xf32>
    %37 = tpu.matmul %34, %36, %cst {dimension_numbers = #tpu.dot_dimension_numbers<[1], [0], [0], [1], [0, 0, 1, 1], [], []>} : vector<14x384xbf16>, vector<384x384xbf16>, vector<14x384xf32> -> vector<14x384xf32>
    %38 = vector.broadcast %32 : vector<1x384xf32> to vector<14x384xf32>
    %39 = arith.addf %38, %37 : vector<14x384xf32>
    %c1 = arith.constant 1 : index
    %c0_15 = arith.constant 0 : index
    %40 = vector.load %arg10[%c1, %c0_15] : memref<16x384xf32, #tpu.memory_space<vmem>>, vector<14x384xf32>
    %41 = arith.truncf %40 : vector<14x384xf32> to vector<14x384xbf16>
    %c0_16 = arith.constant 0 : index
    %c1_17 = arith.constant 1 : index
    %c0_18 = arith.constant 0 : index
    %c0_19 = arith.constant 0 : index
    %42 = vector.load %arg4[%c0_16, %c1_17, %c0_18, %c0_19] : memref<1x3x384x384xbf16, #tpu.memory_space<vmem>>, vector<1x1x384x384xbf16>
    %43 = vector.shape_cast %42 : vector<1x1x384x384xbf16> to vector<384x384xbf16>
    %cst_20 = arith.constant dense<0.000000e+00> : vector<14x384xf32>
    %44 = tpu.matmul %41, %43, %cst_20 {dimension_numbers = #tpu.dot_dimension_numbers<[1], [0], [0], [1], [0, 0, 1, 1], [], []>} : vector<14x384xbf16>, vector<384x384xbf16>, vector<14x384xf32> -> vector<14x384xf32>
    %45 = arith.addf %39, %44 : vector<14x384xf32>
    %c2 = arith.constant 2 : index
    %c0_21 = arith.constant 0 : index
    %46 = vector.load %arg10[%c2, %c0_21] : memref<16x384xf32, #tpu.memory_space<vmem>>, vector<14x384xf32>
    %47 = arith.truncf %46 : vector<14x384xf32> to vector<14x384xbf16>
    %c0_22 = arith.constant 0 : index
    %c2_23 = arith.constant 2 : index
    %c0_24 = arith.constant 0 : index
    %c0_25 = arith.constant 0 : index
    %48 = vector.load %arg4[%c0_22, %c2_23, %c0_24, %c0_25] : memref<1x3x384x384xbf16, #tpu.memory_space<vmem>>, vector<1x1x384x384xbf16>
    %49 = vector.shape_cast %48 : vector<1x1x384x384xbf16> to vector<384x384xbf16>
    %cst_26 = arith.constant dense<0.000000e+00> : vector<14x384xf32>
    %50 = tpu.matmul %47, %49, %cst_26 {dimension_numbers = #tpu.dot_dimension_numbers<[1], [0], [0], [1], [0, 0, 1, 1], [], []>} : vector<14x384xbf16>, vector<384x384xbf16>, vector<14x384xf32> -> vector<14x384xf32>
    %51 = arith.addf %45, %50 : vector<14x384xf32>
    %cst_27 = arith.constant 0.000000e+00 : f32
    %52 = vector.broadcast %cst_27 : f32 to vector<14x384xf32>
    %53 = arith.maximumf %51, %52 : vector<14x384xf32>
    %54 = arith.mulf %53, %27 : vector<14x384xf32>
    %c1_28 = arith.constant 1 : index
    %c0_29 = arith.constant 0 : index
    %55 = vector.load %arg11[%c1_28, %c0_29] : memref<16x384xf32, #tpu.memory_space<vmem>>, vector<14x384xf32>
    tpu.vector_store %arg11[%c1_28, %c0_29], %54 {strides = array<i32>} : memref<16x384xf32, #tpu.memory_space<vmem>>, vector<14x384xf32>,
    %c0_30 = arith.constant 0 : index
    %c0_31 = arith.constant 0 : index
    %c0_32 = arith.constant 0 : index
    %56 = vector.load %arg7[%c0_30, %c0_31, %c0_32] : memref<1x1x384xf32, #tpu.memory_space<vmem>>, vector<1x1x384xf32>
    %57 = vector.shape_cast %56 : vector<1x1x384xf32> to vector<1x384xf32>
    %c0_33 = arith.constant 0 : index
    %c0_34 = arith.constant 0 : index
    %58 = vector.load %arg11[%c0_33, %c0_34] : memref<16x384xf32, #tpu.memory_space<vmem>>, vector<14x384xf32>
    %59 = arith.truncf %58 : vector<14x384xf32> to vector<14x384xbf16>
    %c0_35 = arith.constant 0 : index
    %c0_36 = arith.constant 0 : index
    %c0_37 = arith.constant 0 : index
    %c0_38 = arith.constant 0 : index
    %60 = vector.load %arg6[%c0_35, %c0_36, %c0_37, %c0_38] : memref<1x3x384x384xbf16, #tpu.memory_space<vmem>>, vector<1x1x384x384xbf16>
    %61 = vector.shape_cast %60 : vector<1x1x384x384xbf16> to vector<384x384xbf16>
    %cst_39 = arith.constant dense<0.000000e+00> : vector<14x384xf32>
    %62 = tpu.matmul %59, %61, %cst_39 {dimension_numbers = #tpu.dot_dimension_numbers<[1], [0], [0], [1], [0, 0, 1, 1], [], []>} : vector<14x384xbf16>, vector<384x384xbf16>, vector<14x384xf32> -> vector<14x384xf32>
    %63 = vector.broadcast %57 : vector<1x384xf32> to vector<14x384xf32>
    %64 = arith.addf %63, %62 : vector<14x384xf32>
    %c1_40 = arith.constant 1 : index
    %c0_41 = arith.constant 0 : index
    %65 = vector.load %arg11[%c1_40, %c0_41] : memref<16x384xf32, #tpu.memory_space<vmem>>, vector<14x384xf32>
    %66 = arith.truncf %65 : vector<14x384xf32> to vector<14x384xbf16>
    %c0_42 = arith.constant 0 : index
    %c1_43 = arith.constant 1 : index
    %c0_44 = arith.constant 0 : index
    %c0_45 = arith.constant 0 : index
    %67 = vector.load %arg6[%c0_42, %c1_43, %c0_44, %c0_45] : memref<1x3x384x384xbf16, #tpu.memory_space<vmem>>, vector<1x1x384x384xbf16>
    %68 = vector.shape_cast %67 : vector<1x1x384x384xbf16> to vector<384x384xbf16>
    %cst_46 = arith.constant dense<0.000000e+00> : vector<14x384xf32>
    %69 = tpu.matmul %66, %68, %cst_46 {dimension_numbers = #tpu.dot_dimension_numbers<[1], [0], [0], [1], [0, 0, 1, 1], [], []>} : vector<14x384xbf16>, vector<384x384xbf16>, vector<14x384xf32> -> vector<14x384xf32>
    %70 = arith.addf %64, %69 : vector<14x384xf32>
    %c2_47 = arith.constant 2 : index
    %c0_48 = arith.constant 0 : index
    %71 = vector.load %arg11[%c2_47, %c0_48] : memref<16x384xf32, #tpu.memory_space<vmem>>, vector<14x384xf32>
    %72 = arith.truncf %71 : vector<14x384xf32> to vector<14x384xbf16>
    %c0_49 = arith.constant 0 : index
    %c2_50 = arith.constant 2 : index
    %c0_51 = arith.constant 0 : index
    %c0_52 = arith.constant 0 : index
    %73 = vector.load %arg6[%c0_49, %c2_50, %c0_51, %c0_52] : memref<1x3x384x384xbf16, #tpu.memory_space<vmem>>, vector<1x1x384x384xbf16>
    %74 = vector.shape_cast %73 : vector<1x1x384x384xbf16> to vector<384x384xbf16>
    %cst_53 = arith.constant dense<0.000000e+00> : vector<14x384xf32>
    %75 = tpu.matmul %72, %74, %cst_53 {dimension_numbers = #tpu.dot_dimension_numbers<[1], [0], [0], [1], [0, 0, 1, 1], [], []>} : vector<14x384xbf16>, vector<384x384xbf16>, vector<14x384xf32> -> vector<14x384xf32>
    %76 = arith.addf %70, %75 : vector<14x384xf32>
    %c1_54 = arith.constant 1 : index
    %c0_55 = arith.constant 0 : index
    %77 = vector.load %arg10[%c1_54, %c0_55] : memref<16x384xf32, #tpu.memory_space<vmem>>, vector<14x384xf32>
    %78 = arith.addf %76, %77 : vector<14x384xf32>
    %79 = arith.mulf %78, %27 : vector<14x384xf32>
    %c1_i32_56 = arith.constant 1 : i32
    %80 = arith.cmpi slt, %arg1, %c1_i32_56 : i32
    %81 = arith.extui %80 : i1 to i32
    %c0_i32_57 = arith.constant 0 : i32
    %82 = arith.cmpi ne, %81, %c0_i32_57 : i32
    scf.if %82 {
      %c1_60 = arith.constant 1 : index
      %c0_61 = arith.constant 0 : index
      %86 = vector.load %arg10[%c1_60, %c0_61] : memref<16x384xf32, #tpu.memory_space<vmem>>, vector<14x384xf32>
      tpu.vector_store %arg10[%c1_60, %c0_61], %79 {strides = array<i32>} : memref<16x384xf32, #tpu.memory_space<vmem>>, vector<14x384xf32>,
    } else {
    }
    %c1_i32_58 = arith.constant 1 : i32
    %83 = arith.cmpi eq, %arg1, %c1_i32_58 : i32
    %84 = arith.extui %83 : i1 to i32
    %c0_i32_59 = arith.constant 0 : i32
    %85 = arith.cmpi ne, %84, %c0_i32_59 : i32
    scf.if %85 {
      %cst_60 = arith.constant 0.000000e+00 : f32
      %86 = vector.broadcast %cst_60 : f32 to vector<1x384xf32>
      %c0_61 = arith.constant 0 : index
      %c0_62 = arith.constant 0 : index
      %87 = vector.load %arg9[%c0_61, %c0_62] : memref<16x384xf32, #tpu.memory_space<vmem>>, vector<1x384xf32>
      tpu.vector_store %arg9[%c0_61, %c0_62], %86 {strides = array<i32>} : memref<16x384xf32, #tpu.memory_space<vmem>>, vector<1x384xf32>,
      %c15 = arith.constant 15 : index
      %c0_63 = arith.constant 0 : index
      %88 = vector.load %arg9[%c15, %c0_63] : memref<16x384xf32, #tpu.memory_space<vmem>>, vector<1x384xf32>
      tpu.vector_store %arg9[%c15, %c0_63], %86 {strides = array<i32>} : memref<16x384xf32, #tpu.memory_space<vmem>>, vector<1x384xf32>,
      %c1_64 = arith.constant 1 : index
      %c0_65 = arith.constant 0 : index
      %89 = vector.load %arg9[%c1_64, %c0_65] : memref<16x384xf32, #tpu.memory_space<vmem>>, vector<14x384xf32>
      tpu.vector_store %arg9[%c1_64, %c0_65], %79 {strides = array<i32>} : memref<16x384xf32, #tpu.memory_space<vmem>>, vector<14x384xf32>,
      %c0_66 = arith.constant 0 : index
      %c0_67 = arith.constant 0 : index
      %90 = vector.load %arg8[%c0_66, %c0_67] : memref<16x384xf32, #tpu.memory_space<vmem>>, vector<1x384xf32>
      tpu.vector_store %arg8[%c0_66, %c0_67], %86 {strides = array<i32>} : memref<16x384xf32, #tpu.memory_space<vmem>>, vector<1x384xf32>,
      %c15_68 = arith.constant 15 : index
      %c0_69 = arith.constant 0 : index
      %91 = vector.load %arg8[%c15_68, %c0_69] : memref<16x384xf32, #tpu.memory_space<vmem>>, vector<1x384xf32>
      tpu.vector_store %arg8[%c15_68, %c0_69], %86 {strides = array<i32>} : memref<16x384xf32, #tpu.memory_space<vmem>>, vector<1x384xf32>,
      %c1_70 = arith.constant 1 : index
      %c0_71 = arith.constant 0 : index
      %92 = vector.load %arg3[%c1_70, %c0_71] : memref<16x384xf32, #tpu.memory_space<vmem>>, vector<14x384xf32>
      %93 = arith.addf %92, %79 : vector<14x384xf32>
      %c1_72 = arith.constant 1 : index
      %c0_73 = arith.constant 0 : index
      %94 = vector.load %arg8[%c1_72, %c0_73] : memref<16x384xf32, #tpu.memory_space<vmem>>, vector<14x384xf32>
      tpu.vector_store %arg8[%c1_72, %c0_73], %93 {strides = array<i32>} : memref<16x384xf32, #tpu.memory_space<vmem>>, vector<14x384xf32>,
    } else {
    }
    return
  }
  func.func @transform_0(%arg0: i32, %arg1: i32) -> (i32, i32) {
    %c0_i32 = arith.constant 0 : i32
    %c0_i32_0 = arith.constant 0 : i32
    return %arg0, %c0_i32 : i32, i32
  }
  func.func @transform_1(%arg0: i32, %arg1: i32) -> (i32, i32) {
    %c0_i32 = arith.constant 0 : i32
    %c0_i32_0 = arith.constant 0 : i32
    return %arg0, %c0_i32 : i32, i32
  }
  func.func @transform_2(%arg0: i32, %arg1: i32) -> (i32, i32, i32, i32) {
    %c0_i32 = arith.constant 0 : i32
    %c0_i32_0 = arith.constant 0 : i32
    %c0_i32_1 = arith.constant 0 : i32
    %c0_i32_2 = arith.constant 0 : i32
    return %arg1, %c0_i32, %c0_i32_0, %c0_i32_1 : i32, i32, i32, i32
  }
  func.func @transform_3(%arg0: i32, %arg1: i32) -> (i32, i32, i32) {
    %c0_i32 = arith.constant 0 : i32
    %c0_i32_0 = arith.constant 0 : i32
    %c0_i32_1 = arith.constant 0 : i32
    return %arg1, %c0_i32, %c0_i32_0 : i32, i32, i32
  }
  func.func @transform_4(%arg0: i32, %arg1: i32) -> (i32, i32, i32, i32) {
    %c0_i32 = arith.constant 0 : i32
    %c0_i32_0 = arith.constant 0 : i32
    %c0_i32_1 = arith.constant 0 : i32
    %c0_i32_2 = arith.constant 0 : i32
    return %arg1, %c0_i32, %c0_i32_0, %c0_i32_1 : i32, i32, i32, i32
  }
  func.func @transform_5(%arg0: i32, %arg1: i32) -> (i32, i32, i32) {
    %c0_i32 = arith.constant 0 : i32
    %c0_i32_0 = arith.constant 0 : i32
    %c0_i32_1 = arith.constant 0 : i32
    return %arg1, %c0_i32, %c0_i32_0 : i32, i32, i32
  }
  func.func @transform_6(%arg0: i32, %arg1: i32) -> (i32, i32) {
    %c0_i32 = arith.constant 0 : i32
    %c0_i32_0 = arith.constant 0 : i32
    return %arg0, %c0_i32 : i32, i32
  }
  func.func @transform_7(%arg0: i32, %arg1: i32) -> (i32, i32) {
    %c0_i32 = arith.constant 0 : i32
    %c0_i32_0 = arith.constant 0 : i32
    return %arg0, %c0_i32 : i32, i32
  }
}

</mosaic_0001>

<bundles_post_ra>
// kernel: larva_body_forward.1
= control target key start
LH: loop header
LB: loop body
LE: loop exit
PB: predicated region body
PF: predicated region fallthrough
CT: control target
= control target key end

     0   :  { %s8107_s0 = inlined_call_operand.vmem [shape: f32[32,384], index: 0, kind: input, shape index: {}, may-alias: {0,7}]   ;;  %s8108_s1 = inlined_call_operand.vmem [shape: f32[32,384], index: 1, kind: input, shape index: {}]   ;;  %s8109_s2 = inlined_call_operand.hbm [shape: bf16[2,3,384,384], index: 2, kind: input, shape index: {}]   ;;  %s8110_s3 = inlined_call_operand.hbm [shape: f32[2,1,384], index: 3, kind: input, shape index: {}]   ;;  %s8111_s4 = inlined_call_operand.hbm [shape: bf16[2,3,384,384], index: 4, kind: input, shape index: {}]   ;;  %s8112_s5 = inlined_call_operand.hbm [shape: f32[2,1,384], index: 5, kind: input, shape index: {}]   ;;  %s8113_s6 = inlined_call_operand.vmem [shape: f32[32,384], index: 6, kind: output, shape index: {0}]   ;;  %s8114_s7 = inlined_call_operand.vmem [shape: f32[32,384], index: 7, kind: output, shape index: {1}, may-alias: {0,7}]  }
   0x1   :  { %8123 = sst [smem:[#allocation18_spill]] %s8109_s2 }
   0x2   :  { %8124 = sst [smem:[#allocation19_spill]] %s8110_s3 }
   0x3   :  { %13 = vsyncpa [#allocation5], 0 }
   0x4   :  { %15 = vsyncpa [#allocation5 + $0x1], 0 }
   0x5   :  { %16 = vsyncpa [#allocation7], 0 }
   0x6   :  { %18 = vsyncpa [#allocation7 + $0x1], 0 }
   0x7   :  { %19 = vsyncpa [#allocation10], 0 }
   0x8   :  { %21 = vsyncpa [#allocation10 + $0x1], 0  ;;  %s7160_s24 = smov 0   ;;  %s7162_s25 = smov 0  }
   0x9   :  { %s7164_s26 = smov 0   ;;  %s7166_s27 = smov 0  }
   0xa   :  { %s7168_s28 = smov 0   ;;  %s7170_s29 = smov 0  }
   0xb   :  { %s7172_s30 = smov 0   ;;  %s7174_s8 = smov 0  }
   0xc LB: > { %8125 = sst [smem:[#allocation14_spill]] %s7103_s30  ;;  %s8115_s9 = sadd.s32 4294967295, %s7107_s8   ;;  %s7107_s8 = sphi %s7174_s8, %s27_s8   ;;  %s7103_s30 = sphi %s7172_s30, %s8145_s30   ;;  %s7099_s29 = sphi %s7170_s29, %s8150_s29   ;;  %s7095_s28 = sphi %s7168_s28, %s8143_s28   ;;  %s7091_s27 = sphi %s7166_s27, %s8149_s27   ;;  %s7087_s26 = sphi %s7164_s26, %s8148_s26   ;;  %s7083_s25 = sphi %s7162_s25, %s8147_s25   ;;  %s7079_s24 = sphi %s7160_s24, %s8146_s24  }
   0xd   : > { %s36_s10 = sadd.s32 1, %s7099_s29  ;;  %s39_s11 = sadd.s32 1, %s7103_s30 }
   0xe   : > { %p37_p0 = scmp.ge.s32.totalorder %s36_s10, 2  ;;  %s98_s12 = sadd.s32 1, %s7087_s26 }
   0xf   : > { %p105_p1 = scmp.ne.s32.totalorder %s7087_s26, %s7083_s25  ;;  %p106_p2 = scmp.eq.s32.totalorder %s7107_s8, 0 }
  0x10   : > { %s8152_s10 = smov (%p37_p0, %s36_s10), 0  ;;  %s8154_s11 = smov (!%p37_p0, %s39_s11), %s7103_s30 }
  0x11   : > { %8126 = sst [smem:[#allocation15_spill]] %s8152_s10  ;;  %s95_s13 = ssub.s32 %s7099_s29, %s8152_s10 }
  0x12   : > { %p41_p3 = scmp.ge.s32.totalorder %s8154_s11, 2  ;;  %p96_p4 = scmp.eq.s32.totalorder %s95_s13, 0 }
  0x13   : > { %p107_p5 = por %p106_p2, %p105_p1  ;;  %p111_p6 = scmp.ne.s32.totalorder %s7083_s25, %s7079_s24 }
  0x14   : > { %s8156_s11 = smov (%p41_p3, %s8154_s11), 0  ;;  %p112_p7 = scmp.eq.s32.totalorder %s8115_s9, 0 }
  0x15   : > { %8127 = sst [smem:[#allocation16_spill]] %s8156_s11  ;;  %p6265_p8 = scmp.lt.s32.totalorder %s7107_s8, 4 }
  0x16   : > { %s7214_s14 = scalar_select %p96_p4, %s7087_s26, %s98_s12  }
  0x17   : > { %s7220_s15 = sand.u32 1, %s7087_s26   ;;  %p7222_p9 = por %p112_p7, %p111_p6 }
  0x18   : > { %8128 = sst [smem:[#allocation17_spill]] %s7214_s14  ;;  %s306_s17 = sand.u32 1, %s7107_s8  }
  0x19   : > { %s8129_s16 = scalar_select %p7222_p9, 1, 0 }
  0x1a   : > { %p7227_p10 = pnand %p6265_p8, %p107_p5  ;;  %s8116_s19 = smul.u32 3, %s7220_s15 }
  0x1b   : > { %p5029_p11 = scmp.ge.s32.totalorder %s7107_s8, 1  ;;  %s8117_s20 = smul.u32 48, %s7099_s29 }
  0x1c   : > { %s8130_s18 = scalar_select %p7227_p10, 1, 0 }
  0x1d   : > { %p363_p12 = scmp.lt.s32.totalorder %s7107_s8, 5  ;;  %s8131_s3 = sld [smem:[#allocation19_spill]] }
  0x1e   : > { %s310_s24 = scalar_lea.vmem [#allocation6], %s8116_s19  ;;  %s7250_s9 = scalar_lea.sflag [#allocation7], %s306_s17 }
  0x1f   : > { %s318_s12 = sshll.u32 %s310_s24, 4  ;;  %p7246_p13 = pnand %p5029_p11, %p363_p12  ;;  %s7244_s12 = int_to_ptr.vmem [resolvable:$true] %s318_s12 }
  0x20   : > { %p7256_p1 = pneg %p7227_p10 }
  0x21   : > { %s8132_s13 = scalar_select %p7246_p13, 1, 0 }
  0x23   : > { %s7240_s23 = scalar_lea.hbm %s8131_s3, %s8117_s20  ;;  %s6918_s19 = scalar_lea.hbm %s8131_s3, 96 }
  0x24   : > { %s6913_s11 = scalar_lea.hbm %s7240_s23, 48  ;;  %p6919_p4 = scmp.lt.u32.totalorder %s7240_s23, %s8131_s3 }
  0x25   : > { %p6914_p0 = scmp.ne.s32.totalorder %s7240_s23, %s6913_s11  ;;  %p6920_p5 = scmp.lt.u32.totalorder %s6918_s19, %s6913_s11 }
  0x26   : > { %p6922_p7 = scmp.lt.u32.totalorder %s6913_s11, %s7240_s23 }
  0x27   : > { %p6916_p2 = pnand %p7256_p1, %p6914_p0  ;;  %p6921_p6 = por %p6920_p5, %p6919_p4 }
  0x29   : > { %p6917_p3 = pneg %p6916_p2  ;;  %p6923_p8 = por %p6922_p7, %p6921_p6 }
  0x2b   : > { %p6924_p11 = pnand %p6923_p8, %p6917_p3 }
  0x2d   : > { %6927 = shalt.err (!%p6924_p11)
}
  0x2e   : > { %s6928_s17 = scalar_lea.vmem %s7244_s12, 48  ;;  %s7109_s22 = smov [#allocation6]  }
  0x2f   : > { %p6929_p12 = scmp.ne.s32.totalorder %s7244_s12, %s6928_s17  ;;  %s6933_s24 = sshll.u32 %s7109_s22, 4  ;;  %s6934_s24 = int_to_ptr.vmem [resolvable:$false] %s6933_s24 }
  0x30   : > { %s6935_s10 = scalar_lea.vmem %s6934_s24, 96  ;;  %p6936_p9 = scmp.lt.s32.totalorder %s7244_s12, %s6934_s24 }
  0x31   : > { %p6931_p0 = pnand %p6929_p12, %p7256_p1  ;;  %p6937_p13 = scmp.lt.s32.totalorder %s6935_s10, %s6928_s17 }
  0x33   : > { %p6932_p2 = pneg %p6931_p0  ;;  %p6938_p4 = por %p6937_p13, %p6936_p9 }
  0x35   : > { %p6939_p5 = pnand %p6938_p4, %p6932_p2 }
  0x37   : > { %6942 = shalt.err (!%p6939_p5)
}
  0x38   : > { %6258 = dma.hbm_to_vmem [thread:$0]  (!%p7227_p10), %s7240_s23, 48, %s7244_s12, %s7250_s9  }
  0x39   : > { %s6233_s11 = smul.u32 1728, %s7220_s15  ;;  %s8134_s2 = sld [smem:[#allocation18_spill]] }
  0x3a   : > { %s8121_s19 = smul.u32 27648, %s7099_s29  ;;  %s286_s3 = scalar_lea.sflag [#allocation5], %s7220_s15 }
  0x3b   : > { %s289_s24 = scalar_lea.vmem [#allocation4], %s6233_s11 }
  0x3c   : > { %s296_s10 = sshll.u32 %s289_s24, 4  ;;  %s7291_s10 = int_to_ptr.vmem [resolvable:$true] %s296_s10 }
  0x3f   : > { %s7287_s22 = scalar_lea.hbm %s8134_s2, %s8121_s19  ;;  %s6948_s20 = scalar_lea.hbm %s8134_s2, 55296 }
  0x40   : > { %s6943_s30 = scalar_lea.hbm %s7287_s22, 27648  ;;  %p6949_p6 = scmp.lt.u32.totalorder %s7287_s22, %s8134_s2 }
  0x41   : > { %p6944_p9 = scmp.ne.s32.totalorder %s7287_s22, %s6943_s30  ;;  %p6950_p7 = scmp.lt.u32.totalorder %s6948_s20, %s6943_s30 }
  0x42   : > { %p6952_p11 = scmp.lt.u32.totalorder %s6943_s30, %s7287_s22 }
  0x43   : > { %p6946_p13 = pnand %p6944_p9, %p7256_p1  ;;  %p6951_p8 = por %p6950_p7, %p6949_p6 }
  0x45   : > { %p6947_p3 = pneg %p6946_p13  ;;  %p6953_p12 = por %p6952_p11, %p6951_p8 }
  0x47   : > { %p6954_p0 = pnand %p6953_p12, %p6947_p3 }
  0x49   : > { %6957 = shalt.err (!%p6954_p0)
}
  0x4a   : > { %s6958_s24 = scalar_lea.vmem %s7291_s10, 27648  ;;  %s7110_s23 = smov [#allocation4]  }
  0x4b   : > { %p6959_p2 = scmp.ne.s32.totalorder %s7291_s10, %s6958_s24  ;;  %s6963_s12 = sshll.u32 %s7110_s23, 4  ;;  %s6964_s12 = int_to_ptr.vmem [resolvable:$false] %s6963_s12 }
  0x4c   : > { %s6965_s19 = scalar_lea.vmem %s6964_s12, 55296  ;;  %p6966_p9 = scmp.lt.s32.totalorder %s7291_s10, %s6964_s12 }
  0x4d   : > { %p6961_p4 = pnand %p6959_p2, %p7256_p1  ;;  %p6967_p13 = scmp.lt.s32.totalorder %s6965_s19, %s6958_s24 }
  0x4f   : > { %p6962_p5 = pneg %p6961_p4  ;;  %p6968_p6 = por %p6967_p13, %p6966_p9 }
  0x51   : > { %p6969_p7 = pnand %p6968_p6, %p6962_p5 }
  0x53   : > { %6972 = shalt.err (!%p6969_p7)
}
  0x54   : > { %s7111_s30 = smov 192   ;;  %s7112_s20 = smov 12  }
  0x55   : > { %6255 = dma.hbm_to_vmem [thread:$0]  (!%p7227_p10), %s7287_s22, 27648, %s7291_s10, %s286_s3, %s7111_s30, %s7111_s30, %s7112_s20  }
  0x56   : > { %s8135_s17 = smul.u32 27648, %s7099_s29  ;;  %s329_s19 = scalar_lea.vmem [#allocation8], %s6233_s11 }
  0x57   : > { %s336_s2 = sshll.u32 %s329_s19, 4  ;;  %s6978_s10 = scalar_lea.hbm %s8111_s4, 55296  ;;  %s7329_s2 = int_to_ptr.vmem [resolvable:$true] %s336_s2 }
  0x58   : > { %s7325_s12 = scalar_lea.hbm %s8111_s4, %s8135_s17 }
  0x59   : > { %s6973_s14 = scalar_lea.hbm %s7325_s12, 27648  ;;  %p6979_p12 = scmp.lt.u32.totalorder %s7325_s12, %s8111_s4 }
  0x5a   : > { %p6974_p3 = scmp.ne.s32.totalorder %s7325_s12, %s6973_s14  ;;  %p6980_p0 = scmp.lt.u32.totalorder %s6978_s10, %s6973_s14 }
  0x5b   : > { %p6982_p4 = scmp.lt.u32.totalorder %s6973_s14, %s7325_s12 }
  0x5c   : > { %p6976_p8 = pnand %p6974_p3, %p7256_p1  ;;  %p6981_p2 = por %p6980_p0, %p6979_p12 }
  0x5e   : > { %p6977_p11 = pneg %p6976_p8  ;;  %p6983_p5 = por %p6982_p4, %p6981_p2 }
  0x60   : > { %p6984_p9 = pnand %p6983_p5, %p6977_p11 }
  0x62   : > { %6987 = shalt.err (!%p6984_p9)
}
  0x63   : > { %s6988_s11 = scalar_lea.vmem %s7329_s2, 27648  ;;  %s7113_s23 = smov [#allocation8]  }
  0x64   : > { %p6989_p13 = scmp.ne.s32.totalorder %s7329_s2, %s6988_s11  ;;  %s6993_s19 = sshll.u32 %s7113_s23, 4  ;;  %s6994_s19 = int_to_ptr.vmem [resolvable:$false] %s6993_s19 }
  0x65   : > { %s6995_s3 = scalar_lea.vmem %s6994_s19, 55296  ;;  %p6996_p3 = scmp.lt.s32.totalorder %s7329_s2, %s6994_s19 }
  0x66   : > { %p6991_p6 = pnand %p6989_p13, %p7256_p1  ;;  %p6997_p8 = scmp.lt.s32.totalorder %s6995_s3, %s6988_s11 }
  0x68   : > { %p6992_p7 = pneg %p6991_p6  ;;  %p6998_p12 = por %p6997_p8, %p6996_p3 }
  0x6a   : > { %p6999_p0 = pnand %p6998_p12, %p6992_p7 }
  0x6c   : > { %7002 = shalt.err (!%p6999_p0)
}
  0x6d   : > { %6261 = dma.hbm_to_vmem [thread:$0]  (!%p7227_p10), %s7325_s12, 27648, %s7329_s2, %s7250_s9, %s7111_s30, %s7111_s30, %s7112_s20  }
  0x6e   : > { %s8136_s14 = smul.u32 48, %s7099_s29  ;;  %s347_s19 = scalar_lea.sflag [#allocation10], %s7220_s15 }
  0x6f   : > { %s8137_s24 = smul.u32 3, %s7220_s15  ;;  %s7008_s30 = scalar_lea.hbm %s8112_s5, 96 }
  0x70   : > { %s7361_s17 = scalar_lea.hbm %s8112_s5, %s8136_s14 }
  0x71   : > { %s350_s11 = scalar_lea.vmem [#allocation9], %s8137_s24  ;;  %s7003_s3 = scalar_lea.hbm %s7361_s17, 48 }
  0x72   : > { %s358_s23 = sshll.u32 %s350_s11, 4  ;;  %p7004_p11 = scmp.ne.s32.totalorder %s7361_s17, %s7003_s3  ;;  %s359_s23 = int_to_ptr.vmem [resolvable:$true] %s358_s23 }
  0x73   : > { %p7009_p5 = scmp.lt.u32.totalorder %s7361_s17, %s8112_s5  ;;  %p7010_p9 = scmp.lt.u32.totalorder %s7008_s30, %s7003_s3 }
  0x74   : > { %p7006_p2 = pnand %p7004_p11, %p7256_p1  ;;  %p7012_p6 = scmp.lt.u32.totalorder %s7003_s3, %s7361_s17 }
  0x75   : > { %p7011_p13 = por %p7010_p9, %p7009_p5 }
  0x76   : > { %p7007_p4 = pneg %p7006_p2 }
  0x77   : > { %p7013_p7 = por %p7012_p6, %p7011_p13 }
  0x79   : > { %p7014_p3 = pnand %p7013_p7, %p7007_p4 }
  0x7b   : > { %7017 = shalt.err (!%p7014_p3)
}
  0x7c   : > { %s7018_s15 = scalar_lea.vmem %s359_s23, 48  ;;  %s7114_s14 = smov [#allocation9]  }
  0x7d   : > { %p7019_p8 = scmp.ne.s32.totalorder %s359_s23, %s7018_s15  ;;  %s7023_s22 = sshll.u32 %s7114_s14, 4  ;;  %s7024_s22 = int_to_ptr.vmem [resolvable:$false] %s7023_s22 }
  0x7e   : > { %s7025_s10 = scalar_lea.vmem %s7024_s22, 96  ;;  %p7026_p11 = scmp.lt.s32.totalorder %s359_s23, %s7024_s22 }
  0x7f   : > { %p7021_p12 = pnand %p7019_p8, %p7256_p1  ;;  %p7027_p2 = scmp.lt.s32.totalorder %s7025_s10, %s7018_s15 }
  0x81   : > { %p7022_p0 = pneg %p7021_p12  ;;  %p7028_p10 = por %p7027_p2, %p7026_p11 }
  0x83   : > { %p7029_p5 = pnand %p7028_p10, %p7022_p0 }
  0x85   : > { %7032 = shalt.err (!%p7029_p5)
}
  0x86   : > { %p8138_p9 = scmp.ne.s32.totalorder %s8130_s18, 0  ;;  %p8139_p4 = scmp.ne.s32.totalorder %s8132_s13, 0 }
  0x87   : > { %s369_s21 = sand.u32 (!%p8139_p4), 1, %s7083_s25   ;;  %p8140_p1 = scmp.ne.s32.totalorder (!%p8139_p4), %s8129_s16, 0 }
  0x88   : > { %6264 = dma.hbm_to_vmem [thread:$0]  (!%p8138_p9), %s7361_s17, 48, %s359_s23, %s347_s19  }
  0x89   : > { %367 = sbr.rel (%p8139_p4) target bundleno = 1216 (0x4c0), region = 44  ;;  %s370_s11 = scalar_lea.sflag (!%p8139_p4), [#allocation5], %s369_s21 }
  0x8a   : > { %s6241_s24 = smul.u32 (!%p8139_p4), 1728, %s369_s21 }
  0x8c   : > { %s7386_s3 = scalar_lea.vmem (!%p8139_p4), [#allocation4], %s6241_s24 }
  0x90   : > { %7066 = dma.done.wait (%p8140_p1), %s370_s11, 27648  }
  0x91   : > { %7068 = vsyncadd (%p8140_p1), %s370_s11, 4294939648  ;;  %s8141_s2 = sadd.s32 4294967295, %s7107_s8   ;;  %s6242_s17 = smul.u32 3, %s369_s21 }
  0x92   : > { %s378_s18 = sand.u32 1, %s8141_s2  }
  0x93   : > { %s379_s23 = scalar_lea.sflag [#allocation7], %s378_s18  ;;  %s7394_s13 = scalar_lea.vmem [#allocation6], %s6242_s17 }
  0x94   : > { %7070 = dma.done.wait (%p8140_p1), %s379_s23, 27696  }
  0x95   : > { %7072 = vsyncadd (%p8140_p1), %s379_s23, 4294939600  ;;  %s7400_s19 = scalar_lea.vmem [#allocation8], %s6241_s24  ;;  %s397_s9 = scalar_lea.sflag [#allocation10], %s369_s21 }
  0x96   : > { %s7402_s30 = scalar_lea.vmem [#allocation9], %s6242_s17 }
  0x97   : > { %7074 = dma.done.wait (%p8140_p1), %s397_s9, 48  }
  0x98   : > { %7076 = vsyncadd (%p8140_p1), %s397_s9, 4294967248  ;;  %s5030_s20 = sshll.u32 %s7095_s28, 1  ;;  %v494_v0 = vlaneseq  ;;  %v7115_v7 = vmov 0.0   ;;  %p5040_p13 = scmp.ne.s32.totalorder %s7091_s27, 0 }
  0x99   : > { %p466_p10 = scmp.lt.s32.totalorder %s5030_s20, 3  ;;  %v7116_v16 = vmov (!%p5040_p13), 0.0  }
  0x9a   : > { %v7410_v1 = vshrl.u32 %v494_v0, 7  ;;  %vm551_vm6 = vcmp.lt.s32.totalorder (!%p5040_p13), %v494_v0, 384 }
  0x9b   : > { %s8158_s20 = smov (!%p466_p10, %s5030_s20), 3  ;;  %553 = vst.msk [vmem:[#allocation3] ss:$8 sm:$0x7] (!%p5040_p13), %vm551_vm6, %v7116_v16 }
  0x9c   : > { %v496_v2 = vadd.s32 8, %v7410_v1  ;;  %v497_v3 = vadd.s32 1, %v7410_v1  ;;  %s6243_s12 = smul.u32 24, %s8158_s20  ;;  %556 = vst.msk [vmem:[#allocation3 + $0x1f] ss:$8 sm:$0x7] (!%p5040_p13), %vm551_vm6, %v7116_v16 }
  0x9e   : > { %v498_v4 = vadd.s32 1, %v496_v2  ;;  %v503_v5 = vand.u32 7, %v497_v3  ;;  %s470_s16 = scalar_lea.vmem %s8107_s0, %s6243_s12  ;;  %s7420_s28 = scalar_lea.vmem %s8108_s1, %s6243_s12 }
  0x9f   : > { %s7425_s11 = scalar_lea.vmem %s8113_s6, %s6243_s12  ;;  %s7430_s17 = scalar_lea.vmem %s8114_s7, %s6243_s12  ;;  %v537_v10 = vld [vmem:[%s470_s16] sm:$0xff] (!%p5040_p13)  ;;  %v538_v11 = vld [vmem:[%s470_s16 + $0x8] sm:$0xff] (!%p5040_p13)  ;;  %v539_v12 = vld [vmem:[%s470_s16 + $0x10] sm:$0xff] (!%p5040_p13) }
  0xa0   : > { %v510_v6 = vand.u32 7, %v498_v4  ;;  %vm523_vm0 = vcmp.ge.s32.totalorder %v503_v5, 1  ;;  %vm525_vm1 = vcmp.le.s32.totalorder %v503_v5, 6  ;;  %536 = sbr.rel (%p5040_p13) target bundleno = 167 (0xa7), region = 64  ;;  %543 = vst [vmem:[#allocation2] sm:$0xff] (!%p5040_p13), %v537_v10  ;;  %544 = vst [vmem:[#allocation2 + $0x8] sm:$0xff] (!%p5040_p13), %v538_v11 }
  0xa1   : > { %vm527_vm2 = vmand %vm523_vm0, %vm525_vm1  ;;  %545 = vst [vmem:[#allocation2 + $0x10] sm:$0xff] (!%p5040_p13), %v539_v12  ;;  %v540_v13 = vld [vmem:[%s470_s16 + $0x18] sm:$0xff] (!%p5040_p13)  ;;  %v541_v14 = vld [vmem:[%s470_s16 + $0x20] sm:$0xff] (!%p5040_p13) }
  0xa2   : > { %vm524_vm3 = vcmp.ge.s32.totalorder %v510_v6, 1  ;;  %vm526_vm4 = vcmp.le.s32.totalorder %v510_v6, 6  ;;  %v7433_v8 = vsel %vm527_vm2, 1.0, %v7115_v7  ;;  %v542_v15 = vld [vmem:[%s470_s16 + $0x28] sm:$0xff] (!%p5040_p13)  ;;  %546 = vst [vmem:[#allocation2 + $0x18] sm:$0xff] (!%p5040_p13), %v540_v13  ;;  %547 = vst [vmem:[#allocation2 + $0x20] sm:$0xff] (!%p5040_p13), %v541_v14 }
  0xa3   : > { %vm528_vm5 = vmand %vm524_vm3, %vm526_vm4  ;;  %548 = vst [vmem:[#allocation2 + $0x28] sm:$0xff] (!%p5040_p13), %v542_v15 }
  0xa4   : > { %v7436_v9 = vsel %vm528_vm5, 1.0, %v7115_v7 }
  0xa7 PF: > { %6049 = vmatprep.subr.bf16.mxu1 %v7115_v7  ;;  %v6337_v17 = vld [vmem:[%s7386_s3 + $0x4] ss:$12 sps:$4 sm:$0xff]   ;;  %v6339_v18 = vld [vmem:[%s7386_s3 + $0x188] ss:$12 sps:$4 sm:$0xff]   ;;  %vm7117_vm7 = vmmov 0   ;;  %vm2617_vm8 = vcmask 1040384  }
  0xa8   : > { %6065 = vmatprep.mubr.msk.bf16.mxu1 %vm7117_vm7, %v7115_v7  ;;  %1048 = vmatprep.subr.bf16.mxu0 %v6337_v17  ;;  %v6340_v19 = vld [vmem:[%s7386_s3] ss:$12 sps:$4 sm:$0xff]   ;;  %v6341_v20 = vld [vmem:[%s7386_s3 + $0x1c] ss:$12 sps:$4 sm:$0xff]   ;;  %v6344_v22 = vld [vmem:[%s7386_s3 + $0x18] ss:$12 sps:$4 sm:$0xff]  }
  0xa9   : > { %6050 = vmatpush3.bf16.msra.mxu1 %v6339_v18  ;;  %1049 = vmatpush1.bf16.msra.mxu0 %v6340_v19  ;;  %v6343_v21 = vld [vmem:[%s7386_s3 + $0x1a0] ss:$12 sps:$4 sm:$0xff]   ;;  %v6347_v24 = vld [vmem:[%s7386_s3 + $0x1b8] ss:$12 sps:$4 sm:$0xff]   ;;  %v6348_v25 = vld [vmem:[%s7386_s3 + $0x30] ss:$12 sps:$4 sm:$0xff]  }
  0xaa   : > { %6051 = vmatprep.subr.bf16.mxu1 %v7115_v7  ;;  %1050 = vmatprep.subr.bf16.mxu0 %v6341_v20  ;;  %v6345_v23 = vld [vmem:[%s7386_s3 + $0x34] ss:$12 sps:$4 sm:$0xff]   ;;  %v6349_v26 = vld [vmem:[%s7386_s3 + $0x4c] ss:$12 sps:$4 sm:$0xff]   ;;  %v6351_v27 = vld [vmem:[%s7386_s3 + $0x1d0] ss:$12 sps:$4 sm:$0xff]  }
  0xab   : > { %v6352_v28 = vld [vmem:[%s7386_s3 + $0x48] ss:$12 sps:$4 sm:$0xff]   ;;  %v6353_v29 = vld [vmem:[%s7386_s3 + $0x64] ss:$12 sps:$4 sm:$0xff]   ;;  %v6356_v31 = vld [vmem:[%s7386_s3 + $0x60] ss:$12 sps:$4 sm:$0xff]  }
  0xac   : > { %v6355_v30 = vld [vmem:[%s7386_s3 + $0x1e8] ss:$12 sps:$4 sm:$0xff]   ;;  %v6359_v33 = vld [vmem:[%s7386_s3 + $0x200] ss:$12 sps:$4 sm:$0xff]   ;;  %v6360_v34 = vld [vmem:[%s7386_s3 + $0x78] ss:$12 sps:$4 sm:$0xff]  }
  0xad   : > { %6052 = vmatpush3.bf16.msra.mxu1 %v6343_v21  ;;  %1051 = vmatpush1.bf16.msra.mxu0 %v6344_v22  ;;  %v6357_v32 = vld [vmem:[%s7386_s3 + $0x7c] ss:$12 sps:$4 sm:$0xff]   ;;  %v6361_v35 = vld [vmem:[%s7386_s3 + $0x94] ss:$12 sps:$4 sm:$0xff]   ;;  %v6363_v36 = vld [vmem:[%s7386_s3 + $0x218] ss:$12 sps:$4 sm:$0xff]  }
  0xae   : > { %6053 = vmatprep.subr.bf16.mxu1 %v7115_v7  ;;  %1052 = vmatprep.subr.bf16.mxu0 %v6345_v23  ;;  %v6364_v37 = vld [vmem:[%s7386_s3 + $0x90] ss:$12 sps:$4 sm:$0xff]   ;;  %v6365_v38 = vld [vmem:[%s7386_s3 + $0xac] ss:$12 sps:$4 sm:$0xff]   ;;  %v6368_v40 = vld [vmem:[%s7386_s3 + $0xa8] ss:$12 sps:$4 sm:$0xff]  }
  0xaf   : > { %v6367_v39 = vld [vmem:[%s7386_s3 + $0x230] ss:$12 sps:$4 sm:$0xff]   ;;  %v564_v42 = vld [vmem:[#allocation2 + $0x28] sm:$0x3f]  ;;  %v6378_v51 = vld [vmem:[%s7386_s3 + $0xd8] ss:$12 sps:$4 sm:$0xff]  }
  0xb0   : > { %v561_v41 = vld [vmem:[#allocation2 + $0x10] sm:$0xff]  ;;  %v6373_v47 = vld [vmem:[%s7386_s3 + $0xc0] ss:$12 sps:$4 sm:$0xff]   ;;  %v6375_v49 = vld [vmem:[%s7386_s3 + $0xdc] ss:$12 sps:$4 sm:$0xff]   ;;  %vm4692_vm9 = vcmask 1046528  }
  0xb1   : > { %6054 = vmatpush3.bf16.msra.mxu1 %v6347_v24  ;;  %1053 = vmatpush1.bf16.msra.mxu0 %v6348_v25  ;;  %v6369_v43 = vld [vmem:[%s7386_s3 + $0x308] ss:$12 sps:$4 sm:$0xff]   ;;  %v6370_v44 = vld [vmem:[%s7386_s3 + $0xc4] ss:$12 sps:$4 sm:$0xff]   ;;  %v7476_v45 = vpack.c.bf16 %v564_v42, %v561_v41  ;;  %v6374_v48 = vld [vmem:[%s7386_s3 + $0x320] ss:$12 sps:$4 sm:$0xff]  }
  0xb2   : > { %6055 = vmatprep.subr.bf16.mxu1 %v7115_v7  ;;  %1054 = vmatprep.subr.bf16.mxu0 %v6349_v26  ;;  %v6372_v46 = vld [vmem:[%s7386_s3 + $0x248] ss:$12 sps:$4 sm:$0xff]   ;;  %v6377_v50 = vld [vmem:[%s7386_s3 + $0x260] ss:$12 sps:$4 sm:$0xff]   ;;  %v6379_v52 = vld [vmem:[%s7386_s3 + $0x338] ss:$12 sps:$4 sm:$0xff]  }
  0xb3   : > { %v6380_v53 = vld [vmem:[%s7386_s3 + $0xf4] ss:$12 sps:$4 sm:$0xff]   ;;  %v6382_v54 = vld [vmem:[%s7386_s3 + $0x278] ss:$12 sps:$4 sm:$0xff]   ;;  %v6383_v55 = vld [vmem:[%s7386_s3 + $0xf0] ss:$12 sps:$4 sm:$0xff]  }
  0xb4   : > { %v6384_v56 = vld [vmem:[%s7386_s3 + $0x350] ss:$12 sps:$4 sm:$0xff]   ;;  %v6385_v57 = vld [vmem:[%s7386_s3 + $0x10c] ss:$12 sps:$4 sm:$0xff]   ;;  %v6388_v59 = vld [vmem:[%s7386_s3 + $0x108] ss:$12 sps:$4 sm:$0xff]  }
  0xb5   : > { %6056 = vmatpush3.bf16.msra.mxu1 %v6351_v27  ;;  %1055 = vmatpush1.bf16.msra.mxu0 %v6352_v28  ;;  %v6387_v58 = vld [vmem:[%s7386_s3 + $0x290] ss:$12 sps:$4 sm:$0xff]   ;;  %v6389_v60 = vld [vmem:[%s7386_s3 + $0x368] ss:$12 sps:$4 sm:$0xff]   ;;  %v6393_v63 = vld [vmem:[%s7386_s3 + $0x120] ss:$12 sps:$4 sm:$0xff]  }
  0xb6   : > { %6057 = vmatprep.subr.bf16.mxu1 %v7115_v7  ;;  %1056 = vmatprep.subr.bf16.mxu0 %v6353_v29  ;;  %v6390_v61 = vld [vmem:[%s7386_s3 + $0x124] ss:$12 sps:$4 sm:$0xff]   ;;  %v6392_v62 = vld [vmem:[%s7386_s3 + $0x2a8] ss:$12 sps:$4 sm:$0xff]   ;;  %v6394_v10 = vld [vmem:[%s7386_s3 + $0x380] ss:$12 sps:$4 sm:$0xff]  }
  0xb7   : > { %v1239_v2 = vld [vmem:[#allocation2 + $0x8] sm:$0xfe]  ;;  %v1242_v3 = vld [vmem:[#allocation2 + $0x20] sm:$0x7f]  ;;  %v1241_v16 = vld [vmem:[#allocation2 + $0x18] sm:$0x7f] }
  0xb8   : > { %v560_v4 = vld [vmem:[#allocation2 + $0x8] sm:$0xff]  ;;  %v1245_v5 = vpack.c.bf16 %v1242_v3, %v1239_v2  ;;  %v563_v6 = vld [vmem:[#allocation2 + $0x20] sm:$0x3f]  ;;  %v6403_v26 = vld [vmem:[%s7386_s3 + $0x150] ss:$12 sps:$4 sm:$0xff]   ;;  %p5857_p6 = scmp.ge.s32.totalorder %s7091_s27, 1 }
  0xb9   : > { %6058 = vmatpush3.bf16.msra.mxu1 %v6355_v30  ;;  %1057 = vmatpush1.bf16.msra.mxu0 %v6356_v31  ;;  %v6395_v11 = vld [vmem:[%s7386_s3 + $0x13c] ss:$12 sps:$4 sm:$0xff]   ;;  %v7499_v12 = vpack.c.bf16 %v563_v6, %v560_v4  ;;  %v1238_v13 = vld [vmem:[#allocation2] sm:$0xfe]  ;;  %v6405_v28 = vld [vmem:[%s7386_s3 + $0x16c] ss:$12 sps:$4 sm:$0xff]  }
  0xba   : > { %6059 = vmatprep.subr.bf16.mxu1 %v7115_v7  ;;  %1058 = vmatprep.subr.bf16.mxu0 %v6357_v32  ;;  %v1352_v14 = vshrl.u32 %v1245_v5, 16  ;;  %v1354_v15 = vshll.u32 %v1245_v5, 16  ;;  %v1244_v17 = vpack.c.bf16 %v1241_v16, %v1238_v13  ;;  %v6397_v18 = vld [vmem:[%s7386_s3 + $0x2c0] ss:$12 sps:$4 sm:$0xff]   ;;  %v6398_v20 = vld [vmem:[%s7386_s3 + $0x138] ss:$12 sps:$4 sm:$0xff]  }
  0xbb   : > { %1080 = vmatprep.mubr.bf16.mxu0 %v7499_v12  ;;  %v6399_v21 = vld [vmem:[%s7386_s3 + $0x398] ss:$12 sps:$4 sm:$0xff]   ;;  %v6400_v22 = vld [vmem:[%s7386_s3 + $0x154] ss:$12 sps:$4 sm:$0xff]   ;;  %v6404_v27 = vld [vmem:[%s7386_s3 + $0x3b0] ss:$12 sps:$4 sm:$0xff]  }
  0xbc   : > { %v1356_v19 = vrot.slane %v1354_v15, 1  ;;  %v6402_v24 = vld [vmem:[%s7386_s3 + $0x2d8] ss:$12 sps:$4 sm:$0xff]   ;;  %v1347_v25 = vshll.u32 %v1244_v17, 16  ;;  %v6407_v29 = vld [vmem:[%s7386_s3 + $0x2f0] ss:$12 sps:$4 sm:$0xff]  }
  0xbd   : > { %6060 = vmatpush3.bf16.msra.mxu1 %v6359_v33  ;;  %1059 = vmatpush1.bf16.msra.mxu0 %v6360_v34  ;;  %v1345_v30 = vshrl.u32 %v1244_v17, 16  ;;  %v6408_v32 = vld [vmem:[%s7386_s3 + $0x168] ss:$12 sps:$4 sm:$0xff]   ;;  %v559_v33 = vld [vmem:[#allocation2] sm:$0xff]  ;;  %v562_v34 = vld [vmem:[#allocation2 + $0x18] sm:$0x3f] }
  0xbe   : > { %6061 = vmatprep.subr.bf16.mxu1 %v7115_v7  ;;  %1060 = vmatprep.subr.bf16.mxu0 %v6361_v35  ;;  %v7506_v23 = vor.u32 %v1356_v19, %v1352_v14  ;;  %v1349_v31 = vrot.slane %v1347_v25, 1  ;;  %v6411_v35 = vld [vmem:[%s7386_s3 + $0x184] ss:$12 sps:$4 sm:$0xff]   ;;  %v6416_v41 = vld [vmem:[%s7386_s3 + $0x3e0] ss:$12 sps:$4 sm:$0xff]  }
  0xbf   : > { %v6413_v42 = vld [vmem:[%s7386_s3 + $0x198] ss:$12 sps:$4 sm:$0xff]   ;;  %v6440_v3 = vld [vmem:[%s7386_s3 + $0x470] ss:$12 sps:$4 sm:$0xff]   ;;  %v6437_v4 = vld [vmem:[%s7386_s3 + $0x228] ss:$12 sps:$4 sm:$0xff]  }
  0xc0   : > { %v6439_v2 = vld [vmem:[%s7386_s3 + $0x22c] ss:$12 sps:$4 sm:$0xff]   ;;  %v6443_v13 = vld [vmem:[%s7386_s3 + $0x488] ss:$12 sps:$4 sm:$0xff]  }
  0xc1   : > { %6062 = vmatpush3.bf16.msra.mxu1 %v6363_v36  ;;  %1061 = vmatpush1.bf16.msra.mxu0 %v6364_v37  ;;  %v7516_v36 = vor.u32 %v1349_v31, %v1345_v30  ;;  %v6412_v37 = vld [vmem:[%s7386_s3 + $0x3c8] ss:$12 sps:$4 sm:$0xff]   ;;  %v6445_v16 = vld [vmem:[%s7386_s3 + $0x560] ss:$12 sps:$4 sm:$0xff]   ;;  %v6456_v30 = vld [vmem:[%s7386_s3 + $0x50] ss:$12 sps:$4 sm:$0xff]  }
  0xc2   : > { %6063 = vmatprep.subr.bf16.mxu1 %v7115_v7  ;;  %1062 = vmatprep.subr.bf16.mxu0 %v6365_v38  ;;  %v7519_v38 = vpack.c.bf16 %v562_v34, %v559_v33  ;;  %v6444_v15 = vld [vmem:[%s7386_s3 + $0x8] ss:$12 sps:$4 sm:$0xff]   ;;  %v6446_v17 = vld [vmem:[%s7386_s3 + $0xe0] ss:$12 sps:$4 sm:$0xff]  }
  0xc3   : > { %v6447_v19 = vld [vmem:[%s7386_s3 + $0x4a0] ss:$12 sps:$4 sm:$0xff]   ;;  %v6457_v31 = vld [vmem:[%s7386_s3 + $0x5a8] ss:$12 sps:$4 sm:$0xff]  }
  0xc4   : > { %v6459_v33 = vld [vmem:[%s7386_s3 + $0x4e8] ss:$12 sps:$4 sm:$0xff]  }
  0xc5   : > { %6064 = vmatpush3.bf16.msra.mxu1 %v6367_v39  ;;  %1063 = vmatpush1.bf16.msra.mxu0 %v6368_v40  ;;  %v6409_v39 = vld [vmem:[%s7386_s3 + $0x180] ss:$12 sps:$4 sm:$0xff]   ;;  %v6415_v40 = vld [vmem:[%s7386_s3 + $0x19c] ss:$12 sps:$4 sm:$0xff]  }
  0xc6   : > { %5894 = vmatprep.subr.bf16.mxu1 %v6369_v43  ;;  %1064 = vmatprep.subr.bf16.mxu0 %v6370_v44  ;;  %v6419_v43 = vld [vmem:[%s7386_s3 + $0x1b4] ss:$12 sps:$4 sm:$0xff]   ;;  %v7118_v44 = vmov 0  }
  0xc7   : > { %v6460_v34 = vld [vmem:[%s7386_s3 + $0x68] ss:$12 sps:$4 sm:$0xff]  }
  0xc8   : > { %6066 = vmatmul.mubr.bf16.vlgmr.msra.gmra.mrb[0].mxu1 %v7476_v45 }
  0xc9   : > { %5895 = vmatpush3.bf16.msra.mxu1 %v6372_v46  ;;  %1065 = vmatpush1.bf16.msra.mxu0 %v6373_v47  ;;  %v6420_v46 = vld [vmem:[%s7386_s3 + $0x3f8] ss:$12 sps:$4 sm:$0xff]   ;;  %v6417_v47 = vld [vmem:[%s7386_s3 + $0x1b0] ss:$12 sps:$4 sm:$0xff]  }
  0xca   : > { %5896 = vmatprep.subr.bf16.mxu1 %v6374_v48  ;;  %1066 = vmatprep.subr.bf16.mxu0 %v6375_v49  ;;  %v6423_v48 = vld [vmem:[%s7386_s3 + $0x1cc] ss:$12 sps:$4 sm:$0xff]   ;;  %v6421_v49 = vld [vmem:[%s7386_s3 + $0x1c8] ss:$12 sps:$4 sm:$0xff]  }
  0xcb   : > { %1870 = vmatprep.mubr.bf16.mxu1 %v7506_v23 }
  0xcd   : > { %5897 = vmatpush3.bf16.msra.mxu1 %v6377_v50  ;;  %1067 = vmatpush1.bf16.msra.mxu0 %v6378_v51  ;;  %v6424_v50 = vld [vmem:[%s7386_s3 + $0x410] ss:$12 sps:$4 sm:$0xff]  }
  0xce   : > { %5898 = vmatprep.subr.bf16.mxu1 %v6379_v52  ;;  %1068 = vmatprep.subr.bf16.mxu0 %v6380_v53  ;;  %v6427_v51 = vld [vmem:[%s7386_s3 + $0x1e4] ss:$12 sps:$4 sm:$0xff]   ;;  %v6428_v52 = vld [vmem:[%s7386_s3 + $0x428] ss:$12 sps:$4 sm:$0xff]  }
  0xcf   : > { %v1240_v53 = vld [vmem:[#allocation2 + $0x10] sm:$0xfe] }
  0xd1   : > { %5899 = vmatpush3.bf16.msra.mxu1 %v6382_v54  ;;  %1069 = vmatpush1.bf16.msra.mxu0 %v6383_v55  ;;  %v1243_v54 = vld [vmem:[#allocation2 + $0x28] sm:$0x7f] }
  0xd2   : > { %5900 = vmatprep.subr.bf16.mxu1 %v6384_v56  ;;  %1070 = vmatprep.subr.bf16.mxu0 %v6385_v57  ;;  %v6425_v55 = vld [vmem:[%s7386_s3 + $0x1e0] ss:$12 sps:$4 sm:$0xff]   ;;  %v6431_v56 = vld [vmem:[%s7386_s3 + $0x1fc] ss:$12 sps:$4 sm:$0xff]   ;;  %v1246_v57 = vpack.c.bf16 %v1243_v54, %v1240_v53  ;;  %v6475_v54 = vld [vmem:[%s7386_s3 + $0x244] ss:$12 sps:$4 sm:$0xff]  }
  0xd3   : > { %v6472_v53 = vld [vmem:[%s7386_s3 + $0xb0] ss:$12 sps:$4 sm:$0xff]  }
  0xd4   : > { %v1359_v5 = vshrl.u32 %v1246_v57, 16 }
  0xd5   : > { %5901 = vmatpush3.bf16.msra.mxu1 %v6387_v58  ;;  %1071 = vmatpush1.bf16.msra.mxu0 %v6388_v59  ;;  %v6432_v58 = vld [vmem:[%s7386_s3 + $0x440] ss:$12 sps:$4 sm:$0xff]   ;;  %v6429_v59 = vld [vmem:[%s7386_s3 + $0x1f8] ss:$12 sps:$4 sm:$0xff]  }
  0xd6   : > { %5902 = vmatprep.subr.bf16.mxu1 %v6389_v60  ;;  %1072 = vmatprep.subr.bf16.mxu0 %v6390_v61  ;;  %v6435_v60 = vld [vmem:[%s7386_s3 + $0x214] ss:$12 sps:$4 sm:$0xff]   ;;  %v6433_v61 = vld [vmem:[%s7386_s3 + $0x210] ss:$12 sps:$4 sm:$0xff]  }
  0xd9   : > { %5903 = vmatpush3.bf16.msra.mxu1 %v6392_v62  ;;  %1073 = vmatpush1.bf16.msra.mxu0 %v6393_v63  ;;  %v1361_v62 = vshll.u32 %v1246_v57, 16  ;;  %v6436_v63 = vld [vmem:[%s7386_s3 + $0x458] ss:$12 sps:$4 sm:$0xff]   ;;  %v6473_v57 = vld [vmem:[%s7386_s3 + $0x240] ss:$12 sps:$4 sm:$0xff]  }
  0xda   : > { %5904 = vmatprep.subr.bf16.mxu1 %v6394_v10  ;;  %1074 = vmatprep.subr.bf16.mxu0 %v6395_v11  ;;  %v6441_v10 = vld [vmem:[%s7386_s3 + $0x548] ss:$12 sps:$4 sm:$0xff]  }
  0xdb   : > { %v1363_v6 = vrot.slane %v1361_v62, 1  ;;  %v6442_v11 = vld [vmem:[%s7386_s3 + $0xc8] ss:$12 sps:$4 sm:$0xff]   ;;  %v6481_v62 = vld [vmem:[%s7386_s3 + $0x270] ss:$12 sps:$4 sm:$0xff]  }
  0xdd   : > { %5905 = vmatpush3.bf16.msra.mxu1 %v6397_v18  ;;  %1075 = vmatpush1.bf16.msra.mxu0 %v6398_v20  ;;  %v7559_v14 = vor.u32 %v1363_v6, %v1359_v5  ;;  %v1930_v18 = vld [vmem:[#allocation2 + $0x20] sm:$0xff]  ;;  %v6495_v6 = vld [vmem:[%s7386_s3 + $0x2bc] ss:$12 sps:$4 sm:$0xff]  }
  0xde   : > { %5906 = vmatprep.subr.bf16.mxu1 %v6399_v21  ;;  %1076 = vmatprep.subr.bf16.mxu0 %v6400_v22  ;;  %v6448_v20 = vld [vmem:[%s7386_s3 + $0x20] ss:$12 sps:$4 sm:$0xff]   ;;  %v6449_v21 = vld [vmem:[%s7386_s3 + $0x578] ss:$12 sps:$4 sm:$0xff]  }
  0xdf   : > { %v6450_v22 = vld [vmem:[%s7386_s3 + $0xf8] ss:$12 sps:$4 sm:$0xff]   ;;  %v6489_v5 = vld [vmem:[%s7386_s3 + $0x2a0] ss:$12 sps:$4 sm:$0xff]  }
  0xe1   : > { %5907 = vmatpush3.bf16.msra.mxu1 %v6402_v24  ;;  %1077 = vmatpush1.bf16.msra.mxu0 %v6403_v26  ;;  %v1927_v24 = vld [vmem:[#allocation2 + $0x8] sm:$0xfc]  ;;  %v6451_v26 = vld [vmem:[%s7386_s3 + $0x4b8] ss:$12 sps:$4 sm:$0xff]  }
  0xe2   : > { %5908 = vmatprep.subr.bf16.mxu1 %v6404_v27  ;;  %1078 = vmatprep.subr.bf16.mxu0 %v6405_v28  ;;  %v1933_v25 = vpack.c.bf16 %v1930_v18, %v1927_v24  ;;  %v6452_v27 = vld [vmem:[%s7386_s3 + $0x38] ss:$12 sps:$4 sm:$0xff]   ;;  %v6497_v18 = vld [vmem:[%s7386_s3 + $0x2d0] ss:$12 sps:$4 sm:$0xff]  }
  0xe3   : > { %v6507_v24 = vld [vmem:[%s7386_s3 + $0x304] ss:$12 sps:$4 sm:$0xff]  }
  0xe4   : > { %v7574_v28 = vrot.slane %v1933_v25, 1 }
  0xe5   : > { %5909 = vmatpush3.bf16.msra.mxu1 %v6407_v29  ;;  %1079 = vmatpush1.bf16.msra.mxu0 %v6408_v32  ;;  %v6454_v29 = vld [vmem:[%s7386_s3 + $0x110] ss:$12 sps:$4 sm:$0xff]   ;;  %v6458_v32 = vld [vmem:[%s7386_s3 + $0x128] ss:$12 sps:$4 sm:$0xff]  }
  0xe6   : > { %6069 = vmatprep.subr.bf16.mxu1 %v7115_v7  ;;  %1091 = vmatprep.subr.bf16.mxu0 %v6411_v35  ;;  %v6461_v35 = vld [vmem:[%s7386_s3 + $0x5c0] ss:$12 sps:$4 sm:$0xff]  }
  0xe8   : > { %1871 = vmatmul.mubr.bf16.vlgmr.msra.gmra.mrb[4].mxu1 %v7516_v36  ;;  %1081 = vmatmul.mubr.bf16.vlgmr.msra.gmra.mrb[0].mxu0 %v7519_v38 }
  0xe9   : > { %6070 = vmatpush3.bf16.msra.mxu1 %v6412_v37  ;;  %1092 = vmatpush1.bf16.msra.mxu0 %v6409_v39  ;;  %v6462_v37 = vld [vmem:[%s7386_s3 + $0x140] ss:$12 sps:$4 sm:$0xff]  }
  0xea   : > { %6071 = vmatprep.subr.bf16.mxu1 %v7115_v7  ;;  %1093 = vmatprep.subr.bf16.mxu0 %v6415_v40  ;;  %v6463_v39 = vld [vmem:[%s7386_s3 + $0x500] ss:$12 sps:$4 sm:$0xff]  }
  0xeb   : > { %6085 = vmatprep.mubr.msk.bf16.mxu1 %vm7117_vm7, %v7115_v7  ;;  %1123 = vmatprep.mubr.bf16.mxu0 %v7118_v44  ;;  %v6464_v40 = vld [vmem:[%s7386_s3 + $0x80] ss:$12 sps:$4 sm:$0xff]  }
  0xed   : > { %6072 = vmatpush3.bf16.msra.mxu1 %v6416_v41  ;;  %1094 = vmatpush1.bf16.msra.mxu0 %v6413_v42  ;;  %v6465_v41 = vld [vmem:[%s7386_s3 + $0x5d8] ss:$12 sps:$4 sm:$0xff]  }
  0xee   : > { %6073 = vmatprep.subr.bf16.mxu1 %v7115_v7  ;;  %1095 = vmatprep.subr.bf16.mxu0 %v6419_v43  ;;  %v6466_v42 = vld [vmem:[%s7386_s3 + $0x158] ss:$12 sps:$4 sm:$0xff]  }
  0xef   : > { %v6467_v43 = vld [vmem:[%s7386_s3 + $0x518] ss:$12 sps:$4 sm:$0xff]  }
  0xf1   : > { %6074 = vmatpush3.bf16.msra.mxu1 %v6420_v46  ;;  %1096 = vmatpush1.bf16.msra.mxu0 %v6417_v47  ;;  %v6468_v46 = vld [vmem:[%s7386_s3 + $0x98] ss:$12 sps:$4 sm:$0xff]  }
  0xf2   : > { %6075 = vmatprep.subr.bf16.mxu1 %v7115_v7  ;;  %1097 = vmatprep.subr.bf16.mxu0 %v6423_v48  ;;  %v1926_v47 = vld [vmem:[#allocation2] sm:$0xfc]  ;;  %v1929_v48 = vld [vmem:[#allocation2 + $0x18] sm:$0xff] }
  0xf5   : > { %6076 = vmatpush3.bf16.msra.mxu1 %v6424_v50  ;;  %1098 = vmatpush1.bf16.msra.mxu0 %v6421_v49  ;;  %v6469_v49 = vld [vmem:[%s7386_s3 + $0x5f0] ss:$12 sps:$4 sm:$0xff]  }
  0xf6   : > { %6077 = vmatprep.subr.bf16.mxu1 %v7115_v7  ;;  %1099 = vmatprep.subr.bf16.mxu0 %v6427_v51  ;;  %v6470_v50 = vld [vmem:[%s7386_s3 + $0x170] ss:$12 sps:$4 sm:$0xff]   ;;  %v1932_v51 = vpack.c.bf16 %v1929_v48, %v1926_v47  ;;  %v6532_v47 = vld [vmem:[%s7386_s3 + $0x3d8] ss:$12 sps:$4 sm:$0xff]   ;;  %v6537_v48 = vld [vmem:[%s7386_s3 + $0x3f4] ss:$12 sps:$4 sm:$0xff]  }
  0xf9   : > { %6078 = vmatpush3.bf16.msra.mxu1 %v6428_v52  ;;  %1100 = vmatpush1.bf16.msra.mxu0 %v6425_v55  ;;  %v6471_v52 = vld [vmem:[%s7386_s3 + $0x530] ss:$12 sps:$4 sm:$0xff]   ;;  %v7597_v55 = vrot.slane %v1932_v51, 1  ;;  %v6538_v51 = vld [vmem:[%s7386_s3 + $0x408] ss:$12 sps:$4 sm:$0xff]  }
  0xfa   : > { %6079 = vmatprep.subr.bf16.mxu1 %v7115_v7  ;;  %1101 = vmatprep.subr.bf16.mxu0 %v6431_v56  ;;  %v6476_v56 = vld [vmem:[%s7386_s3 + $0x608] ss:$12 sps:$4 sm:$0xff]  }
  0xfd   : > { %6080 = vmatpush3.bf16.msra.mxu1 %v6432_v58  ;;  %1102 = vmatpush1.bf16.msra.mxu0 %v6429_v59  ;;  %v6479_v58 = vld [vmem:[%s7386_s3 + $0x25c] ss:$12 sps:$4 sm:$0xff]   ;;  %v6480_v59 = vld [vmem:[%s7386_s3 + $0x620] ss:$12 sps:$4 sm:$0xff]  }
  0xfe   : > { %6081 = vmatprep.subr.bf16.mxu1 %v7115_v7  ;;  %1103 = vmatprep.subr.bf16.mxu0 %v6435_v60  ;;  %v6477_v60 = vld [vmem:[%s7386_s3 + $0x258] ss:$12 sps:$4 sm:$0xff]  }
 0x101   : > { %6082 = vmatpush3.bf16.msra.mxu1 %v6436_v63  ;;  %1104 = vmatpush1.bf16.msra.mxu0 %v6433_v61  ;;  %v6483_v61 = vld [vmem:[%s7386_s3 + $0x274] ss:$12 sps:$4 sm:$0xff]   ;;  %v6487_v63 = vld [vmem:[%s7386_s3 + $0x28c] ss:$12 sps:$4 sm:$0xff]  }
 0x102   : > { %6083 = vmatprep.subr.bf16.mxu1 %v7115_v7  ;;  %1105 = vmatprep.subr.bf16.mxu0 %v6439_v2  ;;  %v6488_v2 = vld [vmem:[%s7386_s3 + $0x650] ss:$12 sps:$4 sm:$0xff]  }
 0x105   : > { %6084 = vmatpush3.bf16.msra.mxu1 %v6440_v3  ;;  %1106 = vmatpush1.bf16.msra.mxu0 %v6437_v4  ;;  %v6485_v3 = vld [vmem:[%s7386_s3 + $0x288] ss:$12 sps:$4 sm:$0xff]  }
 0x106   : > { %5925 = vmatprep.subr.bf16.mxu1 %v6441_v10  ;;  %5863 = vmatprep.subr.bf16.mxu0 %v6442_v11  ;;  %v6492_v4 = vld [vmem:[%s7386_s3 + $0x668] ss:$12 sps:$4 sm:$0xff]   ;;  %v6496_v10 = vld [vmem:[%s7386_s3 + $0x680] ss:$12 sps:$4 sm:$0xff]   ;;  %v6493_v11 = vld [vmem:[%s7386_s3 + $0x2b8] ss:$12 sps:$4 sm:$0xff]  }
 0x108   : > { %6086 = vmatmul.mubr.bf16.vlgmr.msra.gmra.mrb[0].mxu1 %v7559_v14  ;;  %1124 = vmatmul.mubr.bf16.vlgmr.msra.gmra.mrb[0].mxu0 %v7476_v45  ;;  %v6453_v45 = vld [vmem:[%s7386_s3 + $0x590] ss:$12 sps:$4 sm:$0xff]  }
 0x109   : > { %5926 = vmatpush3.bf16.msra.mxu1 %v6443_v13  ;;  %5864 = vmatpush3.bf16.msra.mxu0 %v6444_v15  ;;  %v6499_v13 = vld [vmem:[%s7386_s3 + $0x2d4] ss:$12 sps:$4 sm:$0xff]   ;;  %v6500_v15 = vld [vmem:[%s7386_s3 + $0x698] ss:$12 sps:$4 sm:$0xff]  }
 0x10a   : > { %5927 = vmatprep.subr.bf16.mxu1 %v6445_v16  ;;  %5865 = vmatprep.subr.bf16.mxu0 %v6446_v17  ;;  %v1928_v16 = vld [vmem:[#allocation2 + $0x10] sm:$0xfc]  ;;  %v1931_v17 = vld [vmem:[#allocation2 + $0x28] sm:$0xff] }
 0x10b   : > { %1166 = vmatprep.mubr.bf16.mxu0 %v7499_v12  ;;  %2543 = vmatprep.mubr.bf16.mxu1 %v7574_v28  ;;  %v6455_v12 = vld [vmem:[%s7386_s3 + $0x4d0] ss:$12 sps:$4 sm:$0xff]  }
 0x10d   : > { %5928 = vmatpush3.bf16.msra.mxu1 %v6447_v19  ;;  %5866 = vmatpush3.bf16.msra.mxu0 %v6448_v20  ;;  %v6503_v19 = vld [vmem:[%s7386_s3 + $0x2ec] ss:$12 sps:$4 sm:$0xff]   ;;  %v1934_v20 = vpack.c.bf16 %v1931_v17, %v1928_v16  ;;  %v6582_v17 = vld [vmem:[%s7386_s3 + $0x55c] ss:$12 sps:$4 sm:$0xff]  }
 0x10e   : > { %5929 = vmatprep.subr.bf16.mxu1 %v6449_v21  ;;  %5867 = vmatprep.subr.bf16.mxu0 %v6450_v22  ;;  %v6504_v21 = vld [vmem:[%s7386_s3 + $0x6b0] ss:$12 sps:$4 sm:$0xff]   ;;  %v6501_v22 = vld [vmem:[%s7386_s3 + $0x2e8] ss:$12 sps:$4 sm:$0xff]   ;;  %v6577_v16 = vld [vmem:[%s7386_s3 + $0x540] ss:$12 sps:$4 sm:$0xff]  }
 0x10f   : > { %v7636_v25 = vrot.slane %v1934_v20, 1  ;;  %v6630_v20 = vld [vmem:[%s7400_s19 + $0x1c] ss:$12 sps:$4 sm:$0xff]  }
 0x111   : > { %5930 = vmatpush3.bf16.msra.mxu1 %v6451_v26  ;;  %5868 = vmatpush3.bf16.msra.mxu0 %v6452_v27  ;;  %v6505_v26 = vld [vmem:[%s7386_s3 + $0x300] ss:$12 sps:$4 sm:$0xff]   ;;  %v6510_v27 = vld [vmem:[%s7386_s3 + $0x31c] ss:$12 sps:$4 sm:$0xff]  }
 0x112   : > { %5931 = vmatprep.subr.bf16.mxu1 %v6453_v45  ;;  %5869 = vmatprep.subr.bf16.mxu0 %v6454_v29  ;;  %v6508_v45 = vld [vmem:[%s7386_s3 + $0x318] ss:$12 sps:$4 sm:$0xff]   ;;  %v6513_v29 = vld [vmem:[%s7386_s3 + $0x334] ss:$12 sps:$4 sm:$0xff]  }
 0x115   : > { %5932 = vmatpush3.bf16.msra.mxu1 %v6455_v12  ;;  %5870 = vmatpush3.bf16.msra.mxu0 %v6456_v30  ;;  %v6511_v12 = vld [vmem:[%s7386_s3 + $0x330] ss:$12 sps:$4 sm:$0xff]   ;;  %v6516_v30 = vld [vmem:[%s7386_s3 + $0x34c] ss:$12 sps:$4 sm:$0xff]  }
 0x116   : > { %5933 = vmatprep.subr.bf16.mxu1 %v6457_v31  ;;  %5871 = vmatprep.subr.bf16.mxu0 %v6458_v32  ;;  %v6514_v31 = vld [vmem:[%s7386_s3 + $0x348] ss:$12 sps:$4 sm:$0xff]   ;;  %v6519_v32 = vld [vmem:[%s7386_s3 + $0x364] ss:$12 sps:$4 sm:$0xff]  }
 0x119   : > { %5934 = vmatpush3.bf16.msra.mxu1 %v6459_v33  ;;  %5872 = vmatpush3.bf16.msra.mxu0 %v6460_v34  ;;  %v6517_v33 = vld [vmem:[%s7386_s3 + $0x360] ss:$12 sps:$4 sm:$0xff]   ;;  %v6522_v34 = vld [vmem:[%s7386_s3 + $0x37c] ss:$12 sps:$4 sm:$0xff]  }
 0x11a   : > { %5935 = vmatprep.subr.bf16.mxu1 %v6461_v35  ;;  %5873 = vmatprep.subr.bf16.mxu0 %v6462_v37  ;;  %v6520_v35 = vld [vmem:[%s7386_s3 + $0x378] ss:$12 sps:$4 sm:$0xff]   ;;  %v6525_v37 = vld [vmem:[%s7386_s3 + $0x394] ss:$12 sps:$4 sm:$0xff]  }
 0x11d   : > { %5936 = vmatpush3.bf16.msra.mxu1 %v6463_v39  ;;  %5874 = vmatpush3.bf16.msra.mxu0 %v6464_v40  ;;  %v6523_v39 = vld [vmem:[%s7386_s3 + $0x390] ss:$12 sps:$4 sm:$0xff]   ;;  %v6528_v40 = vld [vmem:[%s7386_s3 + $0x3ac] ss:$12 sps:$4 sm:$0xff]  }
 0x11e   : > { %5937 = vmatprep.subr.bf16.mxu1 %v6465_v41  ;;  %5875 = vmatprep.subr.bf16.mxu0 %v6466_v42  ;;  %v6526_v41 = vld [vmem:[%s7386_s3 + $0x3a8] ss:$12 sps:$4 sm:$0xff]   ;;  %v6531_v42 = vld [vmem:[%s7386_s3 + $0x3c4] ss:$12 sps:$4 sm:$0xff]  }
 0x121   : > { %5938 = vmatpush3.bf16.msra.mxu1 %v6467_v43  ;;  %5876 = vmatpush3.bf16.msra.mxu0 %v6468_v46  ;;  %v6529_v43 = vld [vmem:[%s7386_s3 + $0x3c0] ss:$12 sps:$4 sm:$0xff]   ;;  %v6534_v46 = vld [vmem:[%s7386_s3 + $0x3dc] ss:$12 sps:$4 sm:$0xff]  }
 0x122   : > { %5939 = vmatprep.subr.bf16.mxu1 %v6469_v49  ;;  %5877 = vmatprep.subr.bf16.mxu0 %v6470_v50  ;;  %v6535_v49 = vld [vmem:[%s7386_s3 + $0x3f0] ss:$12 sps:$4 sm:$0xff]   ;;  %v6540_v50 = vld [vmem:[%s7386_s3 + $0x40c] ss:$12 sps:$4 sm:$0xff]  }
 0x125   : > { %5940 = vmatpush3.bf16.msra.mxu1 %v6471_v52  ;;  %5878 = vmatpush3.bf16.msra.mxu0 %v6472_v53  ;;  %v6543_v52 = vld [vmem:[%s7386_s3 + $0x424] ss:$12 sps:$4 sm:$0xff]   ;;  %v6546_v53 = vld [vmem:[%s7386_s3 + $0x43c] ss:$12 sps:$4 sm:$0xff]  }
 0x126   : > { %6089 = vmatprep.subr.bf16.mxu1 %v7115_v7  ;;  %1752 = vmatprep.subr.bf16.mxu0 %v6475_v54  ;;  %v6544_v54 = vld [vmem:[%s7386_s3 + $0x438] ss:$12 sps:$4 sm:$0xff]  }
 0x128   : > { %2544 = vmatmul.mubr.bf16.vlgmr.msra.gmra.mrb[8].mxu1 %v7597_v55  ;;  %1167 = vmatmul.mubr.bf16.vlgmr.msra.gmra.mrb[4].mxu0 %v7519_v38  ;;  %v6484_v38 = vld [vmem:[%s7386_s3 + $0x638] ss:$12 sps:$4 sm:$0xff]  }
 0x129   : > { %6090 = vmatpush3.bf16.msra.mxu1 %v6476_v56  ;;  %1753 = vmatpush1.bf16.msra.mxu0 %v6473_v57  ;;  %v6549_v56 = vld [vmem:[%s7386_s3 + $0x454] ss:$12 sps:$4 sm:$0xff]   ;;  %v6547_v57 = vld [vmem:[%s7386_s3 + $0x450] ss:$12 sps:$4 sm:$0xff]  }
 0x12a   : > { %6091 = vmatprep.subr.bf16.mxu1 %v7115_v7  ;;  %1754 = vmatprep.subr.bf16.mxu0 %v6479_v58  ;;  %v6552_v58 = vld [vmem:[%s7386_s3 + $0x46c] ss:$12 sps:$4 sm:$0xff]  }
 0x12b   : > { %6105 = vmatprep.mubr.msk.bf16.mxu1 %vm7117_vm7, %v7115_v7  ;;  %1784 = vmatprep.mubr.bf16.mxu0 %v7506_v23  ;;  %v6491_v23 = vld [vmem:[%s7386_s3 + $0x2a4] ss:$12 sps:$4 sm:$0xff]  }
 0x12d   : > { %6092 = vmatpush3.bf16.msra.mxu1 %v6480_v59  ;;  %1755 = vmatpush1.bf16.msra.mxu0 %v6477_v60  ;;  %v6550_v59 = vld [vmem:[%s7386_s3 + $0x468] ss:$12 sps:$4 sm:$0xff]   ;;  %v6555_v60 = vld [vmem:[%s7386_s3 + $0x484] ss:$12 sps:$4 sm:$0xff]  }
 0x12e   : > { %6093 = vmatprep.subr.bf16.mxu1 %v7115_v7  ;;  %1756 = vmatprep.subr.bf16.mxu0 %v6483_v61  ;;  %v6553_v61 = vld [vmem:[%s7386_s3 + $0x480] ss:$12 sps:$4 sm:$0xff]  }
 0x131   : > { %6094 = vmatpush3.bf16.msra.mxu1 %v6484_v38  ;;  %1757 = vmatpush1.bf16.msra.mxu0 %v6481_v62  ;;  %v6558_v38 = vld [vmem:[%s7386_s3 + $0x49c] ss:$12 sps:$4 sm:$0xff]   ;;  %v6556_v62 = vld [vmem:[%s7386_s3 + $0x498] ss:$12 sps:$4 sm:$0xff]  }
 0x132   : > { %6095 = vmatprep.subr.bf16.mxu1 %v7115_v7  ;;  %1758 = vmatprep.subr.bf16.mxu0 %v6487_v63  ;;  %v6561_v63 = vld [vmem:[%s7386_s3 + $0x4b4] ss:$12 sps:$4 sm:$0xff]  }
 0x135   : > { %6096 = vmatpush3.bf16.msra.mxu1 %v6488_v2  ;;  %1759 = vmatpush1.bf16.msra.mxu0 %v6485_v3  ;;  %v6559_v2 = vld [vmem:[%s7386_s3 + $0x4b0] ss:$12 sps:$4 sm:$0xff]   ;;  %v6564_v3 = vld [vmem:[%s7386_s3 + $0x4cc] ss:$12 sps:$4 sm:$0xff]  }
 0x136   : > { %6097 = vmatprep.subr.bf16.mxu1 %v7115_v7  ;;  %1760 = vmatprep.subr.bf16.mxu0 %v6491_v23  ;;  %v6562_v23 = vld [vmem:[%s7386_s3 + $0x4c8] ss:$12 sps:$4 sm:$0xff]  }
 0x139   : > { %6098 = vmatpush3.bf16.msra.mxu1 %v6492_v4  ;;  %1761 = vmatpush1.bf16.msra.mxu0 %v6489_v5  ;;  %v6567_v4 = vld [vmem:[%s7386_s3 + $0x4e4] ss:$12 sps:$4 sm:$0xff]   ;;  %v6570_v5 = vld [vmem:[%s7386_s3 + $0x4fc] ss:$12 sps:$4 sm:$0xff]  }
 0x13a   : > { %6099 = vmatprep.subr.bf16.mxu1 %v7115_v7  ;;  %1762 = vmatprep.subr.bf16.mxu0 %v6495_v6  ;;  %v6573_v6 = vld [vmem:[%s7386_s3 + $0x514] ss:$12 sps:$4 sm:$0xff]  }
 0x13d   : > { %6100 = vmatpush3.bf16.msra.mxu1 %v6496_v10  ;;  %1763 = vmatpush1.bf16.msra.mxu0 %v6493_v11  ;;  %v6571_v10 = vld [vmem:[%s7386_s3 + $0x510] ss:$12 sps:$4 sm:$0xff]   ;;  %v6576_v11 = vld [vmem:[%s7386_s3 + $0x52c] ss:$12 sps:$4 sm:$0xff]  }
 0x13e   : > { %6101 = vmatprep.subr.bf16.mxu1 %v7115_v7  ;;  %1764 = vmatprep.subr.bf16.mxu0 %v6499_v13  ;;  %v6574_v13 = vld [vmem:[%s7386_s3 + $0x528] ss:$12 sps:$4 sm:$0xff]  }
 0x141   : > { %6102 = vmatpush3.bf16.msra.mxu1 %v6500_v15  ;;  %1765 = vmatpush1.bf16.msra.mxu0 %v6497_v18  ;;  %v6579_v15 = vld [vmem:[%s7386_s3 + $0x544] ss:$12 sps:$4 sm:$0xff]  }
 0x142   : > { %6103 = vmatprep.subr.bf16.mxu1 %v7115_v7  ;;  %1766 = vmatprep.subr.bf16.mxu0 %v6503_v19  ;;  %v6625_v18 = vld [vmem:[%s7400_s19] ss:$12 sps:$4 sm:$0xff]   ;;  %v6627_v19 = vld [vmem:[%s7400_s19 + $0x4] ss:$12 sps:$4 sm:$0xff]  }
 0x145   : > { %6104 = vmatpush3.bf16.msra.mxu1 %v6504_v21  ;;  %1767 = vmatpush1.bf16.msra.mxu0 %v6501_v22  ;;  %v6580_v21 = vld [vmem:[%s7386_s3 + $0x558] ss:$12 sps:$4 sm:$0xff]   ;;  %v6628_v22 = vld [vmem:[%s7400_s19 + $0x18] ss:$12 sps:$4 sm:$0xff]  }
 0x146   : > { %1768 = vmatprep.subr.bf16.mxu0 %v6507_v24  ;;  %3129 = vmatprep.subr.bf16.mxu1 %v6627_v19  ;;  %v6585_v24 = vld [vmem:[%s7386_s3 + $0x574] ss:$12 sps:$4 sm:$0xff]   ;;  %v6653_v19 = vld [vmem:[%s7400_s19 + $0x8] ss:$12 sps:$4 sm:$0xff]  }
 0x148   : > { %6106 = vmatmul.mubr.bf16.vlgmr.msra.gmra.mrb[0].mxu1 %v7636_v25 }
 0x149   : > { %1769 = vmatpush1.bf16.msra.mxu0 %v6505_v26  ;;  %3130 = vmatpush1.bf16.msra.mxu1 %v6625_v18  ;;  %v6633_v26 = vld [vmem:[%s7400_s19 + $0x34] ss:$12 sps:$4 sm:$0xff]  }
 0x14a   : > { %1770 = vmatprep.subr.bf16.mxu0 %v6510_v27  ;;  %3131 = vmatprep.subr.bf16.mxu1 %v6630_v20  ;;  %v6583_v27 = vld [vmem:[%s7386_s3 + $0x570] ss:$12 sps:$4 sm:$0xff]  }
 0x14b   : > { %v6652_v18 = vld [vmem:[%s7400_s19 + $0xc8] ss:$12 sps:$4 sm:$0xff]   ;;  %v6657_v20 = vld [vmem:[%s7400_s19 + $0xe0] ss:$12 sps:$4 sm:$0xff]  }
 0x14d   : > { %1771 = vmatpush1.bf16.msra.mxu0 %v6508_v45  ;;  %3132 = vmatpush1.bf16.msra.mxu1 %v6628_v22  ;;  %v6631_v45 = vld [vmem:[%s7400_s19 + $0x30] ss:$12 sps:$4 sm:$0xff]   ;;  %v6662_v22 = vld [vmem:[%s7400_s19 + $0xf8] ss:$12 sps:$4 sm:$0xff]  }
 0x14e   : > { %1772 = vmatprep.subr.bf16.mxu0 %v6513_v29  ;;  %v6588_v29 = vld [vmem:[%s7386_s3 + $0x58c] ss:$12 sps:$4 sm:$0xff]   ;;  %3133 = vmatprep.subr.bf16.mxu1 %v6633_v26  ;;  %v7758_v26 = vld [vmem:[%s7394_s13] sm:$0x7] }
 0x151   : > { %1773 = vmatpush1.bf16.msra.mxu0 %v6511_v12  ;;  %v6636_v12 = vld [vmem:[%s7400_s19 + $0x4c] ss:$12 sps:$4 sm:$0xff]   ;;  %3134 = vmatpush1.bf16.msra.mxu1 %v6631_v45 }
 0x152   : > { %1774 = vmatprep.subr.bf16.mxu0 %v6516_v30  ;;  %v6586_v30 = vld [vmem:[%s7386_s3 + $0x588] ss:$12 sps:$4 sm:$0xff]   ;;  %3135 = vmatprep.subr.bf16.mxu1 %v6636_v12 }
 0x155   : > { %1775 = vmatpush1.bf16.msra.mxu0 %v6514_v31  ;;  %v6634_v31 = vld [vmem:[%s7400_s19 + $0x48] ss:$12 sps:$4 sm:$0xff]  }
 0x156   : > { %1776 = vmatprep.subr.bf16.mxu0 %v6519_v32  ;;  %v6591_v32 = vld [vmem:[%s7386_s3 + $0x5a4] ss:$12 sps:$4 sm:$0xff]   ;;  %3136 = vmatpush1.bf16.msra.mxu1 %v6634_v31 }
 0x159   : > { %1777 = vmatpush1.bf16.msra.mxu0 %v6517_v33  ;;  %v6639_v33 = vld [vmem:[%s7400_s19 + $0x64] ss:$12 sps:$4 sm:$0xff]  }
 0x15a   : > { %1778 = vmatprep.subr.bf16.mxu0 %v6522_v34  ;;  %v6589_v34 = vld [vmem:[%s7386_s3 + $0x5a0] ss:$12 sps:$4 sm:$0xff]   ;;  %3137 = vmatprep.subr.bf16.mxu1 %v6639_v33 }
 0x15d   : > { %1779 = vmatpush1.bf16.msra.mxu0 %v6520_v35  ;;  %v6637_v35 = vld [vmem:[%s7400_s19 + $0x60] ss:$12 sps:$4 sm:$0xff]  }
 0x15e   : > { %1780 = vmatprep.subr.bf16.mxu0 %v6525_v37  ;;  %v6594_v37 = vld [vmem:[%s7386_s3 + $0x5bc] ss:$12 sps:$4 sm:$0xff]   ;;  %3138 = vmatpush1.bf16.msra.mxu1 %v6637_v35 }
 0x161   : > { %1781 = vmatpush1.bf16.msra.mxu0 %v6523_v39  ;;  %v6642_v39 = vld [vmem:[%s7400_s19 + $0x7c] ss:$12 sps:$4 sm:$0xff]  }
 0x162   : > { %1782 = vmatprep.subr.bf16.mxu0 %v6528_v40  ;;  %v6592_v40 = vld [vmem:[%s7386_s3 + $0x5b8] ss:$12 sps:$4 sm:$0xff]   ;;  %3139 = vmatprep.subr.bf16.mxu1 %v6642_v39 }
 0x165   : > { %1783 = vmatpush1.bf16.msra.mxu0 %v6526_v41  ;;  %v6640_v41 = vld [vmem:[%s7400_s19 + $0x78] ss:$12 sps:$4 sm:$0xff]  }
 0x166   : > { %1795 = vmatprep.subr.bf16.mxu0 %v6531_v42  ;;  %v6597_v42 = vld [vmem:[%s7386_s3 + $0x5d4] ss:$12 sps:$4 sm:$0xff]   ;;  %3140 = vmatpush1.bf16.msra.mxu1 %v6640_v41 }
 0x168   : > { %1785 = vmatmul.mubr.bf16.vlgmr.msra.gmra.mrb[0].mxu0 %v7516_v36  ;;  %v6541_v36 = vld [vmem:[%s7386_s3 + $0x420] ss:$12 sps:$4 sm:$0xff]  }
 0x169   : > { %1796 = vmatpush1.bf16.msra.mxu0 %v6529_v43  ;;  %1827 = vmatprep.mubr.bf16.mxu0 %v7118_v44  ;;  %v6645_v43 = vld [vmem:[%s7400_s19 + $0x94] ss:$12 sps:$4 sm:$0xff]  }
 0x16a   : > { %1797 = vmatprep.subr.bf16.mxu0 %v6534_v46  ;;  %3141 = vmatprep.subr.bf16.mxu1 %v6645_v43 }
 0x16d   : > { %1798 = vmatpush1.bf16.msra.mxu0 %v6532_v47 }
 0x16e   : > { %1799 = vmatprep.subr.bf16.mxu0 %v6537_v48 }
 0x171   : > { %1800 = vmatpush1.bf16.msra.mxu0 %v6535_v49 }
 0x172   : > { %1801 = vmatprep.subr.bf16.mxu0 %v6540_v50  ;;  %v6595_v50 = vld [vmem:[%s7386_s3 + $0x5d0] ss:$12 sps:$4 sm:$0xff]  }
 0x175   : > { %1802 = vmatpush1.bf16.msra.mxu0 %v6538_v51 }
 0x176   : > { %1803 = vmatprep.subr.bf16.mxu0 %v6543_v52  ;;  %v6643_v52 = vld [vmem:[%s7400_s19 + $0x90] ss:$12 sps:$4 sm:$0xff]  }
 0x177   : > { %3142 = vmatpush1.bf16.msra.mxu1 %v6643_v52 }
 0x179   : > { %1804 = vmatpush1.bf16.msra.mxu0 %v6541_v36  ;;  %v6600_v36 = vld [vmem:[%s7386_s3 + $0x5ec] ss:$12 sps:$4 sm:$0xff]  }
 0x17a   : > { %1805 = vmatprep.subr.bf16.mxu0 %v6546_v53 }
 0x17d   : > { %1806 = vmatpush1.bf16.msra.mxu0 %v6544_v54  ;;  %v6648_v54 = vld [vmem:[%s7400_s19 + $0xac] ss:$12 sps:$4 sm:$0xff]  }
 0x17e   : > { %1807 = vmatprep.subr.bf16.mxu0 %v6549_v56  ;;  %v6598_v56 = vld [vmem:[%s7386_s3 + $0x5e8] ss:$12 sps:$4 sm:$0xff]   ;;  %3143 = vmatprep.subr.bf16.mxu1 %v6648_v54 }
 0x181   : > { %1808 = vmatpush1.bf16.msra.mxu0 %v6547_v57  ;;  %v6646_v57 = vld [vmem:[%s7400_s19 + $0xa8] ss:$12 sps:$4 sm:$0xff]  }
 0x182   : > { %1809 = vmatprep.subr.bf16.mxu0 %v6552_v58  ;;  %v6603_v58 = vld [vmem:[%s7386_s3 + $0x604] ss:$12 sps:$4 sm:$0xff]   ;;  %3144 = vmatpush1.bf16.msra.mxu1 %v6646_v57 }
 0x185   : > { %1810 = vmatpush1.bf16.msra.mxu0 %v6550_v59  ;;  %v6651_v59 = vld [vmem:[%s7400_s19 + $0xc4] ss:$12 sps:$4 sm:$0xff]  }
 0x186   : > { %2425 = vmatprep.subr.bf16.mxu0 %v6555_v60  ;;  %v6601_v60 = vld [vmem:[%s7386_s3 + $0x600] ss:$12 sps:$4 sm:$0xff]   ;;  %3145 = vmatprep.subr.bf16.mxu1 %v6651_v59 }
 0x188   : > { %1828 = vmatmul.mubr.bf16.vlgmr.msra.gmra.mrb[0].mxu0 %v7559_v14  ;;  %v6565_v14 = vld [vmem:[%s7386_s3 + $0x4e0] ss:$12 sps:$4 sm:$0xff]  }
 0x189   : > { %2426 = vmatpush1.bf16.msra.mxu0 %v6553_v61  ;;  %2457 = vmatprep.mubr.bf16.mxu0 %v7574_v28  ;;  %v6568_v28 = vld [vmem:[%s7386_s3 + $0x4f8] ss:$12 sps:$4 sm:$0xff]   ;;  %v6606_v61 = vld [vmem:[%s7386_s3 + $0x61c] ss:$12 sps:$4 sm:$0xff]  }
 0x18a   : > { %2427 = vmatprep.subr.bf16.mxu0 %v6558_v38  ;;  %v6649_v38 = vld [vmem:[%s7400_s19 + $0xc0] ss:$12 sps:$4 sm:$0xff]  }
 0x18b   : > { %3146 = vmatpush1.bf16.msra.mxu1 %v6649_v38  ;;  %v6666_v38 = vld [vmem:[%s7400_s19 + $0x10c] ss:$12 sps:$4 sm:$0xff]  }
 0x18d   : > { %2428 = vmatpush1.bf16.msra.mxu0 %v6556_v62  ;;  %v6656_v62 = vld [vmem:[%s7400_s19 + $0xdc] ss:$12 sps:$4 sm:$0xff]  }
 0x18e   : > { %2429 = vmatprep.subr.bf16.mxu0 %v6561_v63  ;;  %v6604_v63 = vld [vmem:[%s7386_s3 + $0x618] ss:$12 sps:$4 sm:$0xff]   ;;  %3147 = vmatprep.subr.bf16.mxu1 %v6656_v62 }
 0x18f   : > { %v6667_v62 = vld [vmem:[%s7400_s19 + $0x110] ss:$12 sps:$4 sm:$0xff]  }
 0x191   : > { %2430 = vmatpush1.bf16.msra.mxu0 %v6559_v2  ;;  %v6609_v2 = vld [vmem:[%s7386_s3 + $0x634] ss:$12 sps:$4 sm:$0xff]  }
 0x192   : > { %2431 = vmatprep.subr.bf16.mxu0 %v6564_v3  ;;  %v6654_v3 = vld [vmem:[%s7400_s19 + $0xd8] ss:$12 sps:$4 sm:$0xff]  }
 0x193   : > { %3148 = vmatpush1.bf16.msra.mxu1 %v6654_v3  ;;  %v6671_v3 = vld [vmem:[%s7400_s19 + $0x124] ss:$12 sps:$4 sm:$0xff]  }
 0x195   : > { %2432 = vmatpush1.bf16.msra.mxu0 %v6562_v23  ;;  %v6661_v23 = vld [vmem:[%s7400_s19 + $0xf4] ss:$12 sps:$4 sm:$0xff]  }
 0x196   : > { %2433 = vmatprep.subr.bf16.mxu0 %v6567_v4  ;;  %v6607_v4 = vld [vmem:[%s7386_s3 + $0x630] ss:$12 sps:$4 sm:$0xff]   ;;  %3149 = vmatprep.subr.bf16.mxu1 %v6661_v23 }
 0x197   : > { %v6672_v23 = vld [vmem:[%s7400_s19 + $0x128] ss:$12 sps:$4 sm:$0xff]  }
 0x199   : > { %2434 = vmatpush1.bf16.msra.mxu0 %v6565_v14  ;;  %v6612_v14 = vld [vmem:[%s7386_s3 + $0x64c] ss:$12 sps:$4 sm:$0xff]  }
 0x19a   : > { %2435 = vmatprep.subr.bf16.mxu0 %v6570_v5  ;;  %v6610_v5 = vld [vmem:[%s7386_s3 + $0x648] ss:$12 sps:$4 sm:$0xff]  }
 0x19d   : > { %2436 = vmatpush1.bf16.msra.mxu0 %v6568_v28  ;;  %v6615_v28 = vld [vmem:[%s7386_s3 + $0x664] ss:$12 sps:$4 sm:$0xff]  }
 0x19e   : > { %2437 = vmatprep.subr.bf16.mxu0 %v6573_v6  ;;  %v6613_v6 = vld [vmem:[%s7386_s3 + $0x660] ss:$12 sps:$4 sm:$0xff]  }
 0x1a1   : > { %2438 = vmatpush1.bf16.msra.mxu0 %v6571_v10  ;;  %v6618_v10 = vld [vmem:[%s7386_s3 + $0x67c] ss:$12 sps:$4 sm:$0xff]  }
 0x1a2   : > { %2439 = vmatprep.subr.bf16.mxu0 %v6576_v11  ;;  %v6616_v11 = vld [vmem:[%s7386_s3 + $0x678] ss:$12 sps:$4 sm:$0xff]  }
 0x1a5   : > { %2440 = vmatpush1.bf16.msra.mxu0 %v6574_v13  ;;  %v6621_v13 = vld [vmem:[%s7386_s3 + $0x694] ss:$12 sps:$4 sm:$0xff]  }
 0x1a6   : > { %2441 = vmatprep.subr.bf16.mxu0 %v6579_v15  ;;  %v6619_v15 = vld [vmem:[%s7386_s3 + $0x690] ss:$12 sps:$4 sm:$0xff]  }
 0x1a9   : > { %2442 = vmatpush1.bf16.msra.mxu0 %v6577_v16  ;;  %v6624_v16 = vld [vmem:[%s7386_s3 + $0x6ac] ss:$12 sps:$4 sm:$0xff]  }
 0x1aa   : > { %2443 = vmatprep.subr.bf16.mxu0 %v6582_v17  ;;  %v6622_v17 = vld [vmem:[%s7386_s3 + $0x6a8] ss:$12 sps:$4 sm:$0xff]  }
 0x1ad   : > { %2444 = vmatpush1.bf16.msra.mxu0 %v6580_v21  ;;  %v6658_v21 = vld [vmem:[%s7400_s19 + $0x20] ss:$12 sps:$4 sm:$0xff]  }
 0x1ae   : > { %2445 = vmatprep.subr.bf16.mxu0 %v6585_v24  ;;  %v1227_v24 = vsub.s32 2, %v7410_v1 }
 0x1b1   : > { %2446 = vmatpush1.bf16.msra.mxu0 %v6583_v27 }
 0x1b2   : > { %2447 = vmatprep.subr.bf16.mxu0 %v6588_v29  ;;  %v1228_v29 = vrot.slane %v7758_v26, %v1227_v24 }
 0x1b5   : > { %2448 = vmatpush1.bf16.msra.mxu0 %v6586_v30 }
 0x1b6   : > { %2449 = vmatprep.subr.bf16.mxu0 %v6591_v32 }
 0x1b9   : > { %2450 = vmatpush1.bf16.msra.mxu0 %v6589_v34 }
 0x1ba   : > { %2451 = vmatprep.subr.bf16.mxu0 %v6594_v37 }
 0x1bb   : > { %v5910_v46 = vpop.f32.mrb[4].mxu1 }
 0x1bc   : > { %v5911_v47 = vpop.f32.mrb[5].mxu1 }
 0x1bd   : > { %v7716_v48 = vadd.f32 %v5911_v47, %v5910_v46  ;;  %v5913_v49 = vpop.f32.mrb[6].mxu1  ;;  %2452 = vmatpush1.bf16.msra.mxu0 %v6592_v40 }
 0x1be   : > { %v5914_v51 = vpop.f32.mrb[7].mxu1  ;;  %2453 = vmatprep.subr.bf16.mxu0 %v6597_v42 }
 0x1bf   : > { %v7721_v53 = vadd.f32 %v5914_v51, %v5913_v49 }
 0x1c1   : > { %2454 = vmatpush1.bf16.msra.mxu0 %v6595_v50 }
 0x1c2   : > { %2455 = vmatprep.subr.bf16.mxu0 %v6600_v36 }
 0x1c5   : > { %2456 = vmatpush1.bf16.msra.mxu0 %v6598_v56 }
 0x1c6   : > { %2468 = vmatprep.subr.bf16.mxu0 %v6603_v58 }
 0x1c8   : > { %2458 = vmatmul.mubr.bf16.vlgmr.msra.gmra.mrb[0].mxu0 %v7597_v55  ;;  %v6659_v55 = vld [vmem:[%s7400_s19 + $0xf0] ss:$12 sps:$4 sm:$0xff]  }
 0x1c9   : > { %2469 = vmatpush1.bf16.msra.mxu0 %v6601_v60  ;;  %2500 = vmatprep.mubr.bf16.mxu0 %v7118_v44 }
 0x1ca   : > { %2470 = vmatprep.subr.bf16.mxu0 %v6606_v61  ;;  %3150 = vmatpush1.bf16.msra.mxu1 %v6659_v55  ;;  %v6663_v61 = vld [vmem:[%s7400_s19 + $0x38] ss:$12 sps:$4 sm:$0xff]   ;;  %v6676_v55 = vld [vmem:[%s7400_s19 + $0x13c] ss:$12 sps:$4 sm:$0xff]  }
 0x1cb   : > { %3151 = vmatprep.subr.bf16.mxu1 %v6666_v38 }
 0x1cd   : > { %2471 = vmatpush1.bf16.msra.mxu0 %v6604_v63  ;;  %v6664_v63 = vld [vmem:[%s7400_s19 + $0x108] ss:$12 sps:$4 sm:$0xff]  }
 0x1ce   : > { %2472 = vmatprep.subr.bf16.mxu0 %v6609_v2  ;;  %v6668_v2 = vld [vmem:[%s7400_s19 + $0x50] ss:$12 sps:$4 sm:$0xff]   ;;  %3152 = vmatpush1.bf16.msra.mxu1 %v6664_v63 }
 0x1cf   : > { %3153 = vmatprep.subr.bf16.mxu1 %v6671_v3  ;;  %v6696_v63 = vld [vmem:[%s7400_s19 + $0x19c] ss:$12 sps:$4 sm:$0xff]  }
 0x1d1   : > { %2473 = vmatpush1.bf16.msra.mxu0 %v6607_v4  ;;  %v6669_v4 = vld [vmem:[%s7400_s19 + $0x120] ss:$12 sps:$4 sm:$0xff]  }
 0x1d2   : > { %2474 = vmatprep.subr.bf16.mxu0 %v6612_v14  ;;  %v6673_v14 = vld [vmem:[%s7400_s19 + $0x68] ss:$12 sps:$4 sm:$0xff]   ;;  %3154 = vmatpush1.bf16.msra.mxu1 %v6669_v4  ;;  %v6698_v4 = vld [vmem:[%s7400_s19 + $0x260] ss:$12 sps:$4 sm:$0xff]  }
 0x1d3   : > { %3155 = vmatprep.subr.bf16.mxu1 %v6676_v55 }
 0x1d5   : > { %2475 = vmatpush1.bf16.msra.mxu0 %v6610_v5  ;;  %v6677_v5 = vld [vmem:[%s7400_s19 + $0x140] ss:$12 sps:$4 sm:$0xff]  }
 0x1d6   : > { %2476 = vmatprep.subr.bf16.mxu0 %v6615_v28  ;;  %v6674_v28 = vld [vmem:[%s7400_s19 + $0x138] ss:$12 sps:$4 sm:$0xff]  }
 0x1d7   : > { %3156 = vmatpush1.bf16.msra.mxu1 %v6674_v28 }
 0x1d9   : > { %2477 = vmatpush1.bf16.msra.mxu0 %v6613_v6  ;;  %v6678_v6 = vld [vmem:[%s7400_s19 + $0x80] ss:$12 sps:$4 sm:$0xff]  }
 0x1da   : > { %2478 = vmatprep.subr.bf16.mxu0 %v6618_v10  ;;  %v6679_v10 = vld [vmem:[%s7400_s19 + $0x150] ss:$12 sps:$4 sm:$0xff]  }
 0x1dd   : > { %2479 = vmatpush1.bf16.msra.mxu0 %v6616_v11  ;;  %v6681_v11 = vld [vmem:[%s7400_s19 + $0x154] ss:$12 sps:$4 sm:$0xff]  }
 0x1de   : > { %2480 = vmatprep.subr.bf16.mxu0 %v6621_v13  ;;  %v6682_v13 = vld [vmem:[%s7400_s19 + $0x158] ss:$12 sps:$4 sm:$0xff]   ;;  %3157 = vmatprep.subr.bf16.mxu1 %v6681_v11 }
 0x1df   : > { %3158 = vmatpush1.bf16.msra.mxu1 %v6679_v10  ;;  %v6699_v10 = vld [vmem:[%s7400_s19 + $0x1b0] ss:$12 sps:$4 sm:$0xff]   ;;  %v6703_v11 = vld [vmem:[%s7400_s19 + $0x278] ss:$12 sps:$4 sm:$0xff]  }
 0x1e1   : > { %2481 = vmatpush1.bf16.msra.mxu0 %v6619_v15  ;;  %v6683_v15 = vld [vmem:[%s7400_s19 + $0x98] ss:$12 sps:$4 sm:$0xff]  }
 0x1e2   : > { %2482 = vmatprep.subr.bf16.mxu0 %v6624_v16  ;;  %v6686_v16 = vld [vmem:[%s7400_s19 + $0x16c] ss:$12 sps:$4 sm:$0xff]  }
 0x1e3   : > { %3159 = vmatprep.subr.bf16.mxu1 %v6686_v16  ;;  %v6704_v16 = vld [vmem:[%s7400_s19 + $0x1c8] ss:$12 sps:$4 sm:$0xff]  }
 0x1e5   : > { %2483 = vmatpush1.bf16.msra.mxu0 %v6622_v17  ;;  %v6687_v17 = vld [vmem:[%s7400_s19 + $0x170] ss:$12 sps:$4 sm:$0xff]  }
 0x1e6   : > { %5956 = vmatprep.subr.bf16.mxu0 %v6652_v18  ;;  %v6684_v18 = vld [vmem:[%s7400_s19 + $0x168] ss:$12 sps:$4 sm:$0xff]  }
 0x1e7   : > { %3160 = vmatpush1.bf16.msra.mxu1 %v6684_v18  ;;  %v6711_v18 = vld [vmem:[%s7400_s19 + $0x1e4] ss:$12 sps:$4 sm:$0xff]  }
 0x1e8   : > { %2501 = vmatmul.mubr.bf16.vlgmr.msra.gmra.mrb[0].mxu0 %v7636_v25 }
 0x1e9   : > { %5957 = vmatpush3.bf16.msra.mxu0 %v6653_v19  ;;  %v6688_v19 = vld [vmem:[%s7400_s19 + $0xb0] ss:$12 sps:$4 sm:$0xff]  }
 0x1ea   : > { %5958 = vmatprep.subr.bf16.mxu0 %v6657_v20  ;;  %v6691_v20 = vld [vmem:[%s7400_s19 + $0x184] ss:$12 sps:$4 sm:$0xff]  }
 0x1eb   : > { %3172 = vmatprep.subr.bf16.mxu1 %v6691_v20  ;;  %v6709_v20 = vld [vmem:[%s7400_s19 + $0x1e0] ss:$12 sps:$4 sm:$0xff]  }
 0x1ed   : > { %5959 = vmatpush3.bf16.msra.mxu0 %v6658_v21  ;;  %v6692_v21 = vld [vmem:[%s7400_s19 + $0x308] ss:$12 sps:$4 sm:$0xff]  }
 0x1ee   : > { %5960 = vmatprep.subr.bf16.mxu0 %v6662_v22  ;;  %v1219_v22 = vsub.s32 0, %v7410_v1 }
 0x1f1   : > { %5961 = vmatpush3.bf16.msra.mxu0 %v6663_v61  ;;  %v6693_v61 = vld [vmem:[%s7400_s19 + $0x248] ss:$12 sps:$4 sm:$0xff]  }
 0x1f2   : > { %5962 = vmatprep.subr.bf16.mxu0 %v6667_v62 }
 0x1f5   : > { %5963 = vmatpush3.bf16.msra.mxu0 %v6668_v2  ;;  %v6697_v2 = vld [vmem:[%s7400_s19 + $0x320] ss:$12 sps:$4 sm:$0xff]  }
 0x1f6   : > { %5964 = vmatprep.subr.bf16.mxu0 %v6672_v23  ;;  %v6694_v23 = vld [vmem:[%s7400_s19 + $0x198] ss:$12 sps:$4 sm:$0xff]  }
 0x1f9   : > { %5965 = vmatpush3.bf16.msra.mxu0 %v6673_v14 }
 0x1fa   : > { %5966 = vmatprep.subr.bf16.mxu0 %v6677_v5  ;;  %v6701_v5 = vld [vmem:[%s7400_s19 + $0x1b4] ss:$12 sps:$4 sm:$0xff]  }
 0x1fb   : > { %v5941_v27 = vpop.f32.mrb[8].mxu1  ;;  %v5879_v45 = vpop.f32.mrb[4].mxu0 }
 0x1fc   : > { %v5942_v12 = vpop.f32.mrb[9].mxu1  ;;  %v5880_v30 = vpop.f32.mrb[5].mxu0 }
 0x1fd   : > { %v5943_v31 = vadd.f32 %v5942_v12, %v5941_v27  ;;  %v5944_v25 = vpop.f32.mrb[10].mxu1  ;;  %v5881_v32 = vadd.f32 %v5880_v30, %v5879_v45  ;;  %v5882_v33 = vpop.f32.mrb[6].mxu0  ;;  %5967 = vmatpush3.bf16.msra.mxu0 %v6678_v6  ;;  %v1223_v27 = vsub.s32 1, %v7410_v1  ;;  %v1220_v45 = vrot.slane %v7758_v26, %v1219_v22  ;;  %v6702_v6 = vld [vmem:[%s7400_s19 + $0x338] ss:$12 sps:$4 sm:$0xff]  }
 0x1fe   : > { %v5945_v34 = vpop.f32.mrb[11].mxu1  ;;  %v5883_v35 = vpop.f32.mrb[7].mxu0  ;;  %5968 = vmatprep.subr.bf16.mxu0 %v6682_v13  ;;  %v6706_v13 = vld [vmem:[%s7400_s19 + $0x1cc] ss:$12 sps:$4 sm:$0xff]  }
 0x1ff   : > { %v5946_v37 = vadd.f32 %v5945_v34, %v5944_v25  ;;  %v6173_v39 = vadd.f32 %v5881_v32, %v1228_v29  ;;  %v5884_v40 = vadd.f32 %v5883_v35, %v5882_v33 }
 0x201   : > { %v6174_v41 = vadd.f32 %v6173_v39, %v7716_v48  ;;  %v6177_v42 = vadd.f32 %v5884_v40, %v1228_v29  ;;  %5969 = vmatpush3.bf16.msra.mxu0 %v6683_v15  ;;  %v1224_v29 = vrot.slane %v7758_v26, %v1223_v27  ;;  %v6707_v15 = vld [vmem:[%s7400_s19 + $0x350] ss:$12 sps:$4 sm:$0xff]  }
 0x202   : > { %5970 = vmatprep.subr.bf16.mxu0 %v6687_v17  ;;  %v6708_v17 = vld [vmem:[%s7400_s19 + $0x290] ss:$12 sps:$4 sm:$0xff]  }
 0x203   : > { %v6178_v43 = vadd.f32 %v6177_v42, %v7721_v53  ;;  %v6175_v46 = vadd.f32 %v6174_v41, %v5943_v31 }
 0x205   : > { %v6179_v47 = vadd.f32 %v6178_v43, %v5946_v37  ;;  %5971 = vmatpush3.bf16.msra.mxu0 %v6688_v19  ;;  %v6712_v19 = vld [vmem:[%s7400_s19 + $0x368] ss:$12 sps:$4 sm:$0xff]  }
 0x206   : > { %5987 = vmatprep.subr.bf16.mxu0 %v6692_v21  ;;  %v6713_v21 = vld [vmem:[%s7400_s19 + $0x2a8] ss:$12 sps:$4 sm:$0xff]  }
 0x21b   : > { %v2586_v49 = vpop.f32.mrb[0].mxu1 }
 0x21c   : > { %v6176_v50 = vadd.f32 %v6175_v46, %v2586_v49  ;;  %v6107_v51 = vpop.f32.mrb[1].mxu1 }
 0x21d   : > { %v2589_v52 = vpop.f32.mrb[2].mxu1 }
 0x21e   : > { %v2601_v36 = vmax.f32 %v6176_v50, 0.0  ;;  %v6180_v54 = vadd.f32 %v6179_v47, %v2589_v52  ;;  %v6108_v56 = vpop.f32.mrb[3].mxu1 }
 0x220   : > { %v2607_v57 = vmul.f32 %v7433_v8, %v2601_v36  ;;  %v2604_v48 = vmax.f32 %v6180_v54, 0.0 }
 0x222   : > { %v2620_v58 = vrot.slane %v2607_v57, 7  ;;  %v2610_v53 = vmul.f32 %v7436_v9, %v2604_v48 }
 0x224   : > { %2635 = vst [vmem:[#allocation3 + $0x10] sm:$0xfe] %v2620_v58  ;;  %v2625_v59 = vrot.slane %v2610_v53, 7 }
 0x226   : > { %v2626_v60 = vsel %vm2617_vm8, %v2620_v58, %v2625_v59  ;;  %v6689_v59 = vld [vmem:[%s7400_s19 + $0x180] ss:$12 sps:$4 sm:$0xff]  }
 0x227   : > { %2638 = vst [vmem:[#allocation3 + $0x28] sm:$0x7f] %v2626_v60 }
 0x2bb   : > { %v2502_v12 = vpop.f32.mrb[0].mxu0 }
 0x2bc   : > { %v6169_v30 = vadd.f32 %v2502_v12, %v1220_v45  ;;  %v2504_v31 = vpop.f32.mrb[1].mxu0 }
 0x2bd   : > { %v6170_v25 = vadd.f32 %v2504_v31, %v1224_v29  ;;  %v2506_v32 = vpop.f32.mrb[2].mxu0  ;;  %v6718_v31 = vld [vmem:[%s7400_s19 + $0x2c0] ss:$12 sps:$4 sm:$0xff]  }
 0x2be   : > { %v2599_v33 = vmax.f32 %v6169_v30, 0.0  ;;  %v6171_v34 = vadd.f32 %v2506_v32, %v1220_v45  ;;  %v2508_v35 = vpop.f32.mrb[3].mxu0  ;;  %v6716_v45 = vld [vmem:[%s7400_s19 + $0x1fc] ss:$12 sps:$4 sm:$0xff]   ;;  %v6714_v30 = vld [vmem:[%s7400_s19 + $0x1f8] ss:$12 sps:$4 sm:$0xff]  }
 0x2bf   : > { %v2600_v37 = vmax.f32 %v6170_v25, 0.0  ;;  %v6172_v39 = vadd.f32 %v2508_v35, %v1224_v29  ;;  %v6717_v29 = vld [vmem:[%s7400_s19 + $0x380] ss:$12 sps:$4 sm:$0xff]   ;;  %v6719_v35 = vld [vmem:[%s7400_s19 + $0x210] ss:$12 sps:$4 sm:$0xff]  }
 0x2c0   : > { %v2605_v40 = vmul.f32 %v7433_v8, %v2599_v33  ;;  %v2602_v41 = vmax.f32 %v6171_v34, 0.0  ;;  %v6721_v32 = vld [vmem:[%s7400_s19 + $0x214] ss:$12 sps:$4 sm:$0xff]   ;;  %v6722_v33 = vld [vmem:[%s7400_s19 + $0x398] ss:$12 sps:$4 sm:$0xff]  }
 0x2c1   : > { %v2606_v42 = vmul.f32 %v7433_v8, %v2600_v37  ;;  %v2603_v43 = vmax.f32 %v6172_v39, 0.0  ;;  %v6723_v37 = vld [vmem:[%s7400_s19 + $0x2d8] ss:$12 sps:$4 sm:$0xff]  }
 0x2c2   : > { %v2618_v46 = vrot.slane %v2605_v40, 7  ;;  %v2608_v47 = vmul.f32 %v7436_v9, %v2602_v41  ;;  %v6726_v39 = vld [vmem:[%s7400_s19 + $0x22c] ss:$12 sps:$4 sm:$0xff]   ;;  %v6727_v40 = vld [vmem:[%s7400_s19 + $0x3b0] ss:$12 sps:$4 sm:$0xff]  }
 0x2c3   : > { %v2619_v26 = vrot.slane %v2606_v42, 7  ;;  %v2609_v49 = vmul.f32 %v7436_v9, %v2603_v43  ;;  %v6724_v42 = vld [vmem:[%s7400_s19 + $0x228] ss:$12 sps:$4 sm:$0xff]   ;;  %v6728_v43 = vld [vmem:[%s7400_s19 + $0x2f0] ss:$12 sps:$4 sm:$0xff]  }
 0x2c4   : > { %2633 = vst [vmem:[#allocation3] sm:$0xfe] %v2618_v46  ;;  %v2621_v50 = vrot.slane %v2608_v47, 7  ;;  %v2645_v47 = vld [vmem:[#allocation3 + $0x28] sm:$0x3f] }
 0x2c5   : > { %2634 = vst [vmem:[#allocation3 + $0x8] sm:$0xfe] %v2619_v26  ;;  %v2623_v51 = vrot.slane %v2609_v49, 7  ;;  %v2642_v49 = vld [vmem:[#allocation3 + $0x10] sm:$0xff] }
 0x2c6   : > { %v2622_v52 = vsel %vm2617_vm8, %v2618_v46, %v2621_v50  ;;  %v6729_v50 = vld [vmem:[%s7400_s19 + $0x188] ss:$12 sps:$4 sm:$0xff]  }
 0x2c7   : > { %2636 = vst [vmem:[#allocation3 + $0x18] sm:$0x7f] %v2622_v52  ;;  %v2624_v36 = vsel %vm2617_vm8, %v2619_v26, %v2623_v51  ;;  %v6730_v51 = vld [vmem:[%s7400_s19 + $0x3c8] ss:$12 sps:$4 sm:$0xff]   ;;  %v7841_v52 = vpack.c.bf16 %v2645_v47, %v2642_v49  ;;  %v6774_v47 = vld [vmem:[%s7400_s19 + $0x500] ss:$12 sps:$4 sm:$0xff]  }
 0x2c8   : > { %2637 = vst [vmem:[#allocation3 + $0x20] sm:$0x7f] %v2624_v36  ;;  %v6778_v49 = vld [vmem:[%s7400_s19 + $0x5d8] ss:$12 sps:$4 sm:$0xff]  }
 0x2cb   : > { %v2640_v60 = vld [vmem:[#allocation3] sm:$0xff] }
 0x2cc   : > { %v2641_v54 = vld [vmem:[#allocation3 + $0x8] sm:$0xff]  ;;  %v3319_v25 = vld [vmem:[#allocation3] sm:$0xfe] }
 0x2cd   : > { %v3320_v48 = vld [vmem:[#allocation3 + $0x8] sm:$0xfe] }
 0x2ce   : > { %v2643_v56 = vld [vmem:[#allocation3 + $0x18] sm:$0x3f] }
 0x2cf   : > { %v2644_v57 = vld [vmem:[#allocation3 + $0x20] sm:$0x3f]  ;;  %v2646_v62 = vpack.c.bf16 %v2643_v56, %v2640_v60  ;;  %v3322_v12 = vld [vmem:[#allocation3 + $0x18] sm:$0x7f] }
 0x2d0   : > { %v3323_v58 = vld [vmem:[#allocation3 + $0x20] sm:$0x7f]  ;;  %v2647_v53 = vpack.c.bf16 %v2644_v57, %v2641_v54  ;;  %v3325_v34 = vpack.c.bf16 %v3322_v12, %v3319_v25  ;;  %v6733_v57 = vld [vmem:[%s7400_s19 + $0x1b8] ss:$12 sps:$4 sm:$0xff]  }
 0x2d1   : > { %v3326_v38 = vpack.c.bf16 %v3323_v58, %v3320_v48  ;;  %v6731_v54 = vld [vmem:[%s7400_s19 + $0x1a0] ss:$12 sps:$4 sm:$0xff]   ;;  %v6734_v48 = vld [vmem:[%s7400_s19 + $0x3f8] ss:$12 sps:$4 sm:$0xff]   ;;  %v6735_v58 = vld [vmem:[%s7400_s19 + $0x1d0] ss:$12 sps:$4 sm:$0xff]  }
 0x2d2   : > { %3161 = vmatprep.mubr.bf16.mxu1 %v2647_v53  ;;  %3247 = vmatprep.mubr.bf16.mxu0 %v2647_v53  ;;  %v3428_v41 = vshll.u32 %v3325_v34, 16  ;;  %v3426_v26 = vshrl.u32 %v3325_v34, 16  ;;  %v6732_v56 = vld [vmem:[%s7400_s19 + $0x3e0] ss:$12 sps:$4 sm:$0xff]   ;;  %v6736_v53 = vld [vmem:[%s7400_s19 + $0x410] ss:$12 sps:$4 sm:$0xff]  }
 0x2d3   : > { %v3435_v3 = vshll.u32 %v3326_v38, 16  ;;  %3162 = vmatmul.mubr.bf16.vlgmr.msra.gmra.mrb[12].mxu1 %v2646_v62  ;;  %3248 = vmatmul.mubr.bf16.vlgmr.msra.gmra.mrb[8].mxu0 %v2646_v62  ;;  %v3433_v14 = vshrl.u32 %v3326_v38, 16  ;;  %v6738_v60 = vld [vmem:[%s7400_s19 + $0x428] ss:$12 sps:$4 sm:$0xff]   ;;  %v6739_v38 = vld [vmem:[%s7400_s19 + $0x200] ss:$12 sps:$4 sm:$0xff]  }
 0x2d4   : > { %3173 = vmatpush1.bf16.msra.mxu1 %v6689_v59  ;;  %5988 = vmatpush3.bf16.msra.mxu0 %v6693_v61  ;;  %v3430_v46 = vrot.slane %v3428_v41, 1  ;;  %v6737_v59 = vld [vmem:[%s7400_s19 + $0x1e8] ss:$12 sps:$4 sm:$0xff]   ;;  %v6740_v62 = vld [vmem:[%s7400_s19 + $0x440] ss:$12 sps:$4 sm:$0xff]  }
 0x2d5   : > { %v3437_v55 = vrot.slane %v3435_v3, 1  ;;  %3174 = vmatprep.subr.bf16.mxu1 %v6696_v63  ;;  %5989 = vmatprep.subr.bf16.mxu0 %v6697_v2  ;;  %v3324_v61 = vld [vmem:[#allocation3 + $0x28] sm:$0x7f]  ;;  %v3321_v63 = vld [vmem:[#allocation3 + $0x10] sm:$0xfe] }
 0x2d6   : > { %3204 = vmatprep.mubr.bf16.mxu1 %v7118_v44  ;;  %v7844_v36 = vor.u32 %v3430_v46, %v3426_v26  ;;  %v3327_v2 = vpack.c.bf16 %v3324_v61, %v3321_v63  ;;  %v6741_v3 = vld [vmem:[%s7400_s19 + $0x218] ss:$12 sps:$4 sm:$0xff]   ;;  %v6754_v12 = vld [vmem:[%s7400_s19 + $0x4a0] ss:$12 sps:$4 sm:$0xff]   ;;  %v6755_v25 = vld [vmem:[%s7400_s19 + $0x270] ss:$12 sps:$4 sm:$0xff]  }
 0x2d7   : > { %v7812_v28 = vor.u32 %v3437_v55, %v3433_v14  ;;  %v6743_v14 = vld [vmem:[%s7400_s19 + $0x230] ss:$12 sps:$4 sm:$0xff]   ;;  %v6760_v34 = vld [vmem:[%s7400_s19 + $0x288] ss:$12 sps:$4 sm:$0xff]   ;;  %v6770_v46 = vld [vmem:[%s7400_s19 + $0x2b8] ss:$12 sps:$4 sm:$0xff]  }
 0x2d8   : > { %3175 = vmatpush1.bf16.msra.mxu1 %v6694_v23  ;;  %5990 = vmatpush3.bf16.msra.mxu0 %v6698_v4  ;;  %v6742_v23 = vld [vmem:[%s7400_s19 + $0x458] ss:$12 sps:$4 sm:$0xff]   ;;  %v3442_v4 = vshll.u32 %v3327_v2, 16  ;;  %v6744_v55 = vld [vmem:[%s7400_s19 + $0x470] ss:$12 sps:$4 sm:$0xff]  }
 0x2d9   : > { %3951 = vmatprep.mubr.bf16.mxu0 %v7812_v28  ;;  %3176 = vmatprep.subr.bf16.mxu1 %v6701_v5  ;;  %v4011_v5 = vld [vmem:[#allocation3 + $0x20] sm:$0xff]  ;;  %v6777_v26 = vld [vmem:[%s7400_s19 + $0x2d4] ss:$12 sps:$4 sm:$0xff]   ;;  %v6789_v63 = vld [vmem:[%s7400_s19 + $0x318] ss:$12 sps:$4 sm:$0xff]  }
 0x2da   : > { %5991 = vmatprep.subr.bf16.mxu0 %v6702_v6  ;;  %v6747_v6 = vld [vmem:[%s7400_s19 + $0x244] ss:$12 sps:$4 sm:$0xff]   ;;  %v6769_v41 = vld [vmem:[%s7400_s19 + $0x4e8] ss:$12 sps:$4 sm:$0xff]  }
 0x2db   : > { %v6788_v61 = vld [vmem:[%s7400_s19 + $0x608] ss:$12 sps:$4 sm:$0xff]  }
 0x2dc   : > { %3177 = vmatpush1.bf16.msra.mxu1 %v6699_v10  ;;  %5992 = vmatpush3.bf16.msra.mxu0 %v6703_v11  ;;  %v3444_v10 = vrot.slane %v3442_v4, 1  ;;  %v6748_v11 = vld [vmem:[%s7400_s19 + $0x548] ss:$12 sps:$4 sm:$0xff]   ;;  %v6796_v4 = vld [vmem:[%s7400_s19 + $0x638] ss:$12 sps:$4 sm:$0xff]  }
 0x2dd   : > { %3178 = vmatprep.subr.bf16.mxu1 %v6706_v13  ;;  %5993 = vmatprep.subr.bf16.mxu0 %v6707_v15  ;;  %v4008_v13 = vld [vmem:[#allocation3 + $0x8] sm:$0xfc]  ;;  %v3440_v15 = vshrl.u32 %v3327_v2, 16  ;;  %v6792_v2 = vld [vmem:[%s7400_s19 + $0x620] ss:$12 sps:$4 sm:$0xff]  }
 0x2e0   : > { %3179 = vmatpush1.bf16.msra.mxu1 %v6704_v16  ;;  %5994 = vmatpush3.bf16.msra.mxu0 %v6708_v17  ;;  %v4014_v16 = vpack.c.bf16 %v4011_v5, %v4008_v13  ;;  %v6745_v17 = vld [vmem:[%s7400_s19 + $0x240] ss:$12 sps:$4 sm:$0xff]   ;;  %v6800_v5 = vld [vmem:[%s7400_s19 + $0x650] ss:$12 sps:$4 sm:$0xff]  }
 0x2e1   : > { %3180 = vmatprep.subr.bf16.mxu1 %v6711_v18  ;;  %5995 = vmatprep.subr.bf16.mxu0 %v6712_v19  ;;  %v7884_v18 = vor.u32 %v3444_v10, %v3440_v15  ;;  %v6749_v19 = vld [vmem:[%s7400_s19 + $0x488] ss:$12 sps:$4 sm:$0xff]   ;;  %v6801_v10 = vld [vmem:[%s7400_s19 + $0x360] ss:$12 sps:$4 sm:$0xff]   ;;  %v6805_v15 = vld [vmem:[%s7400_s19 + $0x378] ss:$12 sps:$4 sm:$0xff]  }
 0x2e2   : > { %v6807_v13 = vld [vmem:[%s7400_s19 + $0x37c] ss:$12 sps:$4 sm:$0xff]  }
 0x2e4   : > { %3181 = vmatpush1.bf16.msra.mxu1 %v6709_v20  ;;  %5996 = vmatpush3.bf16.msra.mxu0 %v6713_v21  ;;  %v6752_v20 = vld [vmem:[%s7400_s19 + $0x25c] ss:$12 sps:$4 sm:$0xff]   ;;  %v6753_v21 = vld [vmem:[%s7400_s19 + $0x560] ss:$12 sps:$4 sm:$0xff]  }
 0x2e5   : > { %3182 = vmatprep.subr.bf16.mxu1 %v6716_v45  ;;  %5997 = vmatprep.subr.bf16.mxu0 %v6717_v29  ;;  %v7891_v45 = vrot.slane %v4014_v16, 1  ;;  %v6750_v29 = vld [vmem:[%s7400_s19 + $0x258] ss:$12 sps:$4 sm:$0xff]   ;;  %v6808_v16 = vld [vmem:[%s7400_s19 + $0x680] ss:$12 sps:$4 sm:$0xff]  }
 0x2e8   : > { %3183 = vmatpush1.bf16.msra.mxu1 %v6714_v30  ;;  %5998 = vmatpush3.bf16.msra.mxu0 %v6718_v31  ;;  %v6757_v30 = vld [vmem:[%s7400_s19 + $0x274] ss:$12 sps:$4 sm:$0xff]   ;;  %v6758_v31 = vld [vmem:[%s7400_s19 + $0x578] ss:$12 sps:$4 sm:$0xff]  }
 0x2e9   : > { %3184 = vmatprep.subr.bf16.mxu1 %v6721_v32  ;;  %5999 = vmatprep.subr.bf16.mxu0 %v6722_v33  ;;  %v6762_v32 = vld [vmem:[%s7400_s19 + $0x28c] ss:$12 sps:$4 sm:$0xff]   ;;  %v6763_v33 = vld [vmem:[%s7400_s19 + $0x590] ss:$12 sps:$4 sm:$0xff]  }
 0x2ec   : > { %3185 = vmatpush1.bf16.msra.mxu1 %v6719_v35  ;;  %6000 = vmatpush3.bf16.msra.mxu0 %v6723_v37  ;;  %v6764_v35 = vld [vmem:[%s7400_s19 + $0x4d0] ss:$12 sps:$4 sm:$0xff]  }
 0x2ed   : > { %3186 = vmatprep.subr.bf16.mxu1 %v6726_v39  ;;  %6001 = vmatprep.subr.bf16.mxu0 %v6727_v40  ;;  %v6767_v37 = vld [vmem:[%s7400_s19 + $0x2a4] ss:$12 sps:$4 sm:$0xff]   ;;  %v6768_v39 = vld [vmem:[%s7400_s19 + $0x5a8] ss:$12 sps:$4 sm:$0xff]   ;;  %v6765_v40 = vld [vmem:[%s7400_s19 + $0x2a0] ss:$12 sps:$4 sm:$0xff]  }
 0x2f0   : > { %3187 = vmatpush1.bf16.msra.mxu1 %v6724_v42  ;;  %6002 = vmatpush3.bf16.msra.mxu0 %v6728_v43  ;;  %v6772_v42 = vld [vmem:[%s7400_s19 + $0x2bc] ss:$12 sps:$4 sm:$0xff]   ;;  %v6773_v43 = vld [vmem:[%s7400_s19 + $0x5c0] ss:$12 sps:$4 sm:$0xff]  }
 0x2f1   : > { %6109 = vmatprep.subr.bf16.mxu1 %v7115_v7  ;;  %6129 = vmatprep.subr.bf16.mxu0 %v7115_v7 }
 0x2f3   : > { %3205 = vmatmul.mubr.bf16.vlgmr.msra.gmra.mrb[12].mxu1 %v7841_v52  ;;  %3952 = vmatmul.mubr.bf16.vlgmr.msra.gmra.mrb[12].mxu0 %v7844_v36 }
 0x2f4   : > { %6110 = vmatpush3.bf16.msra.mxu1 %v6729_v50  ;;  %6130 = vmatpush3.bf16.msra.mxu0 %v6730_v51  ;;  %v6775_v50 = vld [vmem:[%s7400_s19 + $0x2d0] ss:$12 sps:$4 sm:$0xff]   ;;  %v6779_v51 = vld [vmem:[%s7400_s19 + $0x518] ss:$12 sps:$4 sm:$0xff]  }
 0x2f5   : > { %6111 = vmatprep.subr.bf16.mxu1 %v7115_v7  ;;  %6131 = vmatprep.subr.bf16.mxu0 %v7115_v7 }
 0x2f6   : > { %6125 = vmatprep.mubr.msk.bf16.mxu1 %vm7117_vm7, %v7115_v7  ;;  %6145 = vmatprep.mubr.msk.bf16.mxu0 %vm7117_vm7, %v7115_v7 }
 0x2f8   : > { %6112 = vmatpush3.bf16.msra.mxu1 %v6731_v54  ;;  %6132 = vmatpush3.bf16.msra.mxu0 %v6732_v56  ;;  %v6783_v54 = vld [vmem:[%s7400_s19 + $0x5f0] ss:$12 sps:$4 sm:$0xff]   ;;  %v4010_v56 = vld [vmem:[#allocation3 + $0x18] sm:$0xff] }
 0x2f9   : > { %6113 = vmatprep.subr.bf16.mxu1 %v7115_v7  ;;  %6133 = vmatprep.subr.bf16.mxu0 %v7115_v7 }
 0x2fc   : > { %6114 = vmatpush3.bf16.msra.mxu1 %v6733_v57  ;;  %6134 = vmatpush3.bf16.msra.mxu0 %v6734_v48  ;;  %v6780_v57 = vld [vmem:[%s7400_s19 + $0x2e8] ss:$12 sps:$4 sm:$0xff]   ;;  %v6784_v48 = vld [vmem:[%s7400_s19 + $0x530] ss:$12 sps:$4 sm:$0xff]  }
 0x2fd   : > { %6115 = vmatprep.subr.bf16.mxu1 %v7115_v7  ;;  %6135 = vmatprep.subr.bf16.mxu0 %v7115_v7 }
 0x300   : > { %6116 = vmatpush3.bf16.msra.mxu1 %v6735_v58  ;;  %6136 = vmatpush3.bf16.msra.mxu0 %v6736_v53  ;;  %v6787_v58 = vld [vmem:[%s7400_s19 + $0x304] ss:$12 sps:$4 sm:$0xff]  }
 0x301   : > { %6117 = vmatprep.subr.bf16.mxu1 %v7115_v7  ;;  %6137 = vmatprep.subr.bf16.mxu0 %v7115_v7  ;;  %v4007_v53 = vld [vmem:[#allocation3] sm:$0xfc] }
 0x304   : > { %6118 = vmatpush3.bf16.msra.mxu1 %v6737_v59  ;;  %6138 = vmatpush3.bf16.msra.mxu0 %v6738_v60  ;;  %v4013_v59 = vpack.c.bf16 %v4010_v56, %v4007_v53  ;;  %v6785_v60 = vld [vmem:[%s7400_s19 + $0x300] ss:$12 sps:$4 sm:$0xff]  }
 0x305   : > { %6119 = vmatprep.subr.bf16.mxu1 %v7115_v7  ;;  %6139 = vmatprep.subr.bf16.mxu0 %v7115_v7  ;;  %v6849_v56 = vld [vmem:[%s7400_s19 + $0x4b4] ss:$12 sps:$4 sm:$0xff]  }
 0x306   : > { %v6853_v53 = vld [vmem:[%s7400_s19 + $0x4e0] ss:$12 sps:$4 sm:$0xff]  }
 0x308   : > { %6120 = vmatpush3.bf16.msra.mxu1 %v6739_v38  ;;  %6140 = vmatpush3.bf16.msra.mxu0 %v6740_v62  ;;  %v6791_v38 = vld [vmem:[%s7400_s19 + $0x31c] ss:$12 sps:$4 sm:$0xff]   ;;  %v7925_v62 = vrot.slane %v4013_v59, 1  ;;  %v6856_v59 = vld [vmem:[%s7400_s19 + $0x4f8] ss:$12 sps:$4 sm:$0xff]  }
 0x309   : > { %6121 = vmatprep.subr.bf16.mxu1 %v7115_v7  ;;  %6141 = vmatprep.subr.bf16.mxu0 %v7115_v7 }
 0x30c   : > { %6122 = vmatpush3.bf16.msra.mxu1 %v6741_v3  ;;  %6142 = vmatpush3.bf16.msra.mxu0 %v6742_v23  ;;  %v6795_v3 = vld [vmem:[%s7400_s19 + $0x334] ss:$12 sps:$4 sm:$0xff]   ;;  %v6793_v23 = vld [vmem:[%s7400_s19 + $0x330] ss:$12 sps:$4 sm:$0xff]  }
 0x30d   : > { %6123 = vmatprep.subr.bf16.mxu1 %v7115_v7  ;;  %6143 = vmatprep.subr.bf16.mxu0 %v7115_v7 }
 0x310   : > { %6124 = vmatpush3.bf16.msra.mxu1 %v6743_v14  ;;  %6144 = vmatpush3.bf16.msra.mxu0 %v6744_v55  ;;  %v6799_v14 = vld [vmem:[%s7400_s19 + $0x34c] ss:$12 sps:$4 sm:$0xff]   ;;  %v6797_v55 = vld [vmem:[%s7400_s19 + $0x348] ss:$12 sps:$4 sm:$0xff]  }
 0x311   : > { %3833 = vmatprep.subr.bf16.mxu1 %v6747_v6  ;;  %6018 = vmatprep.subr.bf16.mxu0 %v6748_v11  ;;  %v6803_v6 = vld [vmem:[%s7400_s19 + $0x364] ss:$12 sps:$4 sm:$0xff]   ;;  %v6804_v11 = vld [vmem:[%s7400_s19 + $0x668] ss:$12 sps:$4 sm:$0xff]  }
 0x313   : > { %6126 = vmatmul.mubr.bf16.vlgmr.msra.gmra.mrb[16].mxu1 %v7841_v52  ;;  %6146 = vmatmul.mubr.bf16.vlgmr.msra.gmra.mrb[16].mxu0 %v7884_v18  ;;  %v6782_v52 = vld [vmem:[%s7400_s19 + $0x2ec] ss:$12 sps:$4 sm:$0xff]  }
 0x314   : > { %3834 = vmatpush1.bf16.msra.mxu1 %v6745_v17  ;;  %3865 = vmatprep.mubr.bf16.mxu1 %v7812_v28  ;;  %v6759_v28 = vld [vmem:[%s7400_s19 + $0x4b8] ss:$12 sps:$4 sm:$0xff]   ;;  %v6811_v17 = vld [vmem:[%s7400_s19 + $0x394] ss:$12 sps:$4 sm:$0xff]  }
 0x315   : > { %6019 = vmatpush3.bf16.msra.mxu0 %v6749_v19  ;;  %4624 = vmatprep.mubr.bf16.mxu0 %v7891_v45  ;;  %v6809_v19 = vld [vmem:[%s7400_s19 + $0x390] ss:$12 sps:$4 sm:$0xff]  }
 0x316   : > { %3835 = vmatprep.subr.bf16.mxu1 %v6752_v20  ;;  %6020 = vmatprep.subr.bf16.mxu0 %v6753_v21  ;;  %v6812_v20 = vld [vmem:[%s7400_s19 + $0x698] ss:$12 sps:$4 sm:$0xff]  }
 0x317   : > { %v6815_v21 = vld [vmem:[%s7400_s19 + $0x3ac] ss:$12 sps:$4 sm:$0xff]  }
 0x318   : > { %3836 = vmatpush1.bf16.msra.mxu1 %v6750_v29  ;;  %v4012_v29 = vld [vmem:[#allocation3 + $0x28] sm:$0xff] }
 0x319   : > { %6021 = vmatpush3.bf16.msra.mxu0 %v6754_v12  ;;  %3837 = vmatprep.subr.bf16.mxu1 %v6757_v30  ;;  %v6813_v12 = vld [vmem:[%s7400_s19 + $0x3a8] ss:$12 sps:$4 sm:$0xff]   ;;  %v6816_v30 = vld [vmem:[%s7400_s19 + $0x6b0] ss:$12 sps:$4 sm:$0xff]  }
 0x31a   : > { %6022 = vmatprep.subr.bf16.mxu0 %v6758_v31  ;;  %v6819_v31 = vld [vmem:[%s7400_s19 + $0x3c4] ss:$12 sps:$4 sm:$0xff]  }
 0x31c   : > { %3838 = vmatpush1.bf16.msra.mxu1 %v6755_v25  ;;  %v4009_v25 = vld [vmem:[#allocation3 + $0x10] sm:$0xfc] }
 0x31d   : > { %6023 = vmatpush3.bf16.msra.mxu0 %v6759_v28  ;;  %3839 = vmatprep.subr.bf16.mxu1 %v6762_v32  ;;  %v4015_v28 = vpack.c.bf16 %v4012_v29, %v4009_v25  ;;  %v6817_v32 = vld [vmem:[%s7400_s19 + $0x3c0] ss:$12 sps:$4 sm:$0xff]   ;;  %v6883_v29 = vld [vmem:[%s7400_s19 + $0x5d0] ss:$12 sps:$4 sm:$0xff]   ;;  %v6886_v25 = vld [vmem:[%s7400_s19 + $0x5e8] ss:$12 sps:$4 sm:$0xff]  }
 0x31e   : > { %6024 = vmatprep.subr.bf16.mxu0 %v6763_v33  ;;  %v6822_v33 = vld [vmem:[%s7400_s19 + $0x3dc] ss:$12 sps:$4 sm:$0xff]  }
 0x320   : > { %3840 = vmatpush1.bf16.msra.mxu1 %v6760_v34  ;;  %v7961_v34 = vrot.slane %v4015_v28, 1  ;;  %v6891_v28 = vld [vmem:[%s7400_s19 + $0x604] ss:$12 sps:$4 sm:$0xff]  }
 0x321   : > { %6025 = vmatpush3.bf16.msra.mxu0 %v6764_v35  ;;  %3841 = vmatprep.subr.bf16.mxu1 %v6767_v37  ;;  %v6825_v35 = vld [vmem:[%s7400_s19 + $0x3f4] ss:$12 sps:$4 sm:$0xff]   ;;  %v6823_v37 = vld [vmem:[%s7400_s19 + $0x3f0] ss:$12 sps:$4 sm:$0xff]  }
 0x322   : > { %6026 = vmatprep.subr.bf16.mxu0 %v6768_v39  ;;  %v6828_v39 = vld [vmem:[%s7400_s19 + $0x40c] ss:$12 sps:$4 sm:$0xff]  }
 0x324   : > { %3842 = vmatpush1.bf16.msra.mxu1 %v6765_v40  ;;  %v6831_v40 = vld [vmem:[%s7400_s19 + $0x424] ss:$12 sps:$4 sm:$0xff]  }
 0x325   : > { %6027 = vmatpush3.bf16.msra.mxu0 %v6769_v41  ;;  %3843 = vmatprep.subr.bf16.mxu1 %v6772_v42  ;;  %v6829_v41 = vld [vmem:[%s7400_s19 + $0x420] ss:$12 sps:$4 sm:$0xff]   ;;  %v6834_v42 = vld [vmem:[%s7400_s19 + $0x43c] ss:$12 sps:$4 sm:$0xff]  }
 0x326   : > { %6028 = vmatprep.subr.bf16.mxu0 %v6773_v43  ;;  %v6832_v43 = vld [vmem:[%s7400_s19 + $0x438] ss:$12 sps:$4 sm:$0xff]  }
 0x328   : > { %3844 = vmatpush1.bf16.msra.mxu1 %v6770_v46  ;;  %v6837_v46 = vld [vmem:[%s7400_s19 + $0x454] ss:$12 sps:$4 sm:$0xff]  }
 0x329   : > { %6029 = vmatpush3.bf16.msra.mxu0 %v6774_v47  ;;  %3845 = vmatprep.subr.bf16.mxu1 %v6777_v26  ;;  %v6835_v47 = vld [vmem:[%s7400_s19 + $0x450] ss:$12 sps:$4 sm:$0xff]   ;;  %v6840_v26 = vld [vmem:[%s7400_s19 + $0x46c] ss:$12 sps:$4 sm:$0xff]  }
 0x32a   : > { %6030 = vmatprep.subr.bf16.mxu0 %v6778_v49  ;;  %v6838_v49 = vld [vmem:[%s7400_s19 + $0x468] ss:$12 sps:$4 sm:$0xff]  }
 0x32c   : > { %3846 = vmatpush1.bf16.msra.mxu1 %v6775_v50  ;;  %v6843_v50 = vld [vmem:[%s7400_s19 + $0x484] ss:$12 sps:$4 sm:$0xff]  }
 0x32d   : > { %6031 = vmatpush3.bf16.msra.mxu0 %v6779_v51  ;;  %3847 = vmatprep.subr.bf16.mxu1 %v6782_v52  ;;  %v6841_v51 = vld [vmem:[%s7400_s19 + $0x480] ss:$12 sps:$4 sm:$0xff]   ;;  %v6846_v52 = vld [vmem:[%s7400_s19 + $0x49c] ss:$12 sps:$4 sm:$0xff]  }
 0x32e   : > { %6032 = vmatprep.subr.bf16.mxu0 %v6783_v54  ;;  %v6844_v54 = vld [vmem:[%s7400_s19 + $0x498] ss:$12 sps:$4 sm:$0xff]  }
 0x330   : > { %3848 = vmatpush1.bf16.msra.mxu1 %v6780_v57  ;;  %v6847_v57 = vld [vmem:[%s7400_s19 + $0x4b0] ss:$12 sps:$4 sm:$0xff]  }
 0x331   : > { %6033 = vmatpush3.bf16.msra.mxu0 %v6784_v48  ;;  %3849 = vmatprep.subr.bf16.mxu1 %v6787_v58  ;;  %v6852_v48 = vld [vmem:[%s7400_s19 + $0x4cc] ss:$12 sps:$4 sm:$0xff]   ;;  %v6850_v58 = vld [vmem:[%s7400_s19 + $0x4c8] ss:$12 sps:$4 sm:$0xff]  }
 0x332   : > { %6149 = vmatprep.subr.bf16.mxu0 %v7115_v7 }
 0x334   : > { %4625 = vmatmul.mubr.bf16.vlgmr.msra.gmra.mrb[20].mxu0 %v7925_v62  ;;  %3850 = vmatpush1.bf16.msra.mxu1 %v6785_v60  ;;  %v6861_v60 = vld [vmem:[%s7400_s19 + $0x514] ss:$12 sps:$4 sm:$0xff]  }
 0x335   : > { %6150 = vmatpush3.bf16.msra.mxu0 %v6788_v61  ;;  %3851 = vmatprep.subr.bf16.mxu1 %v6791_v38  ;;  %v6859_v61 = vld [vmem:[%s7400_s19 + $0x510] ss:$12 sps:$4 sm:$0xff]   ;;  %v6864_v38 = vld [vmem:[%s7400_s19 + $0x52c] ss:$12 sps:$4 sm:$0xff]  }
 0x336   : > { %6151 = vmatprep.subr.bf16.mxu0 %v7115_v7  ;;  %6165 = vmatprep.mubr.msk.bf16.mxu0 %vm7117_vm7, %v7115_v7 }
 0x338   : > { %3852 = vmatpush1.bf16.msra.mxu1 %v6789_v63  ;;  %v6862_v63 = vld [vmem:[%s7400_s19 + $0x528] ss:$12 sps:$4 sm:$0xff]  }
 0x339   : > { %6152 = vmatpush3.bf16.msra.mxu0 %v6792_v2  ;;  %3853 = vmatprep.subr.bf16.mxu1 %v6795_v3  ;;  %v6867_v2 = vld [vmem:[%s7400_s19 + $0x544] ss:$12 sps:$4 sm:$0xff]   ;;  %v6865_v3 = vld [vmem:[%s7400_s19 + $0x540] ss:$12 sps:$4 sm:$0xff]  }
 0x33a   : > { %6153 = vmatprep.subr.bf16.mxu0 %v7115_v7 }
 0x33c   : > { %3854 = vmatpush1.bf16.msra.mxu1 %v6793_v23  ;;  %v6870_v23 = vld [vmem:[%s7400_s19 + $0x55c] ss:$12 sps:$4 sm:$0xff]  }
 0x33d   : > { %6154 = vmatpush3.bf16.msra.mxu0 %v6796_v4  ;;  %3855 = vmatprep.subr.bf16.mxu1 %v6799_v14  ;;  %v6868_v4 = vld [vmem:[%s7400_s19 + $0x558] ss:$12 sps:$4 sm:$0xff]   ;;  %v6873_v14 = vld [vmem:[%s7400_s19 + $0x574] ss:$12 sps:$4 sm:$0xff]  }
 0x33e   : > { %6155 = vmatprep.subr.bf16.mxu0 %v7115_v7 }
 0x340   : > { %3856 = vmatpush1.bf16.msra.mxu1 %v6797_v55  ;;  %v6871_v55 = vld [vmem:[%s7400_s19 + $0x570] ss:$12 sps:$4 sm:$0xff]  }
 0x341   : > { %6156 = vmatpush3.bf16.msra.mxu0 %v6800_v5  ;;  %3857 = vmatprep.subr.bf16.mxu1 %v6803_v6  ;;  %v6876_v5 = vld [vmem:[%s7400_s19 + $0x58c] ss:$12 sps:$4 sm:$0xff]   ;;  %v6874_v6 = vld [vmem:[%s7400_s19 + $0x588] ss:$12 sps:$4 sm:$0xff]  }
 0x342   : > { %6157 = vmatprep.subr.bf16.mxu0 %v7115_v7 }
 0x344   : > { %3858 = vmatpush1.bf16.msra.mxu1 %v6801_v10  ;;  %v6879_v10 = vld [vmem:[%s7400_s19 + $0x5a4] ss:$12 sps:$4 sm:$0xff]  }
 0x345   : > { %6158 = vmatpush3.bf16.msra.mxu0 %v6804_v11  ;;  %3859 = vmatprep.subr.bf16.mxu1 %v6807_v13  ;;  %v6877_v11 = vld [vmem:[%s7400_s19 + $0x5a0] ss:$12 sps:$4 sm:$0xff]   ;;  %v6882_v13 = vld [vmem:[%s7400_s19 + $0x5bc] ss:$12 sps:$4 sm:$0xff]  }
 0x346   : > { %6159 = vmatprep.subr.bf16.mxu0 %v7115_v7 }
 0x348   : > { %3860 = vmatpush1.bf16.msra.mxu1 %v6805_v15  ;;  %v6880_v15 = vld [vmem:[%s7400_s19 + $0x5b8] ss:$12 sps:$4 sm:$0xff]  }
 0x349   : > { %6160 = vmatpush3.bf16.msra.mxu0 %v6808_v16  ;;  %3861 = vmatprep.subr.bf16.mxu1 %v6811_v17  ;;  %v6885_v16 = vld [vmem:[%s7400_s19 + $0x5d4] ss:$12 sps:$4 sm:$0xff]  }
 0x34a   : > { %6161 = vmatprep.subr.bf16.mxu0 %v7115_v7 }
 0x34c   : > { %3862 = vmatpush1.bf16.msra.mxu1 %v6809_v19 }
 0x34d   : > { %6162 = vmatpush3.bf16.msra.mxu0 %v6812_v20  ;;  %3863 = vmatprep.subr.bf16.mxu1 %v6815_v21 }
 0x34e   : > { %6163 = vmatprep.subr.bf16.mxu0 %v7115_v7  ;;  %v6820_v7 = vld [vmem:[%s7400_s19 + $0x3d8] ss:$12 sps:$4 sm:$0xff]  }
 0x350   : > { %3864 = vmatpush1.bf16.msra.mxu1 %v6813_v12 }
 0x351   : > { %6164 = vmatpush3.bf16.msra.mxu0 %v6816_v30  ;;  %3876 = vmatprep.subr.bf16.mxu1 %v6819_v31  ;;  %v6888_v30 = vld [vmem:[%s7400_s19 + $0x5ec] ss:$12 sps:$4 sm:$0xff]  }
 0x353   : > { %3866 = vmatmul.mubr.bf16.vlgmr.msra.gmra.mrb[12].mxu1 %v7844_v36  ;;  %v6826_v36 = vld [vmem:[%s7400_s19 + $0x408] ss:$12 sps:$4 sm:$0xff]  }
 0x354   : > { %6166 = vmatmul.mubr.bf16.vlgmr.msra.gmra.mrb[24].mxu0 %v7961_v34  ;;  %3877 = vmatpush1.bf16.msra.mxu1 %v6817_v32  ;;  %v6889_v32 = vld [vmem:[%s7400_s19 + $0x600] ss:$12 sps:$4 sm:$0xff]  }
 0x355   : > { %3878 = vmatprep.subr.bf16.mxu1 %v6822_v33  ;;  %3908 = vmatprep.mubr.bf16.mxu1 %v7118_v44  ;;  %v6894_v33 = vld [vmem:[%s7400_s19 + $0x61c] ss:$12 sps:$4 sm:$0xff]  }
 0x358   : > { %3879 = vmatpush1.bf16.msra.mxu1 %v6820_v7  ;;  %v6892_v7 = vld [vmem:[%s7400_s19 + $0x618] ss:$12 sps:$4 sm:$0xff]  }
 0x359   : > { %3880 = vmatprep.subr.bf16.mxu1 %v6825_v35  ;;  %v6897_v35 = vld [vmem:[%s7400_s19 + $0x634] ss:$12 sps:$4 sm:$0xff]  }
 0x35c   : > { %3881 = vmatpush1.bf16.msra.mxu1 %v6823_v37  ;;  %v6895_v37 = vld [vmem:[%s7400_s19 + $0x630] ss:$12 sps:$4 sm:$0xff]  }
 0x35d   : > { %3882 = vmatprep.subr.bf16.mxu1 %v6828_v39  ;;  %v6900_v39 = vld [vmem:[%s7400_s19 + $0x64c] ss:$12 sps:$4 sm:$0xff]  }
 0x360   : > { %3883 = vmatpush1.bf16.msra.mxu1 %v6826_v36  ;;  %v6898_v36 = vld [vmem:[%s7400_s19 + $0x648] ss:$12 sps:$4 sm:$0xff]  }
 0x361   : > { %3884 = vmatprep.subr.bf16.mxu1 %v6831_v40  ;;  %v6903_v40 = vld [vmem:[%s7400_s19 + $0x664] ss:$12 sps:$4 sm:$0xff]  }
 0x364   : > { %3885 = vmatpush1.bf16.msra.mxu1 %v6829_v41  ;;  %v6906_v41 = vld [vmem:[%s7400_s19 + $0x67c] ss:$12 sps:$4 sm:$0xff]  }
 0x365   : > { %3886 = vmatprep.subr.bf16.mxu1 %v6834_v42  ;;  %v6909_v42 = vld [vmem:[%s7400_s19 + $0x694] ss:$12 sps:$4 sm:$0xff]  }
 0x368   : > { %3887 = vmatpush1.bf16.msra.mxu1 %v6832_v43 }
 0x369   : > { %3888 = vmatprep.subr.bf16.mxu1 %v6837_v46 }
 0x36c   : > { %3889 = vmatpush1.bf16.msra.mxu1 %v6835_v47 }
 0x36d   : > { %3890 = vmatprep.subr.bf16.mxu1 %v6840_v26 }
 0x370   : > { %3891 = vmatpush1.bf16.msra.mxu1 %v6838_v49  ;;  %v6907_v49 = vld [vmem:[%s7400_s19 + $0x690] ss:$12 sps:$4 sm:$0xff]  }
 0x371   : > { %4506 = vmatprep.subr.bf16.mxu1 %v6843_v50 }
 0x373   : > { %3909 = vmatmul.mubr.bf16.vlgmr.msra.gmra.mrb[12].mxu1 %v7884_v18  ;;  %v6855_v18 = vld [vmem:[%s7400_s19 + $0x4e4] ss:$12 sps:$4 sm:$0xff]  }
 0x374   : > { %4507 = vmatpush1.bf16.msra.mxu1 %v6841_v51  ;;  %4538 = vmatprep.mubr.bf16.mxu1 %v7891_v45  ;;  %v6858_v45 = vld [vmem:[%s7400_s19 + $0x4fc] ss:$12 sps:$4 sm:$0xff]   ;;  %v6912_v51 = vld [vmem:[%s7400_s19 + $0x6ac] ss:$12 sps:$4 sm:$0xff]  }
 0x375   : > { %4508 = vmatprep.subr.bf16.mxu1 %v6846_v52 }
 0x378   : > { %4509 = vmatpush1.bf16.msra.mxu1 %v6844_v54  ;;  %v6910_v54 = vld [vmem:[%s7400_s19 + $0x6a8] ss:$12 sps:$4 sm:$0xff]  }
 0x379   : > { %4510 = vmatprep.subr.bf16.mxu1 %v6849_v56  ;;  %v2639_v56 = vld [vmem:[%s7402_s30] sm:$0x7] }
 0x37c   : > { %4511 = vmatpush1.bf16.msra.mxu1 %v6847_v57  ;;  %v3309_v57 = vrot.slane %v2639_v56, %v1227_v24 }
 0x37d   : > { %4512 = vmatprep.subr.bf16.mxu1 %v6852_v48 }
 0x380   : > { %4513 = vmatpush1.bf16.msra.mxu1 %v6850_v58 }
 0x381   : > { %4514 = vmatprep.subr.bf16.mxu1 %v6855_v18 }
 0x384   : > { %4515 = vmatpush1.bf16.msra.mxu1 %v6853_v53 }
 0x385   : > { %4516 = vmatprep.subr.bf16.mxu1 %v6858_v45 }
 0x388   : > { %4517 = vmatpush1.bf16.msra.mxu1 %v6856_v59 }
 0x389   : > { %4518 = vmatprep.subr.bf16.mxu1 %v6861_v60 }
 0x38c   : > { %4519 = vmatpush1.bf16.msra.mxu1 %v6859_v61 }
 0x38d   : > { %4520 = vmatprep.subr.bf16.mxu1 %v6864_v38 }
 0x390   : > { %4521 = vmatpush1.bf16.msra.mxu1 %v6862_v63 }
 0x391   : > { %4522 = vmatprep.subr.bf16.mxu1 %v6867_v2 }
 0x394   : > { %4523 = vmatpush1.bf16.msra.mxu1 %v6865_v3 }
 0x395   : > { %4524 = vmatprep.subr.bf16.mxu1 %v6870_v23 }
 0x398   : > { %4525 = vmatpush1.bf16.msra.mxu1 %v6868_v4 }
 0x399   : > { %4526 = vmatprep.subr.bf16.mxu1 %v6873_v14 }
 0x39c   : > { %4527 = vmatpush1.bf16.msra.mxu1 %v6871_v55 }
 0x39d   : > { %4528 = vmatprep.subr.bf16.mxu1 %v6876_v5 }
 0x3a0   : > { %4529 = vmatpush1.bf16.msra.mxu1 %v6874_v6 }
 0x3a1   : > { %4530 = vmatprep.subr.bf16.mxu1 %v6879_v10 }
 0x3a4   : > { %4531 = vmatpush1.bf16.msra.mxu1 %v6877_v11 }
 0x3a5   : > { %4532 = vmatprep.subr.bf16.mxu1 %v6882_v13  ;;  %v4682_v13 = vld [vmem:[#allocation2 + $0x10] sm:$0xfe] }
 0x3a6   : > { %v5972_v17 = vpop.f32.mrb[8].mxu0 }
 0x3a7   : > { %v5973_v19 = vpop.f32.mrb[9].mxu0 }
 0x3a8   : > { %v5974_v20 = vadd.f32 %v5973_v19, %v5972_v17  ;;  %4533 = vmatpush1.bf16.msra.mxu1 %v6880_v15  ;;  %v5975_v21 = vpop.f32.mrb[10].mxu0  ;;  %v4685_v15 = vld [vmem:[#allocation2 + $0x28] sm:$0x7f] }
 0x3a9   : > { %v5976_v12 = vpop.f32.mrb[11].mxu0  ;;  %4534 = vmatprep.subr.bf16.mxu1 %v6885_v16  ;;  %v4699_v16 = vrot.slane %v4682_v13, 1  ;;  %v4700_v17 = vrot.slane %v4685_v15, 1 }
 0x3aa   : > { %v5977_v31 = vadd.f32 %v5976_v12, %v5975_v21 }
 0x3ac   : > { %4535 = vmatpush1.bf16.msra.mxu1 %v6883_v29  ;;  %v4701_v29 = vsel %vm4692_vm9, %v4699_v16, %v4700_v17 }
 0x3ad   : > { %4536 = vmatprep.subr.bf16.mxu1 %v6888_v30 }
 0x3b0   : > { %4537 = vmatpush1.bf16.msra.mxu1 %v6886_v25 }
 0x3b1   : > { %4549 = vmatprep.subr.bf16.mxu1 %v6891_v28 }
 0x3b3   : > { %4539 = vmatmul.mubr.bf16.vlgmr.msra.gmra.mrb[12].mxu1 %v7925_v62  ;;  %v6901_v62 = vld [vmem:[%s7400_s19 + $0x660] ss:$12 sps:$4 sm:$0xff]  }
 0x3b4   : > { %4550 = vmatpush1.bf16.msra.mxu1 %v6889_v32  ;;  %4581 = vmatprep.mubr.bf16.mxu1 %v7118_v44  ;;  %v6904_v44 = vld [vmem:[%s7400_s19 + $0x678] ss:$12 sps:$4 sm:$0xff]  }
 0x3b5   : > { %4551 = vmatprep.subr.bf16.mxu1 %v6894_v33 }
 0x3b8   : > { %4552 = vmatpush1.bf16.msra.mxu1 %v6892_v7 }
 0x3b9   : > { %4553 = vmatprep.subr.bf16.mxu1 %v6897_v35 }
 0x3bc   : > { %4554 = vmatpush1.bf16.msra.mxu1 %v6895_v37  ;;  %v4680_v37 = vld [vmem:[#allocation2] sm:$0xfe] }
 0x3bd   : > { %4555 = vmatprep.subr.bf16.mxu1 %v6900_v39  ;;  %v4683_v39 = vld [vmem:[#allocation2 + $0x18] sm:$0x7f] }
 0x3c0   : > { %4556 = vmatpush1.bf16.msra.mxu1 %v6898_v36  ;;  %v4681_v36 = vld [vmem:[#allocation2 + $0x8] sm:$0xfe] }
 0x3c1   : > { %4557 = vmatprep.subr.bf16.mxu1 %v6903_v40  ;;  %v4684_v40 = vld [vmem:[#allocation2 + $0x20] sm:$0x7f] }
 0x3c4   : > { %4558 = vmatpush1.bf16.msra.mxu1 %v6901_v62  ;;  %v4693_v62 = vrot.slane %v4680_v37, 1 }
 0x3c5   : > { %4559 = vmatprep.subr.bf16.mxu1 %v6906_v41  ;;  %v4694_v41 = vrot.slane %v4683_v39, 1 }
 0x3c6   : > { %v6003_v43 = vpop.f32.mrb[12].mxu0 }
 0x3c7   : > { %v6004_v46 = vpop.f32.mrb[13].mxu0 }
 0x3c8   : > { %v6005_v47 = vadd.f32 %v6004_v46, %v6003_v43  ;;  %v6006_v26 = vpop.f32.mrb[14].mxu0  ;;  %4560 = vmatpush1.bf16.msra.mxu1 %v6904_v44  ;;  %v3301_v44 = vrot.slane %v2639_v56, %v1219_v22  ;;  %v4697_v43 = vrot.slane %v4684_v40, 1  ;;  %v3305_v46 = vrot.slane %v2639_v56, %v1223_v27 }
 0x3c9   : > { %v6007_v50 = vpop.f32.mrb[15].mxu0  ;;  %4561 = vmatprep.subr.bf16.mxu1 %v6909_v42  ;;  %v4696_v42 = vrot.slane %v4681_v36, 1 }
 0x3ca   : > { %v6008_v52 = vadd.f32 %v6007_v50, %v6006_v26  ;;  %v4695_v26 = vsel %vm4692_vm9, %v4693_v62, %v4694_v41 }
 0x3cc   : > { %4562 = vmatpush1.bf16.msra.mxu1 %v6907_v49 }
 0x3cd   : > { %4563 = vmatprep.subr.bf16.mxu1 %v6912_v51  ;;  %v4698_v51 = vsel %vm4692_vm9, %v4696_v42, %v4697_v43 }
 0x3d0   : > { %4564 = vmatpush1.bf16.msra.mxu1 %v6910_v54 }
 0x3d3   : > { %4582 = vmatmul.mubr.bf16.vlgmr.msra.gmra.mrb[12].mxu1 %v7961_v34 }
 0x3e6   : > { %v3290_v48 = vpop.f32.mrb[16].mxu1  ;;  %v3994_v58 = vpop.f32.mrb[16].mxu0 }
 0x3e7   : > { %v3291_v18 = vadd.f32 %v5974_v20, %v3290_v48  ;;  %v3995_v53 = vadd.f32 %v6005_v47, %v3994_v58  ;;  %v6127_v45 = vpop.f32.mrb[17].mxu1  ;;  %v6147_v59 = vpop.f32.mrb[17].mxu0 }
 0x3e8   : > { %v3293_v60 = vpop.f32.mrb[18].mxu1  ;;  %v3997_v61 = vpop.f32.mrb[18].mxu0 }
 0x3e9   : > { %v3315_v38 = vadd.f32 %v3309_v57, %v3291_v18  ;;  %v3294_v63 = vadd.f32 %v5977_v31, %v3293_v60  ;;  %v3998_v2 = vadd.f32 %v6008_v52, %v3997_v61  ;;  %v6128_v3 = vpop.f32.mrb[19].mxu1  ;;  %v6148_v23 = vpop.f32.mrb[19].mxu0 }
 0x3eb   : > { %v4003_v4 = vadd.f32 %v3995_v53, %v3315_v38  ;;  %v3318_v14 = vadd.f32 %v3309_v57, %v3294_v63 }
 0x3ed   : > { %v4006_v34 = vadd.f32 %v3998_v2, %v3318_v14 }
 0x407   : > { %v6034_v55 = vpop.f32.mrb[20].mxu0 }
 0x408   : > { %v6035_v5 = vpop.f32.mrb[21].mxu0 }
 0x409   : > { %v6036_v6 = vadd.f32 %v6035_v5, %v6034_v55  ;;  %v6037_v24 = vpop.f32.mrb[22].mxu0 }
 0x40a   : > { %v6038_v10 = vpop.f32.mrb[23].mxu0 }
 0x40b   : > { %v6039_v11 = vadd.f32 %v6038_v10, %v6037_v24 }
 0x427   : > { %v4667_v19 = vpop.f32.mrb[24].mxu0 }
 0x428   : > { %v4668_v20 = vadd.f32 %v6036_v6, %v4667_v19  ;;  %v6167_v21 = vpop.f32.mrb[25].mxu0 }
 0x429   : > { %v4670_v12 = vpop.f32.mrb[26].mxu0 }
 0x42a   : > { %v4676_v30 = vadd.f32 %v4668_v20, %v4003_v4  ;;  %v4671_v31 = vadd.f32 %v6039_v11, %v4670_v12  ;;  %v6168_v25 = vpop.f32.mrb[27].mxu0 }
 0x42c   : > { %v4710_v28 = vadd.f32 %v4701_v29, %v4676_v30  ;;  %v4679_v32 = vadd.f32 %v4671_v31, %v4006_v34 }
 0x42e   : > { %v4716_v33 = vmul.f32 %v7433_v8, %v4710_v28  ;;  %v4713_v7 = vadd.f32 %v4700_v17, %v4679_v32 }
 0x430   : > { %v8038_v35 = vmul.f32 %v7436_v9, %v4713_v7  ;;  %v4732_v38 = vrot.slane (!%p5857_p6), %v4716_v33, 7 }
 0x432   : > { %v4737_v3 = vrot.slane (!%p5857_p6), %v8038_v35, 7  ;;  %4747 = vst [vmem:[#allocation2 + $0x10] sm:$0xfe] (!%p5857_p6), %v4732_v38 }
 0x4a6   : > { %v4583_v47 = vpop.f32.mrb[12].mxu1 }
 0x4a7   : > { %v6181_v49 = vadd.f32 %v4583_v47, %v3301_v44  ;;  %v4585_v50 = vpop.f32.mrb[13].mxu1 }
 0x4a8   : > { %v6182_v52 = vadd.f32 %v4585_v50, %v3305_v46  ;;  %v4587_v54 = vpop.f32.mrb[14].mxu1  ;;  %4723 = sbr.rel (%p5857_p6) target bundleno = 1204 (0x4b4), region = 68 }
 0x4a9   : > { %v4708_v57 = vadd.f32 %v6181_v49, %v4695_v26  ;;  %v6183_v48 = vadd.f32 %v4587_v54, %v3301_v44  ;;  %v4589_v58 = vpop.f32.mrb[15].mxu1 }
 0x4aa   : > { %v4709_v18 = vadd.f32 %v6182_v52, %v4698_v51  ;;  %v6184_v53 = vadd.f32 %v4589_v58, %v3305_v46 }
 0x4ab   : > { %v4714_v22 = vmul.f32 %v7433_v8, %v4708_v57  ;;  %v4711_v45 = vadd.f32 %v6183_v48, %v4694_v41 }
 0x4ac   : > { %v4715_v1 = vmul.f32 %v7433_v8, %v4709_v18  ;;  %v4712_v27 = vadd.f32 %v6184_v53, %v4697_v43 }
 0x4ad   : > { %v4717_v56 = vmul.f32 %v7436_v9, %v4711_v45  ;;  %v4730_v60 = vrot.slane (!%p5857_p6), %v4714_v22, 7 }
 0x4ae   : > { %v4718_v59 = vmul.f32 %v7436_v9, %v4712_v27  ;;  %v4731_v61 = vrot.slane (!%p5857_p6), %v4715_v1, 7  ;;  %v4738_v9 = vsel (!%p5857_p6), %vm2617_vm8, %v4732_v38, %v4737_v3 }
 0x4af   : > { %v4733_v63 = vrot.slane %v4717_v56, 7  ;;  %4745 = vst [vmem:[#allocation2] sm:$0xfe] %v4730_v60  ;;  %4750 = vst [vmem:[#allocation2 + $0x28] sm:$0x7f] %v4738_v9 }
 0x4b0   : > { %v4735_v2 = vrot.slane %v4718_v59, 7  ;;  %4746 = vst [vmem:[#allocation2 + $0x8] sm:$0xfe] %v4731_v61 }
 0x4b1   : > { %v4734_v8 = vsel %vm2617_vm8, %v4730_v60, %v4733_v63 }
 0x4b2   : > { %4748 = vst [vmem:[#allocation2 + $0x18] sm:$0x7f] %v4734_v8  ;;  %v4736_v23 = vsel %vm2617_vm8, %v4731_v61, %v4735_v2 }
 0x4b3   : > { %4749 = vst [vmem:[#allocation2 + $0x20] sm:$0x7f] %v4736_v23 }
 0x4b4 PF: > { %p5858_p7 = scmp.ne.s32.totalorder %s7091_s27, 1 }
 0x4b5   : > { %vm4757_vm10 = vcmp.lt.s32.totalorder (!%p5858_p7), %v494_v0, 384  ;;  %v4770_v4 = vrot.slane (!%p5858_p7), %v4714_v22, 7  ;;  %v4771_v14 = vrot.slane (!%p5858_p7), %v4715_v1, 7  ;;  %v4796_v34 = vld [vmem:[%s7420_s28] sm:$0xfe] (!%p5858_p7)  ;;  %v7119_v55 = vmov (!%p5858_p7), 0.0  }
 0x4b6   : > { %4754 = sbr.rel (%p5858_p7) target bundleno = 1216 (0x4c0), region = 72  ;;  %5859 = vst.msk [vmem:[%s7430_s17 + $0x1f] ss:$8 sm:$0x7] (!%p5858_p7), %vm4757_vm10, %v7119_v55  ;;  %v4772_v5 = vrot.slane (!%p5858_p7), %v4716_v33, 7  ;;  %v4773_v10 = vrot.slane (!%p5858_p7), %v4717_v56, 7 }
 0x4b7   : > { %4759 = vst.msk [vmem:[%s7430_s17] ss:$8 sm:$0x7] (!%p5858_p7), %vm4757_vm10, %v7119_v55  ;;  %4791 = vst.msk [vmem:[%s7425_s11] ss:$8 sm:$0x7] (!%p5858_p7), %vm4757_vm10, %v7119_v55  ;;  %v4802_v0 = vadd.f32 (!%p5858_p7), %v4796_v34, %v4770_v4 }
 0x4b8   : > { %5860 = vst.msk [vmem:[%s7425_s11 + $0x1f] ss:$8 sm:$0x7] (!%p5858_p7), %vm4757_vm10, %v7119_v55  ;;  %v4797_v6 = vld [vmem:[%s7420_s28 + $0x8] sm:$0xfe] (!%p5858_p7)  ;;  %4785 = vst [vmem:[%s7430_s17] sm:$0xfe] (!%p5858_p7), %v4770_v4  ;;  %v4774_v20 = vsel (!%p5858_p7), %vm2617_vm8, %v4770_v4, %v4773_v10 }
 0x4b9   : > { %v4798_v24 = vld [vmem:[%s7420_s28 + $0x10] sm:$0xfe] (!%p5858_p7)  ;;  %4786 = vst [vmem:[%s7430_s17 + $0x8] sm:$0xfe] (!%p5858_p7), %v4771_v14  ;;  %v4803_v11 = vadd.f32 (!%p5858_p7), %v4797_v6, %v4771_v14  ;;  %v4799_v13 = vld [vmem:[%s7420_s28 + $0x18] sm:$0x7f] (!%p5858_p7) }
 0x4ba   : > { %v4775_v15 = vrot.slane (!%p5858_p7), %v4718_v59, 7  ;;  %v4800_v16 = vld [vmem:[%s7420_s28 + $0x20] sm:$0x7f] (!%p5858_p7)  ;;  %v4777_v17 = vrot.slane (!%p5858_p7), %v8038_v35, 7  ;;  %4787 = vst [vmem:[%s7430_s17 + $0x10] sm:$0xfe] (!%p5858_p7), %v4772_v5  ;;  %v4804_v19 = vadd.f32 (!%p5858_p7), %v4798_v24, %v4772_v5  ;;  %v4805_v29 = vadd.f32 (!%p5858_p7), %v4799_v13, %v4774_v20 }
 0x4bb   : > { %v4801_v21 = vld [vmem:[%s7420_s28 + $0x28] sm:$0x7f] (!%p5858_p7)  ;;  %4808 = vst [vmem:[%s7425_s11] sm:$0xfe] (!%p5858_p7), %v4802_v0  ;;  %4809 = vst [vmem:[%s7425_s11 + $0x8] sm:$0xfe] (!%p5858_p7), %v4803_v11 }
 0x4bc   : > { %4788 = vst [vmem:[%s7430_s17 + $0x18] sm:$0x7f] (!%p5858_p7), %v4774_v20  ;;  %v4776_v12 = vsel (!%p5858_p7), %vm2617_vm8, %v4771_v14, %v4775_v15  ;;  %v4778_v30 = vsel (!%p5858_p7), %vm2617_vm8, %v4772_v5, %v4777_v17  ;;  %4810 = vst [vmem:[%s7425_s11 + $0x10] sm:$0xfe] (!%p5858_p7), %v4804_v19 }
 0x4bd   : > { %4789 = vst [vmem:[%s7430_s17 + $0x20] sm:$0x7f] %v4776_v12  ;;  %v4806_v31 = vadd.f32 %v4800_v16, %v4776_v12  ;;  %4790 = vst [vmem:[%s7430_s17 + $0x28] sm:$0x7f] %v4778_v30  ;;  %v4807_v25 = vadd.f32 %v4801_v21, %v4778_v30 }
 0x4be   : > { %4811 = vst [vmem:[%s7425_s11 + $0x18] sm:$0x7f] %v4805_v29 }
 0x4bf   : > { %4812 = vst [vmem:[%s7425_s11 + $0x20] sm:$0x7f] %v4806_v31  ;;  %4813 = vst [vmem:[%s7425_s11 + $0x28] sm:$0x7f] %v4807_v25 }
 0x4c0 PF: > { %s27_s8 = sadd.s32 1, %s7107_s8   ;;  %s8142_s27 = sld [smem:[#allocation17_spill]] }
 0x4c1   : > { %p24_p3 = scmp.ge.s32.totalorder %s27_s8, 6   ;;  %s8143_s28 = sld [smem:[#allocation14_spill]] }
 0x4c2   : > { %s8144_s3 = sld [smem:[#allocation15_spill]]  ;;  %s8145_s30 = sld [smem:[#allocation16_spill]] }
 0x4c3   : > { %s8146_s24 = smov %s7083_s25  ;;  %s8147_s25 = smov %s7087_s26 }
 0x4c4   :  { %26 = sbr.rel (!%p24_p3) target bundleno = 12 (0xc), region = 158 }
 0x4c6   : > { %s8148_s26 = smov %s8142_s27  ;;  %s8149_s27 = smov %s7099_s29 }
 0x4c8   : > { %s8150_s29 = smov %s8144_s3 }
 0x4cb   :  { %4857 = vsyncpa [#allocation5], 1 }
 0x4cc   :  { %4859 = vsyncpa [#allocation5 + $0x1], 1 }
 0x4cd   :  { %4860 = vsyncpa [#allocation7], 1 }
 0x4ce   :  { %4862 = vsyncpa [#allocation7 + $0x1], 1 }
 0x4cf   :  { %4863 = vsyncpa [#allocation10], 1 }
 0x4d0   :  { %4865 = vsyncpa [#allocation10 + $0x1], 1 }

</bundles_post_ra>
